<compile_context>
chip_gen: v7x
topology: tpu7x:2x2x1
jax: 0.10.0
libtpu: 0.0.40
codegen_flags: <defaults>
</compile_context>

<pallas_src>
import functools
import math

import jax
import jax.numpy as jnp
from jax.experimental import pallas as pl
from jax.experimental.pallas import tpu as pltpu

_VMEM_LIMIT = 48 * 1024 * 1024    # Mosaic scoped-VMEM limit (v7x: 64 MiB physical)
_VMEM_BUDGET = 40 * 1024 * 1024   # footprint budget used by the tile chooser


def _round_up(x, m):
    return (x + m - 1) // m * m


# ----------------------------------------------------------------------------
# Kernel 1: tiled matmul.  Epilogue applies the activation (no-BN layer) or
# emits per-M-tile column sum / sum-of-squares for two-pass BatchNorm and
# stores the pre-BN activation in bf16.
# ----------------------------------------------------------------------------
def _mm_kernel(a_ref, b_ref, *refs, act, with_stats, single_k):
    if with_stats:
        y_ref, stats_ref = refs[0], refs[1]
        scratch = refs[2:]
    else:
        y_ref = refs[0]
        scratch = refs[1:]

    def epilogue(y):
        if with_stats:
            # Stats from the f32 result, stored with direct sub-slice writes
            # (no concatenate / relayout on the critical epilogue).
            stats_ref[0, 0:1, :] = jnp.sum(y, axis=0, keepdims=True)
            stats_ref[0, 1:2, :] = jnp.sum(y * y, axis=0, keepdims=True)
        if act == "relu":
            y = jnp.maximum(y, 0.0)
        elif act == "tanh":
            y = jnp.tanh(y)
        y_ref[...] = y.astype(y_ref.dtype)

    if single_k:
        # Full-K resident weight panel: one MXU pass, no accumulator RMW.
        epilogue(jnp.dot(a_ref[...], b_ref[...],
                         preferred_element_type=jnp.float32))
    else:
        acc_ref = scratch[0]
        k = pl.program_id(2)

        @pl.when(k == 0)
        def _():
            acc_ref[...] = jnp.zeros_like(acc_ref)

        acc_ref[...] += jnp.dot(a_ref[...], b_ref[...],
                                preferred_element_type=jnp.float32)

        @pl.when(k == pl.num_programs(2) - 1)
        def _():
            epilogue(acc_ref[...])


# ----------------------------------------------------------------------------
# Kernel 2: fused BatchNorm apply (scale/shift) + ReLU, bf16 in / bf16 out.
# ----------------------------------------------------------------------------
def _bn_act_kernel(y_ref, sc_ref, sh_ref, o_ref, *, act):
    y = y_ref[...].astype(jnp.float32) * sc_ref[...] + sh_ref[...]
    if act == "relu":
        y = jnp.maximum(y, 0.0)
    elif act == "tanh":
        y = jnp.tanh(y)
    o_ref[...] = y.astype(o_ref.dtype)


# ----------------------------------------------------------------------------
# VMEM-aware tile chooser (Kp, Np already padded; returns tiles dividing them).
# ----------------------------------------------------------------------------
def _choose_tiles(M, Kp, Np, out_bytes):
    Mp = _round_up(max(M, 1), 16)

    def fits(tm, tk, tn, kt):
        a = 2 * tm * tk * 2            # double-buffered bf16 A tile
        w = 2 * tk * tn * 2            # double-buffered bf16 W tile
        y = 2 * tm * tn * out_bytes    # double-buffered output tile
        acc = tm * tn * 4 if kt > 1 else 0
        st = 4 * 2 * tn * 4            # stats blocks (generous)
        return a + w + y + acc + st <= _VMEM_BUDGET

    tm_cands = [t for t in (1024, 512, 256, 128, 64, 32, 16) if Mp % t == 0]
    # Prefer >= 2 M-tiles so v7x's two TensorCores both get work.
    tm_cands = [t for t in tm_cands if Mp // t >= 2] or tm_cands
    tn_cands = [Np] + [t for t in (2048, 1024, 512, 256, 128)
                       if t < Np and Np % t == 0]
    tk_cands = [Kp] + [t for t in (2048, 1024, 512, 256, 128)
                       if t < Kp and Kp % t == 0]

    for tk in tk_cands:                 # prefer full-K (no accumulator RMW)
        for tn in tn_cands:             # then full-N (A streamed once)
            for tm in tm_cands:         # then the largest fitting tm
                if fits(tm, tk, tn, Kp // tk):
                    return tm, Mp, tk, tn
    return 16, Mp, 128, 128             # always legal fallback


# ----------------------------------------------------------------------------
# pallas_call wrappers
# ----------------------------------------------------------------------------
def _matmul(Ap, Wp, tm, tn, tk, *, act, with_stats, out_dtype):
    Mp, Kp = Ap.shape
    _, Np = Wp.shape
    mt, nt, kt = Mp // tm, Np // tn, Kp // tk
    single_k = kt == 1

    out_shape = [jax.ShapeDtypeStruct((Mp, Np), out_dtype)]
    out_specs = [pl.BlockSpec((tm, tn), lambda i, j, k: (i, j))]
    if with_stats:
        out_shape.append(jax.ShapeDtypeStruct((mt, 2, Np), jnp.float32))
        out_specs.append(pl.BlockSpec((1, 2, tn), lambda i, j, k: (i, 0, j)))

    scratch = [] if single_k else [pltpu.VMEM((tm, tn), jnp.float32)]

    return pl.pallas_call(
        functools.partial(_mm_kernel, act=act, with_stats=with_stats,
                          single_k=single_k),
        out_shape=out_shape,
        grid_spec=pltpu.PrefetchScalarGridSpec(
            num_scalar_prefetch=0,
            grid=(mt, nt, kt),
            in_specs=[pl.BlockSpec((tm, tk), lambda i, j, k: (i, k)),
                      pl.BlockSpec((tk, tn), lambda i, j, k: (k, j))],
            out_specs=out_specs,
            scratch_shapes=scratch,
        ),
        compiler_params=pltpu.CompilerParams(
            dimension_semantics=("parallel", "parallel", "arbitrary"),
            vmem_limit_bytes=_VMEM_LIMIT),
    )(Ap, Wp)


def _bn_act(Y, scale, shift, tm, tn, *, act):
    Mp, Np = Y.shape
    return pl.pallas_call(
        functools.partial(_bn_act_kernel, act=act),
        out_shape=jax.ShapeDtypeStruct((Mp, Np), jnp.bfloat16),
        grid_spec=pltpu.PrefetchScalarGridSpec(
            num_scalar_prefetch=0,
            grid=(Mp // tm, Np // tn),
            in_specs=[pl.BlockSpec((tm, tn), lambda i, j: (i, j)),
                      pl.BlockSpec((1, tn), lambda i, j: (0, j)),
                      pl.BlockSpec((1, tn), lambda i, j: (0, j))],
            out_specs=pl.BlockSpec((tm, tn), lambda i, j: (i, j)),
        ),
        compiler_params=pltpu.CompilerParams(
            dimension_semantics=("parallel", "parallel"),
            vmem_limit_bytes=_VMEM_LIMIT),
    )(Y, scale, shift)


def _layer_matmul(A, w_pad, gamma, beta, N, G, *, bn, act):
    """A (M,K) bf16, w_pad (Kp,Np) bf16 -> activation (M,N).

    N columns are grouped as G column-groups of Cout = N//G channels each
    (sub-pixel phases / kernel taps); BN statistics are reduced over rows AND
    groups so they match per-channel BatchNorm2d over (B, OH, OW).
    """
    M, K = A.shape
    Kp, Np = w_pad.shape
    out_bytes = 2 if bn else 4
    tm, Mp, tk, tn = _choose_tiles(M, Kp, Np, out_bytes)
    if Mp != M or Kp != K:            # tiny pad: <= 15 rows, <= 127 K columns
        A = jnp.pad(A, ((0, Mp - M), (0, Kp - K)))

    if not bn:
        Y = _matmul(A, w_pad, tm, tn, tk, act=act, with_stats=False,
                    out_dtype=jnp.float32)[0]
        return Y[:M, :N]

    Y, stats = _matmul(A, w_pad, tm, tn, tk, act=None, with_stats=True,
                       out_dtype=jnp.bfloat16)
    # Padded rows of A are all-zero and there is no conv bias, so they add 0
    # to the column sums; dividing by the true element count is exact.
    count = M * G
    col_sum = jnp.sum(stats[:, 0, :], axis=0)[:N].reshape(G, N // G)
    col_sqs = jnp.sum(stats[:, 1, :], axis=0)[:N].reshape(G, N // G)
    mean = jnp.sum(col_sum, axis=0) / count
    # E[x^2]-E[x]^2 (biased, as PyTorch); fine at the demo tolerance.
    var = jnp.sum(col_sqs, axis=0) / count - mean * mean
    scale = gamma.astype(jnp.float32) * jax.lax.rsqrt(var + 1e-5)
    shift = beta.astype(jnp.float32) - mean * scale
    scale_cols = jnp.pad(jnp.tile(scale, G), (0, Np - N)).reshape(1, Np)
    shift_cols = jnp.pad(jnp.tile(shift, G), (0, Np - N)).reshape(1, Np)
    Yn = _bn_act(Y, scale_cols, shift_cols, tm, tn, act=act)
    return Yn[:M, :N]


# ----------------------------------------------------------------------------
# ConvTranspose2d lowering (JAX glue)
# ----------------------------------------------------------------------------
def _weight_to_phase_matrix(W):
    """ConvTranspose2d (stride=2, pad=1, k=4) weight -> (9*Cin, 4*Cout).

    Sub-pixel decomposition: output pixel (2r+ph, 2c+pw) depends only on the
    3x3 input neighbourhood around (r, c) and a 2x2 subset of the kernel taps,
    so the transposed conv is ONE dense matmul over a 3x3 im2col of the
    un-dilated input -- structural zeros never reach the MXU.
      K index: (dh_idx*3 + dw_idx)*Cin + ci   (dh_idx = input row offset + 1)
      N index: (ph*2 + pw)*Cout + co          (ph/pw = output sub-pixel phase)
    """
    Cin, Cout = W.shape[0], W.shape[1]
    # (phase, input-offset-index) -> kernel tap; other combinations are zero.
    tap = {(0, 0): 3, (0, 1): 1, (1, 1): 2, (1, 2): 0}
    Wm = jnp.zeros((3, 3, Cin, 2, 2, Cout), W.dtype)
    for (ph, dh), kh in tap.items():
        for (pw, dw), kw in tap.items():
            Wm = Wm.at[dh, dw, :, ph, pw, :].set(W[:, :, kh, kw])
    return Wm.reshape(9 * Cin, 4 * Cout)


def _subpixel_patches(x):
    """3x3 im2col (pad 1) of NHWC input; pairs with _weight_to_phase_matrix."""
    B, H, W, Cin = x.shape
    xp = jnp.pad(x, ((0, 0), (1, 1), (1, 1), (0, 0)))
    pats = [xp[:, dh:dh + H, dw:dw + W, :]
            for dh in range(3) for dw in range(3)]
    return jnp.stack(pats, axis=3).reshape(B * H * W, 9 * Cin)


# ----------------------------------------------------------------------------
# Generator
# ----------------------------------------------------------------------------
def layer_specs(num_layers):
    # (stride, padding, has_bn, activation) per ConvTranspose2d layer
    specs = [(1, 0, True, "relu")]
    specs += [(2, 1, True, "relu")] * (num_layers - 1)
    specs += [(2, 1, False, "tanh")]
    return specs


def init_params(key, latent_dim, channels, feature_maps, image_size):
    num_layers = int(math.log2(image_size)) - 2
    cins, couts = [latent_dim], [feature_maps * 8]
    size_mult = 8
    for _ in range(num_layers - 1):
        new_mult = size_mult // 2
        cins.append(feature_maps * size_mult)
        couts.append(feature_maps * new_mult)
        size_mult = new_mult
    cins.append(feature_maps * size_mult)
    couts.append(channels)

    params = {}
    for li, (ci, co) in enumerate(zip(cins, couts)):
        key, k1, k2, k3 = jax.random.split(key, 4)
        params[f"w{li}"] = 0.02 * jax.random.normal(k1, (ci, co, 4, 4), jnp.float32)
        if li < len(cins) - 1:  # all but final layer have BatchNorm
            params[f"gamma{li}"] = 1.0 + 0.02 * jax.random.normal(k2, (co,), jnp.float32)
            params[f"beta{li}"] = 0.02 * jax.random.normal(k3, (co,), jnp.float32)
    return params, num_layers


def prepare_params(params, num_layers):
    """Hoisted weight prep: phase-pack / flip-free matmul form, bf16, padded."""
    specs = layer_specs(num_layers)
    arrays, meta = [], []
    for li in range(len(specs)):
        W = params[f"w{li}"]
        Cin, Cout = W.shape[0], W.shape[1]
        if li == 0:
            # 1x1 input, stride 1, pad 0: out[b,kh,kw,co] = sum_ci z*W[ci,co,kh,kw]
            Wm = jnp.transpose(W, (0, 2, 3, 1)).reshape(Cin, 16 * Cout)
            G = 16
        else:
            Wm = _weight_to_phase_matrix(W)
            G = 4
        K, N = Wm.shape
        Kp = _round_up(K, 128)
        Np = _round_up(N, 256) if N > 128 else 128   # 256-wide MXU on v6e/v7x
        Wp = jnp.pad(Wm.astype(jnp.bfloat16), ((0, Kp - K), (0, Np - N)))
        arrays.append({"w": Wp,
                       "gamma": params.get(f"gamma{li}"),
                       "beta": params.get(f"beta{li}")})
        meta.append((N, G))
    return arrays, tuple(meta)


def generator_forward(z, prep, *, meta, num_layers):
    specs = layer_specs(num_layers)
    B = z.shape[0]
    x = None
    for li, (_, _, bn, act) in enumerate(specs):
        w_pad = prep[li]["w"]
        gamma, beta = prep[li]["gamma"], prep[li]["beta"]
        N, G = meta[li]
        cout = N // G
        if li == 0:
            A = z.astype(jnp.bfloat16)                          # (B, latent)
            Y = _layer_matmul(A, w_pad, gamma, beta, N, G, bn=bn, act=act)
            x = Y.reshape(B, 4, 4, cout)                        # NHWC
        else:
            Bx, H, Wd, _ = x.shape
            A = _subpixel_patches(x)                            # (B*H*W, 9*Cin)
            Y = _layer_matmul(A, w_pad, gamma, beta, N, G, bn=bn, act=act)
            x = Y.reshape(Bx, H, Wd, 2, 2, cout)                # pixel shuffle
            x = x.transpose(0, 1, 3, 2, 4, 5).reshape(Bx, 2 * H, 2 * Wd, cout)
    return jnp.transpose(x, (0, 3, 1, 2)).astype(jnp.float32)   # NCHW boundary


# Pure-JAX f32 reference (lhs-dilated conv == ConvTranspose2d) for correctness.
def reference_forward(z, params, num_layers):
    specs = layer_specs(num_layers)
    x = z[:, :, None, None].astype(jnp.float32)
    for li, (stride, pad, bn, act) in enumerate(specs):
        W = params[f"w{li}"]
        rhs = jnp.transpose(W[:, :, ::-1, ::-1], (1, 0, 2, 3))  # (Cout,Cin,4,4)
        x = jax.lax.conv_general_dilated(
            x, rhs, window_strides=(1, 1),
            padding=[(3 - pad, 3 - pad)] * 2,
            lhs_dilation=(stride, stride),
            dimension_numbers=("NCHW", "OIHW", "NCHW"))
        if bn:
            mean = jnp.mean(x, axis=(0, 2, 3), keepdims=True)
            var = jnp.mean((x - mean) ** 2, axis=(0, 2, 3), keepdims=True)
            g = params[f"gamma{li}"].reshape(1, -1, 1, 1)
            b = params[f"beta{li}"].reshape(1, -1, 1, 1)
            x = (x - mean) * jax.lax.rsqrt(var + 1e-5) * g + b
        x = jnp.maximum(x, 0.0) if act == "relu" else jnp.tanh(x)
    return x


if __name__ == "__main__":
    # Small, module-consistent config: latent_dim=32, channels=1,
    # feature_maps=16, image_size=16  ->  num_layers = log2(16) - 2 = 2,
    # i.e. 1x1 -> 4x4 -> 8x8 -> 16x16.
    LATENT, CHANNELS, FMAPS, IMG, BATCH = 32, 1, 16, 16, 2

    key = jax.random.PRNGKey(0)
    pkey, zkey = jax.random.split(key)
    params, num_layers = init_params(pkey, LATENT, CHANNELS, FMAPS, IMG)
    z = jax.random.normal(zkey, (BATCH, LATENT), jnp.float32)

    prep, meta = prepare_params(params, num_layers)   # weight prep hoisted
    fwd = jax.jit(functools.partial(generator_forward, meta=meta,
                                    num_layers=num_layers))
    out = jax.block_until_ready(fwd(z, prep))

    assert out.shape == (BATCH, CHANNELS, IMG, IMG), out.shape
    ref = jax.block_until_ready(reference_forward(z, params, num_layers))
    # bf16 MXU inputs + bf16 inter-layer / pre-BN activations vs f32 reference.
    max_err = float(jnp.max(jnp.abs(out - ref)))
    assert jnp.allclose(out, ref, rtol=5e-2, atol=5e-2), max_err

    print("KERNEL_OK")
</pallas_src>

<mosaic_0001>
module attributes {stable_mosaic.version = 11 : i64} {
  func.func @_mm_kernel(%arg0: i32, %arg1: i32, %arg2: i32, %arg3: memref<16x128xbf16, #tpu.memory_space<vmem>>, %arg4: memref<128x2048xbf16, #tpu.memory_space<vmem>>, %arg5: memref<16x2048xbf16, #tpu.memory_space<vmem>>, %arg6: memref<1x2x2048xf32, #tpu.memory_space<vmem>>) attributes {dimension_semantics = [#tpu.dimension_semantics<parallel>, #tpu.dimension_semantics<parallel>, #tpu.dimension_semantics<arbitrary>], iteration_bounds = array<i64: 1, 1, 1>, scalar_prefetch = 0 : i64, scratch_operands = 0 : i64, tpu.core_type = #tpu.core_type<tc>, window_params = [{transform_indices = @transform_0, window_bounds = array<i64: 16, 128>}, {transform_indices = @transform_1, window_bounds = array<i64: 128, 2048>}, {transform_indices = @transform_2, window_bounds = array<i64: 16, 2048>}, {transform_indices = @transform_3, window_bounds = array<i64: 1, 2, 2048>}]} {
    %c0 = arith.constant 0 : index
    %c0_0 = arith.constant 0 : index
    %0 = vector.load %arg3[%c0, %c0_0] : memref<16x128xbf16, #tpu.memory_space<vmem>>, vector<16x128xbf16>
    %c0_1 = arith.constant 0 : index
    %c0_2 = arith.constant 0 : index
    %1 = vector.load %arg4[%c0_1, %c0_2] : memref<128x2048xbf16, #tpu.memory_space<vmem>>, vector<128x2048xbf16>
    %cst = arith.constant dense<0.000000e+00> : vector<16x2048xf32>
    %2 = tpu.matmul %0, %1, %cst {dimension_numbers = #tpu.dot_dimension_numbers<[1], [0], [0], [1], [0, 0, 1, 1], [], []>} : vector<16x128xbf16>, vector<128x2048xbf16>, vector<16x2048xf32> -> vector<16x2048xf32>
    %cst_3 = arith.constant dense<0.000000e+00> : vector<2048xf32>
    %3 = vector.multi_reduction <add>, %2, %cst_3 [0] : vector<16x2048xf32> to vector<2048xf32>
    %4 = vector.shape_cast %3 : vector<2048xf32> to vector<1x2048xf32>
    %c0_4 = arith.constant 0 : index
    %c0_5 = arith.constant 0 : index
    %c0_6 = arith.constant 0 : index
    %5 = vector.load %arg6[%c0_4, %c0_5, %c0_6] : memref<1x2x2048xf32, #tpu.memory_space<vmem>>, vector<1x1x2048xf32>
    %6 = vector.shape_cast %5 : vector<1x1x2048xf32> to vector<1x2048xf32>
    %7 = vector.shape_cast %4 : vector<1x2048xf32> to vector<1x1x2048xf32>
    tpu.vector_store %arg6[%c0_4, %c0_5, %c0_6], %7 {strides = array<i32>} : memref<1x2x2048xf32, #tpu.memory_space<vmem>>, vector<1x1x2048xf32>,
    %8 = arith.mulf %2, %2 : vector<16x2048xf32>
    %cst_7 = arith.constant dense<0.000000e+00> : vector<2048xf32>
    %9 = vector.multi_reduction <add>, %8, %cst_7 [0] : vector<16x2048xf32> to vector<2048xf32>
    %10 = vector.shape_cast %9 : vector<2048xf32> to vector<1x2048xf32>
    %c0_8 = arith.constant 0 : index
    %c1 = arith.constant 1 : index
    %c0_9 = arith.constant 0 : index
    %11 = vector.load %arg6[%c0_8, %c1, %c0_9] : memref<1x2x2048xf32, #tpu.memory_space<vmem>>, vector<1x1x2048xf32>
    %12 = vector.shape_cast %11 : vector<1x1x2048xf32> to vector<1x2048xf32>
    %13 = vector.shape_cast %10 : vector<1x2048xf32> to vector<1x1x2048xf32>
    tpu.vector_store %arg6[%c0_8, %c1, %c0_9], %13 {strides = array<i32>} : memref<1x2x2048xf32, #tpu.memory_space<vmem>>, vector<1x1x2048xf32>,
    %14 = arith.truncf %2 : vector<16x2048xf32> to vector<16x2048xbf16>
    %c0_10 = arith.constant 0 : index
    %c0_11 = arith.constant 0 : index
    %15 = vector.load %arg5[%c0_10, %c0_11] : memref<16x2048xbf16, #tpu.memory_space<vmem>>, vector<16x2048xbf16>
    tpu.vector_store %arg5[%c0_10, %c0_11], %14 {strides = array<i32>} : memref<16x2048xbf16, #tpu.memory_space<vmem>>, vector<16x2048xbf16>,
    return
  }
  func.func @transform_0(%arg0: i32, %arg1: i32, %arg2: i32) -> (i32, i32) {
    %c0_i32 = arith.constant 0 : i32
    return %arg0, %arg2 : i32, i32
  }
  func.func @transform_1(%arg0: i32, %arg1: i32, %arg2: i32) -> (i32, i32) {
    %c0_i32 = arith.constant 0 : i32
    return %arg2, %arg1 : i32, i32
  }
  func.func @transform_2(%arg0: i32, %arg1: i32, %arg2: i32) -> (i32, i32) {
    %c0_i32 = arith.constant 0 : i32
    return %arg0, %arg1 : i32, i32
  }
  func.func @transform_3(%arg0: i32, %arg1: i32, %arg2: i32) -> (i32, i32, i32) {
    %c0_i32 = arith.constant 0 : i32
    %c0_i32_0 = arith.constant 0 : i32
    return %arg0, %c0_i32, %arg1 : i32, i32, i32
  }
}

module attributes {stable_mosaic.version = 11 : i64} {
  func.func @_bn_act_kernel(%arg0: i32, %arg1: i32, %arg2: memref<16x2048xbf16, #tpu.memory_space<vmem>>, %arg3: memref<1x2048xf32, #tpu.memory_space<vmem>>, %arg4: memref<1x2048xf32, #tpu.memory_space<vmem>>, %arg5: memref<16x2048xbf16, #tpu.memory_space<vmem>>) attributes {dimension_semantics = [#tpu.dimension_semantics<parallel>, #tpu.dimension_semantics<parallel>], iteration_bounds = array<i64: 1, 1>, scalar_prefetch = 0 : i64, scratch_operands = 0 : i64, tpu.core_type = #tpu.core_type<tc>, window_params = [{transform_indices = @transform_0, window_bounds = array<i64: 16, 2048>}, {transform_indices = @transform_1, window_bounds = array<i64: 1, 2048>}, {transform_indices = @transform_2, window_bounds = array<i64: 1, 2048>}, {transform_indices = @transform_3, window_bounds = array<i64: 16, 2048>}]} {
    %c0 = arith.constant 0 : index
    %c0_0 = arith.constant 0 : index
    %0 = vector.load %arg2[%c0, %c0_0] : memref<16x2048xbf16, #tpu.memory_space<vmem>>, vector<16x2048xbf16>
    %1 = arith.extf %0 : vector<16x2048xbf16> to vector<16x2048xf32>
    %c0_1 = arith.constant 0 : index
    %c0_2 = arith.constant 0 : index
    %2 = vector.load %arg3[%c0_1, %c0_2] : memref<1x2048xf32, #tpu.memory_space<vmem>>, vector<1x2048xf32>
    %3 = vector.broadcast %2 : vector<1x2048xf32> to vector<16x2048xf32>
    %4 = arith.mulf %1, %3 : vector<16x2048xf32>
    %c0_3 = arith.constant 0 : index
    %c0_4 = arith.constant 0 : index
    %5 = vector.load %arg4[%c0_3, %c0_4] : memref<1x2048xf32, #tpu.memory_space<vmem>>, vector<1x2048xf32>
    %6 = vector.broadcast %5 : vector<1x2048xf32> to vector<16x2048xf32>
    %7 = arith.addf %4, %6 : vector<16x2048xf32>
    %cst = arith.constant 0.000000e+00 : f32
    %8 = vector.broadcast %cst : f32 to vector<16x2048xf32>
    %9 = arith.maximumf %7, %8 : vector<16x2048xf32>
    %10 = arith.truncf %9 : vector<16x2048xf32> to vector<16x2048xbf16>
    %c0_5 = arith.constant 0 : index
    %c0_6 = arith.constant 0 : index
    %11 = vector.load %arg5[%c0_5, %c0_6] : memref<16x2048xbf16, #tpu.memory_space<vmem>>, vector<16x2048xbf16>
    tpu.vector_store %arg5[%c0_5, %c0_6], %10 {strides = array<i32>} : memref<16x2048xbf16, #tpu.memory_space<vmem>>, vector<16x2048xbf16>,
    return
  }
  func.func @transform_0(%arg0: i32, %arg1: i32) -> (i32, i32) {
    %c0_i32 = arith.constant 0 : i32
    return %arg0, %arg1 : i32, i32
  }
  func.func @transform_1(%arg0: i32, %arg1: i32) -> (i32, i32) {
    %c0_i32 = arith.constant 0 : i32
    %c0_i32_0 = arith.constant 0 : i32
    return %c0_i32, %arg1 : i32, i32
  }
  func.func @transform_2(%arg0: i32, %arg1: i32) -> (i32, i32) {
    %c0_i32 = arith.constant 0 : i32
    %c0_i32_0 = arith.constant 0 : i32
    return %c0_i32, %arg1 : i32, i32
  }
  func.func @transform_3(%arg0: i32, %arg1: i32) -> (i32, i32) {
    %c0_i32 = arith.constant 0 : i32
    return %arg0, %arg1 : i32, i32
  }
}

module attributes {stable_mosaic.version = 11 : i64} {
  func.func @_mm_kernel(%arg0: i32, %arg1: i32, %arg2: i32, %arg3: memref<16x1152xbf16, #tpu.memory_space<vmem>>, %arg4: memref<1152x256xbf16, #tpu.memory_space<vmem>>, %arg5: memref<16x256xbf16, #tpu.memory_space<vmem>>, %arg6: memref<1x2x256xf32, #tpu.memory_space<vmem>>) attributes {dimension_semantics = [#tpu.dimension_semantics<parallel>, #tpu.dimension_semantics<parallel>, #tpu.dimension_semantics<arbitrary>], iteration_bounds = array<i64: 2, 1, 1>, scalar_prefetch = 0 : i64, scratch_operands = 0 : i64, tpu.core_type = #tpu.core_type<tc>, window_params = [{transform_indices = @transform_0, window_bounds = array<i64: 16, 1152>}, {transform_indices = @transform_1, window_bounds = array<i64: 1152, 256>}, {transform_indices = @transform_2, window_bounds = array<i64: 16, 256>}, {transform_indices = @transform_3, window_bounds = array<i64: 1, 2, 256>}]} {
    %c0 = arith.constant 0 : index
    %c0_0 = arith.constant 0 : index
    %0 = vector.load %arg3[%c0, %c0_0] : memref<16x1152xbf16, #tpu.memory_space<vmem>>, vector<16x1152xbf16>
    %c0_1 = arith.constant 0 : index
    %c0_2 = arith.constant 0 : index
    %1 = vector.load %arg4[%c0_1, %c0_2] : memref<1152x256xbf16, #tpu.memory_space<vmem>>, vector<1152x256xbf16>
    %cst = arith.constant dense<0.000000e+00> : vector<16x256xf32>
    %2 = tpu.matmul %0, %1, %cst {dimension_numbers = #tpu.dot_dimension_numbers<[1], [0], [0], [1], [0, 0, 1, 1], [], []>} : vector<16x1152xbf16>, vector<1152x256xbf16>, vector<16x256xf32> -> vector<16x256xf32>
    %cst_3 = arith.constant dense<0.000000e+00> : vector<256xf32>
    %3 = vector.multi_reduction <add>, %2, %cst_3 [0] : vector<16x256xf32> to vector<256xf32>
    %4 = vector.shape_cast %3 : vector<256xf32> to vector<1x256xf32>
    %c0_4 = arith.constant 0 : index
    %c0_5 = arith.constant 0 : index
    %c0_6 = arith.constant 0 : index
    %5 = vector.load %arg6[%c0_4, %c0_5, %c0_6] : memref<1x2x256xf32, #tpu.memory_space<vmem>>, vector<1x1x256xf32>
    %6 = vector.shape_cast %5 : vector<1x1x256xf32> to vector<1x256xf32>
    %7 = vector.shape_cast %4 : vector<1x256xf32> to vector<1x1x256xf32>
    tpu.vector_store %arg6[%c0_4, %c0_5, %c0_6], %7 {strides = array<i32>} : memref<1x2x256xf32, #tpu.memory_space<vmem>>, vector<1x1x256xf32>,
    %8 = arith.mulf %2, %2 : vector<16x256xf32>
    %cst_7 = arith.constant dense<0.000000e+00> : vector<256xf32>
    %9 = vector.multi_reduction <add>, %8, %cst_7 [0] : vector<16x256xf32> to vector<256xf32>
    %10 = vector.shape_cast %9 : vector<256xf32> to vector<1x256xf32>
    %c0_8 = arith.constant 0 : index
    %c1 = arith.constant 1 : index
    %c0_9 = arith.constant 0 : index
    %11 = vector.load %arg6[%c0_8, %c1, %c0_9] : memref<1x2x256xf32, #tpu.memory_space<vmem>>, vector<1x1x256xf32>
    %12 = vector.shape_cast %11 : vector<1x1x256xf32> to vector<1x256xf32>
    %13 = vector.shape_cast %10 : vector<1x256xf32> to vector<1x1x256xf32>
    tpu.vector_store %arg6[%c0_8, %c1, %c0_9], %13 {strides = array<i32>} : memref<1x2x256xf32, #tpu.memory_space<vmem>>, vector<1x1x256xf32>,
    %14 = arith.truncf %2 : vector<16x256xf32> to vector<16x256xbf16>
    %c0_10 = arith.constant 0 : index
    %c0_11 = arith.constant 0 : index
    %15 = vector.load %arg5[%c0_10, %c0_11] : memref<16x256xbf16, #tpu.memory_space<vmem>>, vector<16x256xbf16>
    tpu.vector_store %arg5[%c0_10, %c0_11], %14 {strides = array<i32>} : memref<16x256xbf16, #tpu.memory_space<vmem>>, vector<16x256xbf16>,
    return
  }
  func.func @transform_0(%arg0: i32, %arg1: i32, %arg2: i32) -> (i32, i32) {
    %c0_i32 = arith.constant 0 : i32
    return %arg0, %arg2 : i32, i32
  }
  func.func @transform_1(%arg0: i32, %arg1: i32, %arg2: i32) -> (i32, i32) {
    %c0_i32 = arith.constant 0 : i32
    return %arg2, %arg1 : i32, i32
  }
  func.func @transform_2(%arg0: i32, %arg1: i32, %arg2: i32) -> (i32, i32) {
    %c0_i32 = arith.constant 0 : i32
    return %arg0, %arg1 : i32, i32
  }
  func.func @transform_3(%arg0: i32, %arg1: i32, %arg2: i32) -> (i32, i32, i32) {
    %c0_i32 = arith.constant 0 : i32
    %c0_i32_0 = arith.constant 0 : i32
    return %arg0, %c0_i32, %arg1 : i32, i32, i32
  }
}

module attributes {stable_mosaic.version = 11 : i64} {
  func.func @_bn_act_kernel(%arg0: i32, %arg1: i32, %arg2: memref<16x256xbf16, #tpu.memory_space<vmem>>, %arg3: memref<1x256xf32, #tpu.memory_space<vmem>>, %arg4: memref<1x256xf32, #tpu.memory_space<vmem>>, %arg5: memref<16x256xbf16, #tpu.memory_space<vmem>>) attributes {dimension_semantics = [#tpu.dimension_semantics<parallel>, #tpu.dimension_semantics<parallel>], iteration_bounds = array<i64: 2, 1>, scalar_prefetch = 0 : i64, scratch_operands = 0 : i64, tpu.core_type = #tpu.core_type<tc>, window_params = [{transform_indices = @transform_0, window_bounds = array<i64: 16, 256>}, {transform_indices = @transform_1, window_bounds = array<i64: 1, 256>}, {transform_indices = @transform_2, window_bounds = array<i64: 1, 256>}, {transform_indices = @transform_3, window_bounds = array<i64: 16, 256>}]} {
    %c0 = arith.constant 0 : index
    %c0_0 = arith.constant 0 : index
    %0 = vector.load %arg2[%c0, %c0_0] : memref<16x256xbf16, #tpu.memory_space<vmem>>, vector<16x256xbf16>
    %1 = arith.extf %0 : vector<16x256xbf16> to vector<16x256xf32>
    %c0_1 = arith.constant 0 : index
    %c0_2 = arith.constant 0 : index
    %2 = vector.load %arg3[%c0_1, %c0_2] : memref<1x256xf32, #tpu.memory_space<vmem>>, vector<1x256xf32>
    %3 = vector.broadcast %2 : vector<1x256xf32> to vector<16x256xf32>
    %4 = arith.mulf %1, %3 : vector<16x256xf32>
    %c0_3 = arith.constant 0 : index
    %c0_4 = arith.constant 0 : index
    %5 = vector.load %arg4[%c0_3, %c0_4] : memref<1x256xf32, #tpu.memory_space<vmem>>, vector<1x256xf32>
    %6 = vector.broadcast %5 : vector<1x256xf32> to vector<16x256xf32>
    %7 = arith.addf %4, %6 : vector<16x256xf32>
    %cst = arith.constant 0.000000e+00 : f32
    %8 = vector.broadcast %cst : f32 to vector<16x256xf32>
    %9 = arith.maximumf %7, %8 : vector<16x256xf32>
    %10 = arith.truncf %9 : vector<16x256xf32> to vector<16x256xbf16>
    %c0_5 = arith.constant 0 : index
    %c0_6 = arith.constant 0 : index
    %11 = vector.load %arg5[%c0_5, %c0_6] : memref<16x256xbf16, #tpu.memory_space<vmem>>, vector<16x256xbf16>
    tpu.vector_store %arg5[%c0_5, %c0_6], %10 {strides = array<i32>} : memref<16x256xbf16, #tpu.memory_space<vmem>>, vector<16x256xbf16>,
    return
  }
  func.func @transform_0(%arg0: i32, %arg1: i32) -> (i32, i32) {
    %c0_i32 = arith.constant 0 : i32
    return %arg0, %arg1 : i32, i32
  }
  func.func @transform_1(%arg0: i32, %arg1: i32) -> (i32, i32) {
    %c0_i32 = arith.constant 0 : i32
    %c0_i32_0 = arith.constant 0 : i32
    return %c0_i32, %arg1 : i32, i32
  }
  func.func @transform_2(%arg0: i32, %arg1: i32) -> (i32, i32) {
    %c0_i32 = arith.constant 0 : i32
    %c0_i32_0 = arith.constant 0 : i32
    return %c0_i32, %arg1 : i32, i32
  }
  func.func @transform_3(%arg0: i32, %arg1: i32) -> (i32, i32) {
    %c0_i32 = arith.constant 0 : i32
    return %arg0, %arg1 : i32, i32
  }
}

module attributes {stable_mosaic.version = 11 : i64} {
  func.func @_mm_kernel(%arg0: i32, %arg1: i32, %arg2: i32, %arg3: memref<64x640xbf16, #tpu.memory_space<vmem>>, %arg4: memref<640x128xbf16, #tpu.memory_space<vmem>>, %arg5: memref<64x128xf32, #tpu.memory_space<vmem>>) attributes {dimension_semantics = [#tpu.dimension_semantics<parallel>, #tpu.dimension_semantics<parallel>, #tpu.dimension_semantics<arbitrary>], iteration_bounds = array<i64: 2, 1, 1>, scalar_prefetch = 0 : i64, scratch_operands = 0 : i64, tpu.core_type = #tpu.core_type<tc>, window_params = [{transform_indices = @transform_0, window_bounds = array<i64: 64, 640>}, {transform_indices = @transform_1, window_bounds = array<i64: 640, 128>}, {transform_indices = @transform_2, window_bounds = array<i64: 64, 128>}]} {
    %c0 = arith.constant 0 : index
    %c0_0 = arith.constant 0 : index
    %0 = vector.load %arg3[%c0, %c0_0] : memref<64x640xbf16, #tpu.memory_space<vmem>>, vector<64x640xbf16>
    %c0_1 = arith.constant 0 : index
    %c0_2 = arith.constant 0 : index
    %1 = vector.load %arg4[%c0_1, %c0_2] : memref<640x128xbf16, #tpu.memory_space<vmem>>, vector<640x128xbf16>
    %cst = arith.constant dense<0.000000e+00> : vector<64x128xf32>
    %2 = tpu.matmul %0, %1, %cst {dimension_numbers = #tpu.dot_dimension_numbers<[1], [0], [0], [1], [0, 0, 1, 1], [], []>} : vector<64x640xbf16>, vector<640x128xbf16>, vector<64x128xf32> -> vector<64x128xf32>
    %3 = math.tanh %2 : vector<64x128xf32>
    %c0_3 = arith.constant 0 : index
    %c0_4 = arith.constant 0 : index
    %4 = vector.load %arg5[%c0_3, %c0_4] : memref<64x128xf32, #tpu.memory_space<vmem>>, vector<64x128xf32>
    tpu.vector_store %arg5[%c0_3, %c0_4], %3 {strides = array<i32>} : memref<64x128xf32, #tpu.memory_space<vmem>>, vector<64x128xf32>,
    return
  }
  func.func @transform_0(%arg0: i32, %arg1: i32, %arg2: i32) -> (i32, i32) {
    %c0_i32 = arith.constant 0 : i32
    return %arg0, %arg2 : i32, i32
  }
  func.func @transform_1(%arg0: i32, %arg1: i32, %arg2: i32) -> (i32, i32) {
    %c0_i32 = arith.constant 0 : i32
    return %arg2, %arg1 : i32, i32
  }
  func.func @transform_2(%arg0: i32, %arg1: i32, %arg2: i32) -> (i32, i32) {
    %c0_i32 = arith.constant 0 : i32
    return %arg0, %arg1 : i32, i32
  }
}

</mosaic_0001>

<bundles_post_ra>
// kernel: tile.28
= control target key start
LH: loop header
LB: loop body
LE: loop exit
PB: predicated region body
PF: predicated region fallthrough
CT: control target
= control target key end

     0   :  { %s28_s0 = inlined_call_operand.vmem [shape: f32[128], index: 0, kind: input, shape index: {}]   ;;  %s29_s1 = inlined_call_operand.vmem [shape: f32[16,128], index: 1, kind: output, shape index: {}]  }
   0x1   :  { %v4_v0 = vld [vmem:[%s28_s0] ss:$0 sm:$0xff] }
   0x2   :  { %5 = vst [vmem:[%s29_s1] sm:$0xff] %v4_v0  ;;  %8 = vst [vmem:[%s29_s1 + $0x8] sm:$0xff] %v4_v0 }

// kernel: generator_forward.6
= control target key start
LH: loop header
LB: loop body
LE: loop exit
PB: predicated region body
PF: predicated region fallthrough
CT: control target
= control target key end

     0   :  { %v66_v0 = vlaneseq  ;;  %s772_s0 = inlined_call_operand.vmem [shape: bf16[16,2048], index: 0, kind: input, shape index: {}]   ;;  %s773_s1 = inlined_call_operand.vmem [shape: f32[1,2048], index: 1, kind: input, shape index: {}]   ;;  %s774_s2 = inlined_call_operand.vmem [shape: f32[1,2048], index: 2, kind: input, shape index: {}]   ;;  %s775_s3 = inlined_call_operand.vmem [shape: bf16[16,2048], index: 3, kind: output, shape index: {}]  }
   0x1   :  { %v14_v1 = vld [vmem:[%s772_s0] sm:$0xff]  ;;  %v15_v5 = vld [vmem:[%s772_s0 + $0x8] sm:$0xff]  ;;  %v16_v6 = vld [vmem:[%s772_s0 + $0x10] sm:$0xff] }
   0x2   :  { %v30_v2 = vunpack.c.l.bf16 %v14_v1  ;;  %v31_v3 = vunpack.c.h.bf16 %v14_v1  ;;  %v67_v4 = vshrl.u32 %v66_v0, 7  ;;  %v17_v7 = vld [vmem:[%s772_s0 + $0x18] sm:$0xff]  ;;  %v62_v8 = vld [vmem:[%s773_s1] sm:$0xff]  ;;  %v32_v10 = vunpack.c.l.bf16 %v15_v5  ;;  %v63_v55 = vld [vmem:[%s773_s1 + $0x8] sm:$0xff] }
   0x3   :  { %v178_v9 = vld [vmem:[%s774_s2] sm:$0xff]  ;;  %v33_v11 = vunpack.c.h.bf16 %v15_v5  ;;  %v34_v12 = vunpack.c.l.bf16 %v16_v6  ;;  %v35_v13 = vunpack.c.h.bf16 %v16_v6  ;;  %v36_v20 = vunpack.c.l.bf16 %v17_v7  ;;  %v179_v60 = vld [vmem:[%s774_s2 + $0x8] sm:$0xff] }
   0x4   :  { %v68_v14 = vsub.s32 0, %v67_v4  ;;  %v512_v15 = vsub.s32 1, %v67_v4  ;;  %v514_v16 = vsub.s32 2, %v67_v4  ;;  %v516_v17 = vsub.s32 3, %v67_v4  ;;  %v18_v54 = vld [vmem:[%s772_s0 + $0x20] sm:$0xff]  ;;  %v19_v1 = vld [vmem:[%s772_s0 + $0x28] sm:$0xff] }
   0x5   :  { %v518_v18 = vsub.s32 4, %v67_v4  ;;  %v520_v19 = vsub.s32 5, %v67_v4  ;;  %v37_v21 = vunpack.c.h.bf16 %v17_v7  ;;  %v566_v44 = vsub.s32 6, %v67_v4 }
   0x6   :  { %v522_v22 = vrot.slane %v62_v8, %v68_v14  ;;  %v525_v23 = vrot.slane %v62_v8, %v512_v15  ;;  %v527_v24 = vrot.slane %v178_v9, %v68_v14  ;;  %v530_v25 = vrot.slane %v178_v9, %v512_v15 }
   0x7   :  { %v533_v26 = vrot.slane %v62_v8, %v514_v16  ;;  %v536_v27 = vrot.slane %v62_v8, %v516_v17  ;;  %v539_v28 = vrot.slane %v178_v9, %v514_v16  ;;  %v542_v29 = vrot.slane %v178_v9, %v516_v17 }
   0x8   :  { %v146_v30 = vmul.f32 %v522_v22, %v30_v2  ;;  %v147_v31 = vmul.f32 %v525_v23, %v31_v3  ;;  %v547_v32 = vrot.slane %v62_v8, %v518_v18  ;;  %v550_v33 = vrot.slane %v62_v8, %v520_v19 }
   0x9   :  { %v148_v34 = vmul.f32 %v533_v26, %v32_v10  ;;  %v149_v35 = vmul.f32 %v536_v27, %v33_v11  ;;  %v555_v36 = vrot.slane %v178_v9, %v518_v18  ;;  %v558_v37 = vrot.slane %v178_v9, %v520_v19 }
   0xa   :  { %v262_v38 = vadd.f32 %v527_v24, %v146_v30  ;;  %v263_v39 = vadd.f32 %v530_v25, %v147_v31  ;;  %v150_v40 = vmul.f32 %v547_v32, %v34_v12  ;;  %v151_v41 = vmul.f32 %v550_v33, %v35_v13 }
   0xb   :  { %v264_v42 = vadd.f32 %v539_v28, %v148_v34  ;;  %v265_v43 = vadd.f32 %v542_v29, %v149_v35  ;;  %v568_v45 = vsub.s32 7, %v67_v4  ;;  %v573_v52 = vrot.slane %v62_v8, %v566_v44 }
   0xc   :  { %v294_v46 = vmax.f32 %v262_v38, 0.0  ;;  %v295_v47 = vmax.f32 %v263_v39, 0.0  ;;  %v266_v48 = vadd.f32 %v555_v36, %v150_v40  ;;  %v267_v49 = vadd.f32 %v558_v37, %v151_v41 }
   0xd   :  { %v296_v50 = vmax.f32 %v264_v42, 0.0  ;;  %v297_v51 = vmax.f32 %v265_v43, 0.0  ;;  %v576_v53 = vrot.slane %v62_v8, %v568_v45  ;;  %v585_v59 = vrot.slane %v178_v9, %v566_v44  ;;  %v21_v43 = vld [vmem:[%s772_s0 + $0x38] sm:$0xff] }
   0xe   :  { %v458_v56 = vpack.c.bf16 %v295_v47, %v294_v46  ;;  %v298_v57 = vmax.f32 %v266_v48, 0.0  ;;  %v299_v58 = vmax.f32 %v267_v49, 0.0  ;;  %v152_v62 = vmul.f32 %v573_v52, %v36_v20  ;;  %v20_v20 = vld [vmem:[%s772_s0 + $0x30] sm:$0xff] }
   0xf   :  { %v459_v61 = vpack.c.bf16 %v297_v51, %v296_v50  ;;  %v153_v63 = vmul.f32 %v576_v53, %v37_v21  ;;  %v593_v0 = vrot.slane %v178_v9, %v568_v45  ;;  %v38_v3 = vunpack.c.l.bf16 %v18_v54 }
  0x10   :  { %422 = vst [vmem:[%s775_s3] sm:$0xff] %v458_v56  ;;  %v460_v2 = vpack.c.bf16 %v299_v58, %v298_v57  ;;  %v39_v4 = vunpack.c.h.bf16 %v18_v54  ;;  %v601_v5 = vrot.slane %v63_v55, %v68_v14  ;;  %v268_v6 = vadd.f32 %v585_v59, %v152_v62 }
  0x11   :  { %423 = vst [vmem:[%s775_s3 + $0x8] sm:$0xff] %v459_v61  ;;  %v269_v7 = vadd.f32 %v593_v0, %v153_v63  ;;  %v609_v8 = vrot.slane %v63_v55, %v512_v15  ;;  %v611_v9 = vrot.slane %v179_v60, %v68_v14  ;;  %v618_v11 = vrot.slane %v179_v60, %v512_v15  ;;  %v22_v61 = vld [vmem:[%s772_s0 + $0x40] sm:$0xff] }
  0x12   :  { %424 = vst [vmem:[%s775_s3 + $0x10] sm:$0xff] %v460_v2  ;;  %v154_v10 = vmul.f32 %v601_v5, %v38_v3  ;;  %v40_v12 = vunpack.c.l.bf16 %v19_v1  ;;  %v41_v13 = vunpack.c.h.bf16 %v19_v1  ;;  %v300_v21 = vmax.f32 %v268_v6, 0.0 }
  0x13   :  { %v301_v30 = vmax.f32 %v269_v7, 0.0  ;;  %v155_v14 = vmul.f32 %v609_v8, %v39_v4  ;;  %v625_v31 = vrot.slane %v63_v55, %v514_v16  ;;  %v629_v35 = vrot.slane %v63_v55, %v516_v17 }
  0x14   :  { %v270_v34 = vadd.f32 %v611_v9, %v154_v10  ;;  %v632_v15 = vrot.slane %v179_v60, %v514_v16  ;;  %v635_v38 = vrot.slane %v179_v60, %v516_v17  ;;  %v42_v42 = vunpack.c.l.bf16 %v20_v20 }
  0x15   :  { %v461_v39 = vpack.c.bf16 %v301_v30, %v300_v21  ;;  %v271_v40 = vadd.f32 %v618_v11, %v155_v14  ;;  %v156_v41 = vmul.f32 %v625_v31, %v40_v12  ;;  %v157_v47 = vmul.f32 %v629_v35, %v41_v13 }
  0x16   :  { %v302_v46 = vmax.f32 %v270_v34, 0.0  ;;  %v43_v48 = vunpack.c.h.bf16 %v20_v20  ;;  %v644_v16 = vrot.slane %v63_v55, %v518_v18  ;;  %v651_v50 = vrot.slane %v63_v55, %v520_v19 }
  0x17   :  { %425 = vst [vmem:[%s775_s3 + $0x18] sm:$0xff] %v461_v39  ;;  %v303_v17 = vmax.f32 %v271_v40, 0.0  ;;  %v272_v49 = vadd.f32 %v632_v15, %v156_v41  ;;  %v654_v51 = vrot.slane %v179_v60, %v518_v18  ;;  %v273_v54 = vadd.f32 %v635_v38, %v157_v47 }
  0x18   :  { %v158_v56 = vmul.f32 %v644_v16, %v42_v42  ;;  %v659_v57 = vrot.slane %v179_v60, %v520_v19  ;;  %v44_v58 = vunpack.c.l.bf16 %v21_v43  ;;  %v159_v1 = vmul.f32 %v651_v50, %v43_v48  ;;  %v23_v19 = vld [vmem:[%s772_s0 + $0x48] sm:$0xff] }
  0x19   :  { %v462_v62 = vpack.c.bf16 %v303_v17, %v302_v46  ;;  %v304_v63 = vmax.f32 %v272_v49, 0.0  ;;  %v45_v2 = vunpack.c.h.bf16 %v21_v43  ;;  %v305_v3 = vmax.f32 %v273_v54, 0.0 }
  0x1a   :  { %v274_v18 = vadd.f32 %v654_v51, %v158_v56  ;;  %v667_v4 = vrot.slane %v63_v55, %v566_v44  ;;  %v670_v6 = vrot.slane %v63_v55, %v568_v45  ;;  %v275_v7 = vadd.f32 %v659_v57, %v159_v1  ;;  %v24_v55 = vld [vmem:[%s772_s0 + $0x50] sm:$0xff] }
  0x1b   :  { %426 = vst [vmem:[%s775_s3 + $0x20] sm:$0xff] %v462_v62  ;;  %v680_v10 = vrot.slane %v179_v60, %v566_v44  ;;  %v683_v12 = vrot.slane %v179_v60, %v568_v45  ;;  %v46_v13 = vunpack.c.l.bf16 %v22_v61  ;;  %v463_v20 = vpack.c.bf16 %v305_v3, %v304_v63 }
  0x1c   :  { %v306_v21 = vmax.f32 %v274_v18, 0.0  ;;  %v160_v30 = vmul.f32 %v667_v4, %v44_v58  ;;  %v161_v14 = vmul.f32 %v670_v6, %v45_v2  ;;  %v307_v34 = vmax.f32 %v275_v7, 0.0 }
  0x1d   :  { %v47_v39 = vunpack.c.h.bf16 %v22_v61  ;;  %v162_v40 = vmul.f32 %v522_v22, %v46_v13  ;;  %v48_v44 = vunpack.c.l.bf16 %v23_v19  ;;  %427 = vst [vmem:[%s775_s3 + $0x28] sm:$0xff] %v463_v20  ;;  %v49_v41 = vunpack.c.h.bf16 %v23_v19  ;;  %v25_v22 = vld [vmem:[%s772_s0 + $0x58] sm:$0xff]  ;;  %v26_v61 = vld [vmem:[%s772_s0 + $0x60] sm:$0xff]  ;;  %v28_v20 = vld [vmem:[%s772_s0 + $0x70] sm:$0xff] }
  0x1e   :  { %v276_v45 = vadd.f32 %v680_v10, %v160_v30  ;;  %v277_v60 = vadd.f32 %v683_v12, %v161_v14  ;;  %v50_v42 = vunpack.c.l.bf16 %v24_v55  ;;  %v464_v43 = vpack.c.bf16 %v307_v34, %v306_v21 }
  0x1f   :  { %v163_v46 = vmul.f32 %v525_v23, %v47_v39  ;;  %v278_v47 = vadd.f32 %v527_v24, %v162_v40  ;;  %v164_v48 = vmul.f32 %v533_v26, %v48_v44  ;;  %v165_v54 = vmul.f32 %v536_v27, %v49_v41  ;;  %v29_v40 = vld [vmem:[%s772_s0 + $0x78] sm:$0xff] }
  0x20   :  { %v308_v17 = vmax.f32 %v276_v45, 0.0  ;;  %v309_v49 = vmax.f32 %v277_v60, 0.0  ;;  %v51_v56 = vunpack.c.h.bf16 %v24_v55  ;;  %428 = vst [vmem:[%s775_s3 + $0x30] sm:$0xff] %v464_v43  ;;  %v166_v26 = vmul.f32 %v547_v32, %v50_v42 }
  0x21   :  { %v279_v58 = vadd.f32 %v530_v25, %v163_v46  ;;  %v310_v23 = vmax.f32 %v278_v47, 0.0  ;;  %v280_v24 = vadd.f32 %v539_v28, %v164_v48  ;;  %v281_v63 = vadd.f32 %v542_v29, %v165_v54  ;;  %v27_v29 = vld [vmem:[%s772_s0 + $0x68] sm:$0xff] }
  0x22   :  { %v465_v62 = vpack.c.bf16 %v309_v49, %v308_v17  ;;  %v167_v27 = vmul.f32 %v550_v33, %v51_v56  ;;  %v52_v1 = vunpack.c.l.bf16 %v25_v22  ;;  %v282_v18 = vadd.f32 %v555_v36, %v166_v26 }
  0x23   :  { %v311_v2 = vmax.f32 %v279_v58, 0.0  ;;  %v312_v3 = vmax.f32 %v280_v24, 0.0  ;;  %v53_v25 = vunpack.c.h.bf16 %v25_v22  ;;  %v313_v28 = vmax.f32 %v281_v63, 0.0 }
  0x24   :  { %429 = vst [vmem:[%s775_s3 + $0x38] sm:$0xff] %v465_v62  ;;  %v283_v32 = vadd.f32 %v558_v37, %v167_v27  ;;  %v168_v19 = vmul.f32 %v573_v52, %v52_v1  ;;  %v54_v7 = vunpack.c.l.bf16 %v26_v61  ;;  %v314_v13 = vmax.f32 %v282_v18, 0.0 }
  0x25   :  { %v466_v33 = vpack.c.bf16 %v311_v2, %v310_v23  ;;  %v169_v55 = vmul.f32 %v576_v53, %v53_v25  ;;  %v55_v36 = vunpack.c.h.bf16 %v26_v61  ;;  %v467_v21 = vpack.c.bf16 %v313_v28, %v312_v3 }
  0x26   :  { %v315_v30 = vmax.f32 %v283_v32, 0.0  ;;  %v284_v37 = vadd.f32 %v585_v59, %v168_v19  ;;  %v170_v52 = vmul.f32 %v601_v5, %v54_v7  ;;  %v56_v53 = vunpack.c.l.bf16 %v27_v29 }
  0x27   :  { %430 = vst [vmem:[%s775_s3 + $0x40] sm:$0xff] %v466_v33  ;;  %v285_v14 = vadd.f32 %v593_v0, %v169_v55  ;;  %v171_v34 = vmul.f32 %v609_v8, %v55_v36  ;;  %v57_v39 = vunpack.c.h.bf16 %v27_v29  ;;  %431 = vst [vmem:[%s775_s3 + $0x48] sm:$0xff] %v467_v21  ;;  %v58_v45 = vunpack.c.l.bf16 %v28_v20 }
  0x28   :  { %v468_v59 = vpack.c.bf16 %v315_v30, %v314_v13  ;;  %v316_v5 = vmax.f32 %v284_v37, 0.0  ;;  %v286_v44 = vadd.f32 %v611_v9, %v170_v52  ;;  %v172_v8 = vmul.f32 %v625_v31, %v56_v53 }
  0x29   :  { %v317_v60 = vmax.f32 %v285_v14, 0.0  ;;  %v287_v0 = vadd.f32 %v618_v11, %v171_v34  ;;  %v173_v41 = vmul.f32 %v629_v35, %v57_v39  ;;  %v59_v43 = vunpack.c.h.bf16 %v28_v20 }
  0x2a   :  { %432 = vst [vmem:[%s775_s3 + $0x50] sm:$0xff] %v468_v59  ;;  %v318_v42 = vmax.f32 %v286_v44, 0.0  ;;  %v174_v46 = vmul.f32 %v644_v16, %v58_v45  ;;  %v60_v47 = vunpack.c.l.bf16 %v29_v40  ;;  %v288_v9 = vadd.f32 %v632_v15, %v172_v8 }
  0x2b   :  { %v469_v48 = vpack.c.bf16 %v317_v60, %v316_v5  ;;  %v319_v22 = vmax.f32 %v287_v0, 0.0  ;;  %v289_v17 = vadd.f32 %v635_v38, %v173_v41  ;;  %v175_v11 = vmul.f32 %v651_v50, %v59_v43 }
  0x2c   :  { %v290_v31 = vadd.f32 %v654_v51, %v174_v46  ;;  %v61_v35 = vunpack.c.h.bf16 %v29_v40  ;;  %v176_v49 = vmul.f32 %v667_v4, %v60_v47  ;;  %v320_v16 = vmax.f32 %v288_v9, 0.0 }
  0x2d   :  { %433 = vst [vmem:[%s775_s3 + $0x58] sm:$0xff] %v469_v48  ;;  %v470_v54 = vpack.c.bf16 %v319_v22, %v318_v42  ;;  %v321_v56 = vmax.f32 %v289_v17, 0.0  ;;  %v291_v58 = vadd.f32 %v659_v57, %v175_v11 }
  0x2e   :  { %v322_v23 = vmax.f32 %v290_v31, 0.0  ;;  %v177_v15 = vmul.f32 %v670_v6, %v61_v35  ;;  %v292_v38 = vadd.f32 %v680_v10, %v176_v49 }
  0x2f   :  { %434 = vst [vmem:[%s775_s3 + $0x60] sm:$0xff] %v470_v54  ;;  %v471_v50 = vpack.c.bf16 %v321_v56, %v320_v16  ;;  %v323_v51 = vmax.f32 %v291_v58, 0.0 }
  0x30   :  { %v293_v4 = vadd.f32 %v683_v12, %v177_v15  ;;  %v324_v24 = vmax.f32 %v292_v38, 0.0 }
  0x31   :  { %435 = vst [vmem:[%s775_s3 + $0x68] sm:$0xff] %v471_v50  ;;  %v472_v26 = vpack.c.bf16 %v323_v51, %v322_v23 }
  0x32   :  { %v325_v57 = vmax.f32 %v293_v4, 0.0 }
  0x33   :  { %436 = vst [vmem:[%s775_s3 + $0x70] sm:$0xff] %v472_v26 }
  0x34   :  { %v473_v6 = vpack.c.bf16 %v325_v57, %v324_v24 }
  0x36   :  { %437 = vst [vmem:[%s775_s3 + $0x78] sm:$0xff] %v473_v6 }

// kernel: tile.38
= control target key start
LH: loop header
LB: loop body
LE: loop exit
PB: predicated region body
PF: predicated region fallthrough
CT: control target
= control target key end

     0   :  { %s22_s0 = inlined_call_operand.vmem [shape: f32[64], index: 0, kind: input, shape index: {}]   ;;  %s23_s1 = inlined_call_operand.vmem [shape: f32[4,64], index: 1, kind: output, shape index: {}]  }
   0x1   :  { %v4_v0 = vld [vmem:[%s22_s0] ss:$0 sm:$0xff] }
   0x2   :  { %5 = vst [vmem:[%s23_s1] sm:$0xf] %v4_v0 }

// kernel: generator_forward.5
= control target key start
LH: loop header
LB: loop body
LE: loop exit
PB: predicated region body
PF: predicated region fallthrough
CT: control target
= control target key end

     0   :  { %9 = vsyncpa [#allocation3], 0  ;;  %s1958_s12 = smov [#allocation2]   ;;  %s2162_s0 = inlined_call_operand.vmem [shape: bf16[16,128], index: 0, kind: input, shape index: {}]   ;;  %s2163_s1 = inlined_call_operand.hbm [shape: bf16[128,2048], index: 1, kind: input, shape index: {}]   ;;  %s2164_s2 = inlined_call_operand.vmem [shape: bf16[16,2048], index: 2, kind: output, shape index: {0}]   ;;  %s2165_s3 = inlined_call_operand.vmem [shape: f32[1,2,2048], index: 3, kind: output, shape index: {1}]  }
   0x1   :  { %s17_s13 = sshll.u32 %s1958_s12, 4  ;;  %s1934_s16 = scalar_lea.hbm %s2163_s1, 16384  ;;  %s18_s13 = int_to_ptr.vmem [resolvable:$true] %s17_s13 }
   0x2   :  { %p1935_p0 = scmp.ne.s32.totalorder %s2163_s1, %s1934_s16  ;;  %p1938_p1 = scmp.lt.u32.totalorder %s1934_s16, %s2163_s1 }
   0x4   :  { %p1940_p2 = pnand %p1938_p1, %p1935_p0 }
   0x6   :  { %1943 = shalt.err (!%p1940_p2)
}
   0x7   :  { %s1944_s21 = scalar_lea.vmem %s18_s13, 16384  ;;  %p1949_p4 = scmp.lt.s32.totalorder %s18_s13, %s18_s13 }
   0x8   :  { %p1945_p3 = scmp.ne.s32.totalorder %s18_s13, %s1944_s21  ;;  %p1950_p5 = scmp.lt.s32.totalorder %s1944_s21, %s1944_s21 }
   0xa   :  { %p1951_p6 = por %p1950_p5, %p1949_p4 }
   0xc   :  { %p1952_p7 = pnand %p1951_p6, %p1945_p3 }
   0xe   :  { %1955 = shalt.err (!%p1952_p7)
}
   0xf   :  { %s1959_s22 = smov 1024   ;;  %s1960_s23 = smov 64  }
  0x10   :  { %23 = dma.hbm_to_vmem [thread:$0]  %s2163_s1, 16384, %s18_s13, [#allocation3], %s1959_s22, %s1959_s22, %s1960_s23  }
  0x11   :  { %1956 = dma.done.wait [#allocation3], 16384  }
  0x12   :  { %1957 = vsyncadd [#allocation3], 4294950912  ;;  %v1961_v0 = vmov 0   ;;  %v30_v1 = vld [vmem:[#allocation2] sm:$0xff]  ;;  %v31_v3 = vld [vmem:[#allocation2 + $0x8] sm:$0xff] }
  0x13   :  { %836 = vmatprep.mubr.bf16.mxu0 %v1961_v0  ;;  %879 = vmatprep.mubr.bf16.mxu1 %v1961_v0  ;;  %v38_v2 = vld [vmem:[#allocation2 + $0x40] sm:$0xff]  ;;  %v39_v5 = vld [vmem:[#allocation2 + $0x48] sm:$0xff]  ;;  %v32_v63 = vld [vmem:[#allocation2 + $0x10] sm:$0xff] }
  0x14   :  { %v1766_v4 = vcombine.high %v30_v1, %v38_v2  ;;  %v1765_v6 = vcombine.low %v30_v1, %v38_v2  ;;  %v46_v7 = vld [vmem:[#allocation2 + $0x80] sm:$0xff]  ;;  %v1768_v9 = vcombine.high %v31_v3, %v39_v5  ;;  %v1767_v10 = vcombine.low %v31_v3, %v39_v5  ;;  %v47_v12 = vld [vmem:[#allocation2 + $0x88] sm:$0xff]  ;;  %v40_v1 = vld [vmem:[#allocation2 + $0x50] sm:$0xff] }
  0x15   :  { %v54_v8 = vld [vmem:[#allocation2 + $0xc0] sm:$0xff]  ;;  %v55_v13 = vld [vmem:[#allocation2 + $0xc8] sm:$0xff]  ;;  %v33_v2 = vld [vmem:[#allocation2 + $0x18] sm:$0xff] }
  0x16   :  { %v1782_v11 = vcombine.high %v46_v7, %v54_v8  ;;  %v62_v14 = vld [vmem:[#allocation2 + $0x100] sm:$0xff]  ;;  %804 = vmatprep.subr.bf16.mxu0 %v1766_v4  ;;  %v1784_v15 = vcombine.high %v47_v12, %v55_v13  ;;  %v63_v17 = vld [vmem:[#allocation2 + $0x108] sm:$0xff]  ;;  %847 = vmatprep.subr.bf16.mxu1 %v1768_v9  ;;  %v1781_v19 = vcombine.low %v46_v7, %v54_v8  ;;  %v41_v3 = vld [vmem:[#allocation2 + $0x58] sm:$0xff] }
  0x17   :  { %v70_v16 = vld [vmem:[#allocation2 + $0x140] sm:$0xff]  ;;  %v71_v18 = vld [vmem:[#allocation2 + $0x148] sm:$0xff]  ;;  %805 = vmatpush1.bf16.msra.mxu0 %v1765_v6  ;;  %848 = vmatpush1.bf16.msra.mxu1 %v1767_v10  ;;  %v1783_v20 = vcombine.low %v47_v12, %v55_v13  ;;  %v1770_v6 = vcombine.high %v32_v63, %v40_v1  ;;  %v1772_v7 = vcombine.high %v33_v2, %v41_v3  ;;  %v48_v8 = vld [vmem:[#allocation2 + $0x90] sm:$0xff] }
  0x18   :  { %806 = vmatprep.subr.bf16.mxu0 %v1782_v11  ;;  %v1798_v21 = vcombine.high %v62_v14, %v70_v16  ;;  %849 = vmatprep.subr.bf16.mxu1 %v1784_v15  ;;  %v1800_v22 = vcombine.high %v63_v17, %v71_v18  ;;  %v78_v23 = vld [vmem:[#allocation2 + $0x180] sm:$0xff]  ;;  %v79_v25 = vld [vmem:[#allocation2 + $0x188] sm:$0xff]  ;;  %v1797_v27 = vcombine.low %v62_v14, %v70_v16  ;;  %v56_v9 = vld [vmem:[#allocation2 + $0xd0] sm:$0xff] }
  0x19   :  { %v86_v24 = vld [vmem:[#allocation2 + $0x1c0] sm:$0xff]  ;;  %v87_v26 = vld [vmem:[#allocation2 + $0x1c8] sm:$0xff]  ;;  %v1799_v28 = vcombine.low %v63_v17, %v71_v18  ;;  %v49_v11 = vld [vmem:[#allocation2 + $0x98] sm:$0xff]  ;;  %v1769_v13 = vcombine.low %v32_v63, %v40_v1  ;;  %v1771_v14 = vcombine.low %v33_v2, %v41_v3  ;;  %v1786_v15 = vcombine.high %v48_v8, %v56_v9 }
  0x1a   :  { %v1814_v29 = vcombine.high %v78_v23, %v86_v24  ;;  %v1816_v30 = vcombine.high %v79_v25, %v87_v26  ;;  %v94_v31 = vld [vmem:[#allocation2 + $0x200] sm:$0xff]  ;;  %v95_v33 = vld [vmem:[#allocation2 + $0x208] sm:$0xff]  ;;  %v1813_v35 = vcombine.low %v78_v23, %v86_v24  ;;  %v1815_v36 = vcombine.low %v79_v25, %v87_v26  ;;  %v57_v12 = vld [vmem:[#allocation2 + $0xd8] sm:$0xff] }
  0x1b   :  { %807 = vmatpush1.bf16.msra.mxu0 %v1781_v19  ;;  %850 = vmatpush1.bf16.msra.mxu1 %v1783_v20  ;;  %v102_v32 = vld [vmem:[#allocation2 + $0x240] sm:$0xff]  ;;  %v103_v34 = vld [vmem:[#allocation2 + $0x248] sm:$0xff]  ;;  %v1788_v16 = vcombine.high %v49_v11, %v57_v12  ;;  %v64_v17 = vld [vmem:[#allocation2 + $0x110] sm:$0xff] }
  0x1c   :  { %808 = vmatprep.subr.bf16.mxu0 %v1798_v21  ;;  %851 = vmatprep.subr.bf16.mxu1 %v1800_v22  ;;  %v1830_v37 = vcombine.high %v94_v31, %v102_v32  ;;  %v1832_v38 = vcombine.high %v95_v33, %v103_v34  ;;  %v110_v39 = vld [vmem:[#allocation2 + $0x280] sm:$0xff]  ;;  %v111_v41 = vld [vmem:[#allocation2 + $0x288] sm:$0xff]  ;;  %v1829_v43 = vcombine.low %v94_v31, %v102_v32  ;;  %v72_v18 = vld [vmem:[#allocation2 + $0x150] sm:$0xff] }
  0x1d   :  { %v118_v40 = vld [vmem:[#allocation2 + $0x2c0] sm:$0xff]  ;;  %v119_v42 = vld [vmem:[#allocation2 + $0x2c8] sm:$0xff]  ;;  %v1831_v44 = vcombine.low %v95_v33, %v103_v34  ;;  %v65_v19 = vld [vmem:[#allocation2 + $0x118] sm:$0xff]  ;;  %v1785_v21 = vcombine.low %v48_v8, %v56_v9  ;;  %v1787_v22 = vcombine.low %v49_v11, %v57_v12  ;;  %v1802_v23 = vcombine.high %v64_v17, %v72_v18 }
  0x1e   :  { %v1846_v45 = vcombine.high %v110_v39, %v118_v40  ;;  %v1848_v46 = vcombine.high %v111_v41, %v119_v42  ;;  %v126_v47 = vld [vmem:[#allocation2 + $0x300] sm:$0xff]  ;;  %v127_v49 = vld [vmem:[#allocation2 + $0x308] sm:$0xff]  ;;  %v1845_v51 = vcombine.low %v110_v39, %v118_v40  ;;  %v1847_v52 = vcombine.low %v111_v41, %v119_v42  ;;  %v73_v20 = vld [vmem:[#allocation2 + $0x158] sm:$0xff] }
  0x1f   :  { %809 = vmatpush1.bf16.msra.mxu0 %v1797_v27  ;;  %852 = vmatpush1.bf16.msra.mxu1 %v1799_v28  ;;  %v134_v48 = vld [vmem:[#allocation2 + $0x340] sm:$0xff]  ;;  %v135_v50 = vld [vmem:[#allocation2 + $0x348] sm:$0xff]  ;;  %v1804_v24 = vcombine.high %v65_v19, %v73_v20  ;;  %v80_v25 = vld [vmem:[#allocation2 + $0x190] sm:$0xff] }
  0x20   :  { %810 = vmatprep.subr.bf16.mxu0 %v1814_v29  ;;  %853 = vmatprep.subr.bf16.mxu1 %v1816_v30  ;;  %v1862_v53 = vcombine.high %v126_v47, %v134_v48  ;;  %v1864_v54 = vcombine.high %v127_v49, %v135_v50  ;;  %v142_v55 = vld [vmem:[#allocation2 + $0x380] sm:$0xff]  ;;  %v143_v57 = vld [vmem:[#allocation2 + $0x388] sm:$0xff]  ;;  %v1861_v59 = vcombine.low %v126_v47, %v134_v48  ;;  %v88_v26 = vld [vmem:[#allocation2 + $0x1d0] sm:$0xff] }
  0x21   :  { %v150_v56 = vld [vmem:[#allocation2 + $0x3c0] sm:$0xff]  ;;  %v151_v58 = vld [vmem:[#allocation2 + $0x3c8] sm:$0xff]  ;;  %v1863_v60 = vcombine.low %v127_v49, %v135_v50  ;;  %v81_v27 = vld [vmem:[#allocation2 + $0x198] sm:$0xff]  ;;  %v1801_v29 = vcombine.low %v64_v17, %v72_v18  ;;  %v1803_v30 = vcombine.low %v65_v19, %v73_v20  ;;  %v1818_v31 = vcombine.high %v80_v25, %v88_v26 }
  0x22   :  { %v1878_v61 = vcombine.high %v142_v55, %v150_v56  ;;  %v1880_v62 = vcombine.high %v143_v57, %v151_v58  ;;  %v1877_v4 = vcombine.low %v142_v55, %v150_v56  ;;  %v1879_v5 = vcombine.low %v143_v57, %v151_v58  ;;  %v2000_v10 = vld [vmem:[%s2162_s0] sm:$0xff]   ;;  %v89_v28 = vld [vmem:[#allocation2 + $0x1d8] sm:$0xff]  ;;  %v96_v33 = vld [vmem:[#allocation2 + $0x210] sm:$0xff] }
  0x23   :  { %811 = vmatpush1.bf16.msra.mxu0 %v1813_v35  ;;  %854 = vmatpush1.bf16.msra.mxu1 %v1815_v36  ;;  %v1820_v32 = vcombine.high %v81_v27, %v89_v28  ;;  %v104_v34 = vld [vmem:[#allocation2 + $0x250] sm:$0xff]  ;;  %v97_v35 = vld [vmem:[#allocation2 + $0x218] sm:$0xff]  ;;  %v34_v2 = vld [vmem:[#allocation2 + $0x20] sm:$0xff] }
  0x24   :  { %812 = vmatprep.subr.bf16.mxu0 %v1830_v37  ;;  %855 = vmatprep.subr.bf16.mxu1 %v1832_v38  ;;  %v105_v36 = vld [vmem:[#allocation2 + $0x258] sm:$0xff]  ;;  %v1817_v37 = vcombine.low %v80_v25, %v88_v26  ;;  %v1819_v38 = vcombine.low %v81_v27, %v89_v28  ;;  %v1834_v39 = vcombine.high %v96_v33, %v104_v34  ;;  %v112_v41 = vld [vmem:[#allocation2 + $0x290] sm:$0xff]  ;;  %v42_v3 = vld [vmem:[#allocation2 + $0x60] sm:$0xff] }
  0x25   :  { %v1836_v40 = vcombine.high %v97_v35, %v105_v36  ;;  %v120_v42 = vld [vmem:[#allocation2 + $0x2d0] sm:$0xff]  ;;  %v1774_v8 = vcombine.high %v34_v2, %v42_v3  ;;  %v50_v11 = vld [vmem:[#allocation2 + $0xa0] sm:$0xff] }
  0x26   :  { %v1850_v47 = vcombine.high %v112_v41, %v120_v42  ;;  %v128_v49 = vld [vmem:[#allocation2 + $0x310] sm:$0xff]  ;;  %v58_v12 = vld [vmem:[#allocation2 + $0xe0] sm:$0xff] }
  0x27   :  { %813 = vmatpush1.bf16.msra.mxu0 %v1829_v43  ;;  %856 = vmatpush1.bf16.msra.mxu1 %v1831_v44  ;;  %v113_v43 = vld [vmem:[#allocation2 + $0x298] sm:$0xff]  ;;  %v136_v50 = vld [vmem:[#allocation2 + $0x350] sm:$0xff]  ;;  %v1790_v17 = vcombine.high %v50_v11, %v58_v12  ;;  %v66_v19 = vld [vmem:[#allocation2 + $0x120] sm:$0xff] }
  0x28   :  { %814 = vmatprep.subr.bf16.mxu0 %v1846_v45  ;;  %857 = vmatprep.subr.bf16.mxu1 %v1848_v46  ;;  %v121_v44 = vld [vmem:[#allocation2 + $0x2d8] sm:$0xff]  ;;  %v1833_v45 = vcombine.low %v96_v33, %v104_v34  ;;  %v1835_v46 = vcombine.low %v97_v35, %v105_v36  ;;  %v1866_v55 = vcombine.high %v128_v49, %v136_v50  ;;  %v144_v57 = vld [vmem:[#allocation2 + $0x390] sm:$0xff]  ;;  %v74_v20 = vld [vmem:[#allocation2 + $0x160] sm:$0xff] }
  0x29   :  { %v1852_v48 = vcombine.high %v113_v43, %v121_v44  ;;  %v152_v58 = vld [vmem:[#allocation2 + $0x3d0] sm:$0xff]  ;;  %v1806_v25 = vcombine.high %v66_v19, %v74_v20  ;;  %v82_v27 = vld [vmem:[#allocation2 + $0x1a0] sm:$0xff] }
  0x2a   :  { %v1882_v63 = vcombine.high %v144_v57, %v152_v58  ;;  %v90_v28 = vld [vmem:[#allocation2 + $0x1e0] sm:$0xff] }
  0x2b   :  { %815 = vmatpush1.bf16.msra.mxu0 %v1845_v51  ;;  %858 = vmatpush1.bf16.msra.mxu1 %v1847_v52  ;;  %v129_v51 = vld [vmem:[#allocation2 + $0x318] sm:$0xff]  ;;  %v1822_v33 = vcombine.high %v82_v27, %v90_v28  ;;  %v98_v35 = vld [vmem:[#allocation2 + $0x220] sm:$0xff] }
  0x2c   :  { %816 = vmatprep.subr.bf16.mxu0 %v1862_v53  ;;  %859 = vmatprep.subr.bf16.mxu1 %v1864_v54  ;;  %v137_v52 = vld [vmem:[#allocation2 + $0x358] sm:$0xff]  ;;  %v1849_v53 = vcombine.low %v112_v41, %v120_v42  ;;  %v1851_v54 = vcombine.low %v113_v43, %v121_v44  ;;  %v106_v36 = vld [vmem:[#allocation2 + $0x260] sm:$0xff] }
  0x2d   :  { %v1868_v56 = vcombine.high %v129_v51, %v137_v52  ;;  %v1838_v41 = vcombine.high %v98_v35, %v106_v36  ;;  %v114_v43 = vld [vmem:[#allocation2 + $0x2a0] sm:$0xff] }
  0x2e   :  { %v122_v44 = vld [vmem:[#allocation2 + $0x2e0] sm:$0xff] }
  0x2f   :  { %817 = vmatpush1.bf16.msra.mxu0 %v1861_v59  ;;  %860 = vmatpush1.bf16.msra.mxu1 %v1863_v60  ;;  %v145_v59 = vld [vmem:[#allocation2 + $0x398] sm:$0xff] }
  0x30   :  { %818 = vmatprep.subr.bf16.mxu0 %v1878_v61  ;;  %861 = vmatprep.subr.bf16.mxu1 %v1880_v62  ;;  %v153_v60 = vld [vmem:[#allocation2 + $0x3d8] sm:$0xff]  ;;  %v1865_v61 = vcombine.low %v128_v49, %v136_v50  ;;  %v1867_v62 = vcombine.low %v129_v51, %v137_v52  ;;  %v1854_v49 = vcombine.high %v114_v43, %v122_v44  ;;  %v130_v51 = vld [vmem:[#allocation2 + $0x320] sm:$0xff] }
  0x31   :  { %v1884_v1 = vcombine.high %v145_v59, %v153_v60  ;;  %v138_v52 = vld [vmem:[#allocation2 + $0x360] sm:$0xff] }
  0x33   :  { %819 = vmatpush1.bf16.msra.mxu0 %v1877_v4  ;;  %862 = vmatpush1.bf16.msra.mxu1 %v1879_v5  ;;  %v35_v4 = vld [vmem:[#allocation2 + $0x28] sm:$0xff] }
  0x34   :  { %890 = vmatprep.subr.bf16.mxu0 %v1770_v6  ;;  %933 = vmatprep.subr.bf16.mxu1 %v1772_v7  ;;  %v43_v5 = vld [vmem:[#allocation2 + $0x68] sm:$0xff]  ;;  %v1881_v6 = vcombine.low %v144_v57, %v152_v58  ;;  %v1883_v7 = vcombine.low %v145_v59, %v153_v60  ;;  %v1870_v57 = vcombine.high %v130_v51, %v138_v52  ;;  %v146_v59 = vld [vmem:[#allocation2 + $0x3a0] sm:$0xff] }
  0x35   :  { %v1776_v9 = vcombine.high %v35_v4, %v43_v5  ;;  %v154_v60 = vld [vmem:[#allocation2 + $0x3e0] sm:$0xff] }
  0x36   :  { %837 = vmatmul.mubr.bf16.vlgmr.msra.gmra.mrb[0].mxu0 %v2000_v10  ;;  %880 = vmatmul.mubr.bf16.vlgmr.msra.gmra.mrb[0].mxu1 %v2000_v10 }
  0x37   :  { %891 = vmatpush1.bf16.msra.mxu0 %v1769_v13  ;;  %934 = vmatpush1.bf16.msra.mxu1 %v1771_v14  ;;  %v51_v13 = vld [vmem:[#allocation2 + $0xa8] sm:$0xff] }
  0x38   :  { %892 = vmatprep.subr.bf16.mxu0 %v1786_v15  ;;  %935 = vmatprep.subr.bf16.mxu1 %v1788_v16  ;;  %v59_v14 = vld [vmem:[#allocation2 + $0xe8] sm:$0xff]  ;;  %v1773_v15 = vcombine.low %v34_v2, %v42_v3  ;;  %v1775_v16 = vcombine.low %v35_v4, %v43_v5  ;;  %v1886_v2 = vcombine.high %v146_v59, %v154_v60  ;;  %v36_v4 = vld [vmem:[#allocation2 + $0x30] sm:$0xff] }
  0x39   :  { %922 = vmatprep.mubr.bf16.mxu0 %v1961_v0  ;;  %965 = vmatprep.mubr.bf16.mxu1 %v1961_v0  ;;  %v1792_v18 = vcombine.high %v51_v13, %v59_v14  ;;  %v44_v5 = vld [vmem:[#allocation2 + $0x70] sm:$0xff] }
  0x3b   :  { %893 = vmatpush1.bf16.msra.mxu0 %v1785_v21  ;;  %936 = vmatpush1.bf16.msra.mxu1 %v1787_v22  ;;  %v67_v21 = vld [vmem:[#allocation2 + $0x128] sm:$0xff] }
  0x3c   :  { %894 = vmatprep.subr.bf16.mxu0 %v1802_v23  ;;  %937 = vmatprep.subr.bf16.mxu1 %v1804_v24  ;;  %v75_v22 = vld [vmem:[#allocation2 + $0x168] sm:$0xff]  ;;  %v1789_v23 = vcombine.low %v50_v11, %v58_v12  ;;  %v1791_v24 = vcombine.low %v51_v13, %v59_v14  ;;  %v1778_v11 = vcombine.high %v36_v4, %v44_v5  ;;  %v52_v13 = vld [vmem:[#allocation2 + $0xb0] sm:$0xff] }
  0x3d   :  { %v1808_v26 = vcombine.high %v67_v21, %v75_v22  ;;  %v60_v14 = vld [vmem:[#allocation2 + $0xf0] sm:$0xff] }
  0x3f   :  { %895 = vmatpush1.bf16.msra.mxu0 %v1801_v29  ;;  %938 = vmatpush1.bf16.msra.mxu1 %v1803_v30  ;;  %v83_v29 = vld [vmem:[#allocation2 + $0x1a8] sm:$0xff] }
  0x40   :  { %896 = vmatprep.subr.bf16.mxu0 %v1818_v31  ;;  %939 = vmatprep.subr.bf16.mxu1 %v1820_v32  ;;  %v91_v30 = vld [vmem:[#allocation2 + $0x1e8] sm:$0xff]  ;;  %v1805_v31 = vcombine.low %v66_v19, %v74_v20  ;;  %v1807_v32 = vcombine.low %v67_v21, %v75_v22  ;;  %v1794_v19 = vcombine.high %v52_v13, %v60_v14  ;;  %v68_v21 = vld [vmem:[#allocation2 + $0x130] sm:$0xff] }
  0x41   :  { %v1824_v34 = vcombine.high %v83_v29, %v91_v30  ;;  %v76_v22 = vld [vmem:[#allocation2 + $0x170] sm:$0xff] }
  0x43   :  { %897 = vmatpush1.bf16.msra.mxu0 %v1817_v37  ;;  %940 = vmatpush1.bf16.msra.mxu1 %v1819_v38  ;;  %v99_v37 = vld [vmem:[#allocation2 + $0x228] sm:$0xff] }
  0x44   :  { %898 = vmatprep.subr.bf16.mxu0 %v1834_v39  ;;  %941 = vmatprep.subr.bf16.mxu1 %v1836_v40  ;;  %v107_v38 = vld [vmem:[#allocation2 + $0x268] sm:$0xff]  ;;  %v1821_v39 = vcombine.low %v82_v27, %v90_v28  ;;  %v1823_v40 = vcombine.low %v83_v29, %v91_v30  ;;  %v1810_v27 = vcombine.high %v68_v21, %v76_v22  ;;  %v84_v29 = vld [vmem:[#allocation2 + $0x1b0] sm:$0xff] }
  0x45   :  { %v1840_v42 = vcombine.high %v99_v37, %v107_v38  ;;  %v92_v30 = vld [vmem:[#allocation2 + $0x1f0] sm:$0xff] }
  0x47   :  { %899 = vmatpush1.bf16.msra.mxu0 %v1833_v45  ;;  %942 = vmatpush1.bf16.msra.mxu1 %v1835_v46  ;;  %v115_v45 = vld [vmem:[#allocation2 + $0x2a8] sm:$0xff] }
  0x48   :  { %900 = vmatprep.subr.bf16.mxu0 %v1850_v47  ;;  %943 = vmatprep.subr.bf16.mxu1 %v1852_v48  ;;  %v123_v46 = vld [vmem:[#allocation2 + $0x2e8] sm:$0xff]  ;;  %v1837_v47 = vcombine.low %v98_v35, %v106_v36  ;;  %v1839_v48 = vcombine.low %v99_v37, %v107_v38  ;;  %v1826_v35 = vcombine.high %v84_v29, %v92_v30  ;;  %v100_v37 = vld [vmem:[#allocation2 + $0x230] sm:$0xff] }
  0x49   :  { %v1856_v50 = vcombine.high %v115_v45, %v123_v46  ;;  %v108_v38 = vld [vmem:[#allocation2 + $0x270] sm:$0xff] }
  0x4b   :  { %901 = vmatpush1.bf16.msra.mxu0 %v1849_v53  ;;  %944 = vmatpush1.bf16.msra.mxu1 %v1851_v54  ;;  %v131_v53 = vld [vmem:[#allocation2 + $0x328] sm:$0xff] }
  0x4c   :  { %902 = vmatprep.subr.bf16.mxu0 %v1866_v55  ;;  %945 = vmatprep.subr.bf16.mxu1 %v1868_v56  ;;  %v139_v54 = vld [vmem:[#allocation2 + $0x368] sm:$0xff]  ;;  %v1853_v55 = vcombine.low %v114_v43, %v122_v44  ;;  %v1855_v56 = vcombine.low %v115_v45, %v123_v46  ;;  %v1842_v43 = vcombine.high %v100_v37, %v108_v38  ;;  %v116_v44 = vld [vmem:[#allocation2 + $0x2b0] sm:$0xff]  ;;  %v117_v46 = vld [vmem:[#allocation2 + $0x2b8] sm:$0xff] }
  0x4d   :  { %v1872_v58 = vcombine.high %v131_v53, %v139_v54  ;;  %v124_v45 = vld [vmem:[#allocation2 + $0x2f0] sm:$0xff] }
  0x4f   :  { %903 = vmatpush1.bf16.msra.mxu0 %v1865_v61  ;;  %946 = vmatpush1.bf16.msra.mxu1 %v1867_v62  ;;  %v147_v61 = vld [vmem:[#allocation2 + $0x3a8] sm:$0xff] }
  0x50   :  { %904 = vmatprep.subr.bf16.mxu0 %v1882_v63  ;;  %947 = vmatprep.subr.bf16.mxu1 %v1884_v1  ;;  %v155_v62 = vld [vmem:[#allocation2 + $0x3e8] sm:$0xff]  ;;  %v1869_v63 = vcombine.low %v130_v51, %v138_v52  ;;  %v1871_v1 = vcombine.low %v131_v53, %v139_v54  ;;  %v132_v52 = vld [vmem:[#allocation2 + $0x330] sm:$0xff]  ;;  %v133_v54 = vld [vmem:[#allocation2 + $0x338] sm:$0xff] }
  0x51   :  { %v1888_v3 = vcombine.high %v147_v61, %v155_v62  ;;  %v140_v53 = vld [vmem:[#allocation2 + $0x370] sm:$0xff] }
  0x53   :  { %905 = vmatpush1.bf16.msra.mxu0 %v1881_v6  ;;  %948 = vmatpush1.bf16.msra.mxu1 %v1883_v7  ;;  %v37_v6 = vld [vmem:[#allocation2 + $0x38] sm:$0xff] }
  0x54   :  { %976 = vmatprep.subr.bf16.mxu0 %v1774_v8  ;;  %1019 = vmatprep.subr.bf16.mxu1 %v1776_v9  ;;  %v45_v7 = vld [vmem:[#allocation2 + $0x78] sm:$0xff]  ;;  %v1885_v8 = vcombine.low %v146_v59, %v154_v60  ;;  %v1887_v9 = vcombine.low %v147_v61, %v155_v62  ;;  %v148_v60 = vld [vmem:[#allocation2 + $0x3b0] sm:$0xff] }
  0x55   :  { %v1780_v12 = vcombine.high %v37_v6, %v45_v7  ;;  %v156_v61 = vld [vmem:[#allocation2 + $0x3f0] sm:$0xff]  ;;  %v149_v62 = vld [vmem:[#allocation2 + $0x3b8] sm:$0xff] }
  0x56   :  { %923 = vmatmul.mubr.bf16.vlgmr.msra.gmra.mrb[4].mxu0 %v2000_v10  ;;  %966 = vmatmul.mubr.bf16.vlgmr.msra.gmra.mrb[4].mxu1 %v2000_v10 }
  0x57   :  { %977 = vmatpush1.bf16.msra.mxu0 %v1773_v15  ;;  %1020 = vmatpush1.bf16.msra.mxu1 %v1775_v16  ;;  %v53_v15 = vld [vmem:[#allocation2 + $0xb8] sm:$0xff] }
  0x58   :  { %978 = vmatprep.subr.bf16.mxu0 %v1790_v17  ;;  %1021 = vmatprep.subr.bf16.mxu1 %v1792_v18  ;;  %v61_v16 = vld [vmem:[#allocation2 + $0xf8] sm:$0xff]  ;;  %v1777_v17 = vcombine.low %v36_v4, %v44_v5  ;;  %v1779_v18 = vcombine.low %v37_v6, %v45_v7  ;;  %v1889_v5 = vcombine.low %v148_v60, %v156_v61  ;;  %v1962_v7 = vmov 1966171168  }
  0x59   :  { %1008 = vmatprep.mubr.bf16.mxu0 %v1961_v0  ;;  %1051 = vmatprep.mubr.bf16.mxu1 %v1961_v0  ;;  %v1796_v20 = vcombine.high %v53_v15, %v61_v16 }
  0x5b   :  { %979 = vmatpush1.bf16.msra.mxu0 %v1789_v23  ;;  %1022 = vmatpush1.bf16.msra.mxu1 %v1791_v24  ;;  %v69_v23 = vld [vmem:[#allocation2 + $0x138] sm:$0xff] }
  0x5c   :  { %980 = vmatprep.subr.bf16.mxu0 %v1806_v25  ;;  %1023 = vmatprep.subr.bf16.mxu1 %v1808_v26  ;;  %v77_v24 = vld [vmem:[#allocation2 + $0x178] sm:$0xff]  ;;  %v1793_v25 = vcombine.low %v52_v13, %v60_v14  ;;  %v1795_v26 = vcombine.low %v53_v15, %v61_v16 }
  0x5d   :  { %v1812_v28 = vcombine.high %v69_v23, %v77_v24 }
  0x5f   :  { %981 = vmatpush1.bf16.msra.mxu0 %v1805_v31  ;;  %1024 = vmatpush1.bf16.msra.mxu1 %v1807_v32  ;;  %v85_v31 = vld [vmem:[#allocation2 + $0x1b8] sm:$0xff] }
  0x60   :  { %982 = vmatprep.subr.bf16.mxu0 %v1822_v33  ;;  %1025 = vmatprep.subr.bf16.mxu1 %v1824_v34  ;;  %v93_v32 = vld [vmem:[#allocation2 + $0x1f8] sm:$0xff]  ;;  %v1809_v33 = vcombine.low %v68_v21, %v76_v22  ;;  %v1811_v34 = vcombine.low %v69_v23, %v77_v24 }
  0x61   :  { %v1828_v36 = vcombine.high %v85_v31, %v93_v32 }
  0x63   :  { %983 = vmatpush1.bf16.msra.mxu0 %v1821_v39  ;;  %1026 = vmatpush1.bf16.msra.mxu1 %v1823_v40  ;;  %v101_v39 = vld [vmem:[#allocation2 + $0x238] sm:$0xff] }
  0x64   :  { %984 = vmatprep.subr.bf16.mxu0 %v1838_v41  ;;  %1027 = vmatprep.subr.bf16.mxu1 %v1840_v42  ;;  %v109_v40 = vld [vmem:[#allocation2 + $0x278] sm:$0xff]  ;;  %v1825_v41 = vcombine.low %v84_v29, %v92_v30  ;;  %v1827_v42 = vcombine.low %v85_v31, %v93_v32 }
  0x67   :  { %985 = vmatpush1.bf16.msra.mxu0 %v1837_v47  ;;  %1028 = vmatpush1.bf16.msra.mxu1 %v1839_v48  ;;  %v125_v47 = vld [vmem:[#allocation2 + $0x2f8] sm:$0xff]  ;;  %v1841_v48 = vcombine.low %v100_v37, %v108_v38 }
  0x68   :  { %986 = vmatprep.subr.bf16.mxu0 %v1854_v49  ;;  %1029 = vmatprep.subr.bf16.mxu1 %v1856_v50  ;;  %v1843_v49 = vcombine.low %v101_v39, %v109_v40  ;;  %v1858_v50 = vcombine.high %v116_v44, %v124_v45  ;;  %v1860_v51 = vcombine.high %v117_v46, %v125_v47 }
  0x6b   :  { %987 = vmatpush1.bf16.msra.mxu0 %v1853_v55  ;;  %1030 = vmatpush1.bf16.msra.mxu1 %v1855_v56  ;;  %v141_v55 = vld [vmem:[#allocation2 + $0x378] sm:$0xff]  ;;  %v1857_v56 = vcombine.low %v116_v44, %v124_v45 }
  0x6c   :  { %988 = vmatprep.subr.bf16.mxu0 %v1870_v57  ;;  %1031 = vmatprep.subr.bf16.mxu1 %v1872_v58  ;;  %v1859_v57 = vcombine.low %v117_v46, %v125_v47  ;;  %v1874_v58 = vcombine.high %v132_v52, %v140_v53  ;;  %v1876_v59 = vcombine.high %v133_v54, %v141_v55 }
  0x6f   :  { %989 = vmatpush1.bf16.msra.mxu0 %v1869_v63  ;;  %1032 = vmatpush1.bf16.msra.mxu1 %v1871_v1  ;;  %v157_v63 = vld [vmem:[#allocation2 + $0x3f8] sm:$0xff]  ;;  %v1873_v1 = vcombine.low %v132_v52, %v140_v53 }
  0x70   :  { %990 = vmatprep.subr.bf16.mxu0 %v1886_v2  ;;  %1033 = vmatprep.subr.bf16.mxu1 %v1888_v3  ;;  %v1875_v2 = vcombine.low %v133_v54, %v141_v55  ;;  %v1890_v3 = vcombine.high %v148_v60, %v156_v61  ;;  %v1892_v4 = vcombine.high %v149_v62, %v157_v63 }
  0x71   :  { %v1891_v6 = vcombine.low %v149_v62, %v157_v63 }
  0x73   :  { %991 = vmatpush1.bf16.msra.mxu0 %v1885_v8  ;;  %1034 = vmatpush1.bf16.msra.mxu1 %v1887_v9  ;;  %v1281_v8 = vunpack.c.l.s4 %v1962_v7  ;;  %v1283_v9 = vlaneseq }
  0x74   :  { %1062 = vmatprep.subr.bf16.mxu0 %v1778_v11  ;;  %1105 = vmatprep.subr.bf16.mxu1 %v1780_v12 }
  0x75   :  { %v1282_v11 = vunpack.c.0.s8 %v1281_v8  ;;  %v1284_v12 = vshrl.u32 %v1283_v9, 7 }
  0x76   :  { %1009 = vmatmul.mubr.bf16.vlgmr.msra.gmra.mrb[8].mxu0 %v2000_v10  ;;  %1052 = vmatmul.mubr.bf16.vlgmr.msra.gmra.mrb[8].mxu1 %v2000_v10 }
  0x77   :  { %1063 = vmatpush1.bf16.msra.mxu0 %v1777_v17  ;;  %1106 = vmatpush1.bf16.msra.mxu1 %v1779_v18  ;;  %v2016_v22 = vsub.s32 %v1282_v11, %v1284_v12 }
  0x78   :  { %1064 = vmatprep.subr.bf16.mxu0 %v1794_v19  ;;  %1107 = vmatprep.subr.bf16.mxu1 %v1796_v20 }
  0x79   :  { %1094 = vmatprep.mubr.bf16.mxu0 %v1961_v0  ;;  %1137 = vmatprep.mubr.bf16.mxu1 %v1961_v0  ;;  %v1844_v0 = vcombine.high %v101_v39, %v109_v40 }
  0x7b   :  { %1065 = vmatpush1.bf16.msra.mxu0 %v1793_v25  ;;  %1108 = vmatpush1.bf16.msra.mxu1 %v1795_v26 }
  0x7c   :  { %1066 = vmatprep.subr.bf16.mxu0 %v1810_v27  ;;  %1109 = vmatprep.subr.bf16.mxu1 %v1812_v28 }
  0x7f   :  { %1067 = vmatpush1.bf16.msra.mxu0 %v1809_v33  ;;  %1110 = vmatpush1.bf16.msra.mxu1 %v1811_v34 }
  0x80   :  { %1068 = vmatprep.subr.bf16.mxu0 %v1826_v35  ;;  %1111 = vmatprep.subr.bf16.mxu1 %v1828_v36 }
  0x83   :  { %1069 = vmatpush1.bf16.msra.mxu0 %v1825_v41  ;;  %1112 = vmatpush1.bf16.msra.mxu1 %v1827_v42 }
  0x84   :  { %1070 = vmatprep.subr.bf16.mxu0 %v1842_v43  ;;  %1113 = vmatprep.subr.bf16.mxu1 %v1844_v0 }
  0x87   :  { %1071 = vmatpush1.bf16.msra.mxu0 %v1841_v48  ;;  %1114 = vmatpush1.bf16.msra.mxu1 %v1843_v49 }
  0x88   :  { %1072 = vmatprep.subr.bf16.mxu0 %v1858_v50  ;;  %1115 = vmatprep.subr.bf16.mxu1 %v1860_v51 }
  0x8b   :  { %1073 = vmatpush1.bf16.msra.mxu0 %v1857_v56  ;;  %1116 = vmatpush1.bf16.msra.mxu1 %v1859_v57 }
  0x8c   :  { %1074 = vmatprep.subr.bf16.mxu0 %v1874_v58  ;;  %1117 = vmatprep.subr.bf16.mxu1 %v1876_v59 }
  0x8f   :  { %1075 = vmatpush1.bf16.msra.mxu0 %v1873_v1  ;;  %1118 = vmatpush1.bf16.msra.mxu1 %v1875_v2 }
  0x90   :  { %1076 = vmatprep.subr.bf16.mxu0 %v1890_v3  ;;  %1119 = vmatprep.subr.bf16.mxu1 %v1892_v4 }
  0x93   :  { %1077 = vmatpush1.bf16.msra.mxu0 %v1889_v5  ;;  %1120 = vmatpush1.bf16.msra.mxu1 %v1891_v6 }
  0x96   :  { %1095 = vmatmul.mubr.bf16.vlgmr.msra.gmra.mrb[12].mxu0 %v2000_v10  ;;  %1138 = vmatmul.mubr.bf16.vlgmr.msra.gmra.mrb[12].mxu1 %v2000_v10 }
 0x109   :  { %v838_v13 = vpop.f32.mrb[0].mxu0  ;;  %v881_v15 = vpop.f32.mrb[0].mxu1 }
 0x10a   :  { %v1379_v14 = vmul.f32 %v838_v13, %v838_v13  ;;  %v840_v16 = vpop.f32.mrb[1].mxu0  ;;  %v1381_v17 = vmul.f32 %v881_v15, %v881_v15  ;;  %v883_v20 = vpop.f32.mrb[1].mxu1 }
 0x10b   :  { %v1380_v18 = vmul.f32 %v840_v16, %v840_v16  ;;  %v1912_v19 = vpack.c.bf16 %v840_v16, %v838_v13  ;;  %v842_v21 = vpop.f32.mrb[2].mxu0  ;;  %v1382_v23 = vmul.f32 %v883_v20, %v883_v20  ;;  %v1913_v24 = vpack.c.bf16 %v883_v20, %v881_v15  ;;  %v2018_v26 = vpop.f32.mrb[2].mxu1 }
 0x10c   :  { %v1148_v25 = vadd.f32 %v842_v21, %v838_v13  ;;  %v1395_v10 = vmul.f32 %v842_v21, %v842_v21  ;;  %v844_v27 = vpop.f32.mrb[3].mxu0  ;;  %v1162_v28 = vadd.f32 %v2018_v26, %v881_v15  ;;  %v1397_v29 = vmul.f32 %v2018_v26, %v2018_v26  ;;  %v887_v32 = vpop.f32.mrb[3].mxu1 }
 0x10d   :  { %1739 = vst [vmem:[%s2164_s2] sm:$0xff] %v1912_v19  ;;  %v1155_v30 = vadd.f32 %v844_v27, %v840_v16  ;;  %v1396_v31 = vmul.f32 %v844_v27, %v844_v27  ;;  %1740 = vst [vmem:[%s2164_s2 + $0x8] sm:$0xff] %v1913_v24  ;;  %v1920_v35 = vpack.c.bf16 %v844_v27, %v842_v21 }
 0x10e   :  { %v1149_v33 = vrot.slane %v1148_v25, 4  ;;  %v1411_v34 = vadd.f32 %v1395_v10, %v1379_v14  ;;  %v1169_v36 = vadd.f32 %v887_v32, %v883_v20  ;;  %v1163_v37 = vrot.slane %v1162_v28, 4 }
 0x10f   :  { %v1425_v38 = vadd.f32 %v1397_v29, %v1381_v17  ;;  %v1156_v39 = vrot.slane %v1155_v30, 4  ;;  %v1418_v40 = vadd.f32 %v1396_v31, %v1380_v18  ;;  %1747 = vst [vmem:[%s2164_s2 + $0x40] sm:$0xff] %v1920_v35  ;;  %v1398_v0 = vmul.f32 %v887_v32, %v887_v32 }
 0x110   :  { %v1150_v41 = vadd.f32 %v1149_v33, %v1148_v25  ;;  %v1412_v42 = vrot.slane %v1411_v34, 4  ;;  %v1170_v43 = vrot.slane %v1169_v36, 4  ;;  %v1164_v44 = vadd.f32 %v1163_v37, %v1162_v28 }
 0x111   :  { %v1426_v45 = vrot.slane %v1425_v38, 4  ;;  %v1157_v46 = vadd.f32 %v1156_v39, %v1155_v30  ;;  %v1419_v47 = vrot.slane %v1418_v40, 4  ;;  %v1432_v51 = vadd.f32 %v1398_v0, %v1382_v23 }
 0x112   :  { %v1151_v48 = vrot.slane %v1150_v41, 2  ;;  %v1413_v49 = vadd.f32 %v1412_v42, %v1411_v34  ;;  %v1171_v50 = vadd.f32 %v1170_v43, %v1169_v36  ;;  %v1165_v52 = vrot.slane %v1164_v44, 2 }
 0x113   :  { %v1427_v53 = vadd.f32 %v1426_v45, %v1425_v38  ;;  %v1158_v54 = vrot.slane %v1157_v46, 2  ;;  %v1420_v55 = vadd.f32 %v1419_v47, %v1418_v40  ;;  %v1433_v59 = vrot.slane %v1432_v51, 4 }
 0x114   :  { %v1152_v56 = vadd.f32 %v1151_v48, %v1150_v41  ;;  %v1414_v57 = vrot.slane %v1413_v49, 2  ;;  %v1172_v58 = vrot.slane %v1171_v50, 2  ;;  %v1166_v60 = vadd.f32 %v1165_v52, %v1164_v44 }
 0x115   :  { %v1428_v61 = vrot.slane %v1427_v53, 2  ;;  %v1159_v62 = vadd.f32 %v1158_v54, %v1157_v46  ;;  %v1421_v63 = vrot.slane %v1420_v55, 2  ;;  %v1434_v4 = vadd.f32 %v1433_v59, %v1432_v51 }
 0x116   :  { %v1153_v1 = vrot.slane %v1152_v56, 1  ;;  %v1415_v2 = vadd.f32 %v1414_v57, %v1413_v49  ;;  %v1173_v3 = vadd.f32 %v1172_v58, %v1171_v50  ;;  %v1167_v5 = vrot.slane %v1166_v60, 1 }
 0x117   :  { %v1429_v6 = vadd.f32 %v1428_v61, %v1427_v53  ;;  %v1160_v7 = vrot.slane %v1159_v62, 1  ;;  %v1422_v8 = vadd.f32 %v1421_v63, %v1420_v55  ;;  %v1435_v13 = vrot.slane %v1434_v4, 2 }
 0x118   :  { %v1154_v9 = vadd.f32 %v1153_v1, %v1152_v56  ;;  %v1416_v11 = vrot.slane %v1415_v2, 1  ;;  %v1174_v12 = vrot.slane %v1173_v3, 1  ;;  %v1168_v14 = vadd.f32 %v1167_v5, %v1166_v60 }
 0x119   :  { %v1430_v15 = vrot.slane %v1429_v6, 1  ;;  %v1161_v16 = vadd.f32 %v1160_v7, %v1159_v62  ;;  %v1423_v17 = vrot.slane %v1422_v8, 1  ;;  %v1436_v20 = vadd.f32 %v1435_v13, %v1434_v4 }
 0x11a   :  { %v1417_v18 = vadd.f32 %v1416_v11, %v1415_v2  ;;  %v1175_v19 = vadd.f32 %v1174_v12, %v1173_v3  ;;  %v1921_v21 = vpack.c.bf16 %v887_v32, %v2018_v26 }
 0x11b   :  { %v1276_v23 = vcombine.low %v1154_v9, %v1161_v16  ;;  %v1424_v24 = vadd.f32 %v1423_v17, %v1422_v8  ;;  %v1431_v25 = vadd.f32 %v1430_v15, %v1429_v6  ;;  %v1437_v27 = vrot.slane %v1436_v20, 1 }
 0x11c   :  { %v1277_v10 = vcombine.low %v1168_v14, %v1175_v19  ;;  %1748 = vst [vmem:[%s2164_s2 + $0x48] sm:$0xff] %v1921_v21 }
 0x11d   :  { %v2037_v28 = vrot.slane %v1276_v23, %v2016_v22  ;;  %v1539_v29 = vcombine.low %v1417_v18, %v1424_v24  ;;  %v1438_v31 = vadd.f32 %v1437_v27, %v1436_v20 }
 0x11e   :  { %v2040_v30 = vrot.slane %v1277_v10, %v2016_v22 }
 0x11f   :  { %v2043_v33 = vrot.slane %v1539_v29, %v2016_v22  ;;  %v1540_v32 = vcombine.low %v1431_v25, %v1438_v31 }
 0x120   :  { %v1308_v26 = vcombine.low %v2037_v28, %v2040_v30 }
 0x121   :  { %v2048_v34 = vrot.slane %v1540_v32, %v2016_v22 }
 0x123   :  { %v1571_v35 = vcombine.low %v2043_v33, %v2048_v34 }
 0x129   :  { %v924_v36 = vpop.f32.mrb[4].mxu0  ;;  %v967_v38 = vpop.f32.mrb[4].mxu1 }
 0x12a   :  { %v1383_v37 = vmul.f32 %v924_v36, %v924_v36  ;;  %v926_v39 = vpop.f32.mrb[5].mxu0  ;;  %v1385_v40 = vmul.f32 %v967_v38, %v967_v38  ;;  %v969_v43 = vpop.f32.mrb[5].mxu1 }
 0x12b   :  { %v1384_v41 = vmul.f32 %v926_v39, %v926_v39  ;;  %v1914_v42 = vpack.c.bf16 %v926_v39, %v924_v36  ;;  %v928_v0 = vpop.f32.mrb[6].mxu0  ;;  %v1386_v44 = vmul.f32 %v969_v43, %v969_v43  ;;  %v1915_v45 = vpack.c.bf16 %v969_v43, %v967_v38  ;;  %v2052_v48 = vpop.f32.mrb[6].mxu1 }
 0x12c   :  { %v1176_v46 = vadd.f32 %v928_v0, %v924_v36  ;;  %v1399_v47 = vmul.f32 %v928_v0, %v928_v0  ;;  %v930_v49 = vpop.f32.mrb[7].mxu0  ;;  %v1190_v50 = vadd.f32 %v2052_v48, %v967_v38  ;;  %v1401_v51 = vmul.f32 %v2052_v48, %v2052_v48  ;;  %v973_v54 = vpop.f32.mrb[7].mxu1 }
 0x12d   :  { %1741 = vst [vmem:[%s2164_s2 + $0x10] sm:$0xff] %v1914_v42  ;;  %v1183_v52 = vadd.f32 %v930_v49, %v926_v39  ;;  %v1400_v53 = vmul.f32 %v930_v49, %v930_v49  ;;  %1742 = vst [vmem:[%s2164_s2 + $0x18] sm:$0xff] %v1915_v45  ;;  %v1922_v57 = vpack.c.bf16 %v930_v49, %v928_v0 }
 0x12e   :  { %v1177_v55 = vrot.slane %v1176_v46, 4  ;;  %v1439_v56 = vadd.f32 %v1399_v47, %v1383_v37  ;;  %v1197_v58 = vadd.f32 %v973_v54, %v969_v43  ;;  %v1191_v59 = vrot.slane %v1190_v50, 4 }
 0x12f   :  { %v1453_v60 = vadd.f32 %v1401_v51, %v1385_v40  ;;  %v1184_v61 = vrot.slane %v1183_v52, 4  ;;  %v1446_v62 = vadd.f32 %v1400_v53, %v1384_v41  ;;  %1749 = vst [vmem:[%s2164_s2 + $0x50] sm:$0xff] %v1922_v57  ;;  %v1402_v3 = vmul.f32 %v973_v54, %v973_v54 }
 0x130   :  { %v1178_v63 = vadd.f32 %v1177_v55, %v1176_v46  ;;  %v1440_v1 = vrot.slane %v1439_v56, 4  ;;  %v1198_v2 = vrot.slane %v1197_v58, 4  ;;  %v1192_v4 = vadd.f32 %v1191_v59, %v1190_v50 }
 0x131   :  { %v1454_v5 = vrot.slane %v1453_v60, 4  ;;  %v1185_v6 = vadd.f32 %v1184_v61, %v1183_v52  ;;  %v1447_v7 = vrot.slane %v1446_v62, 4  ;;  %v1460_v12 = vadd.f32 %v1402_v3, %v1386_v44 }
 0x132   :  { %v1179_v8 = vrot.slane %v1178_v63, 2  ;;  %v1441_v9 = vadd.f32 %v1440_v1, %v1439_v56  ;;  %v1199_v11 = vadd.f32 %v1198_v2, %v1197_v58  ;;  %v1193_v13 = vrot.slane %v1192_v4, 2 }
 0x133   :  { %v1455_v14 = vadd.f32 %v1454_v5, %v1453_v60  ;;  %v1186_v15 = vrot.slane %v1185_v6, 2  ;;  %v1448_v16 = vadd.f32 %v1447_v7, %v1446_v62  ;;  %v1461_v20 = vrot.slane %v1460_v12, 4 }
 0x134   :  { %v1180_v17 = vadd.f32 %v1179_v8, %v1178_v63  ;;  %v1442_v18 = vrot.slane %v1441_v9, 2  ;;  %v1200_v19 = vrot.slane %v1199_v11, 2  ;;  %v1194_v21 = vadd.f32 %v1193_v13, %v1192_v4 }
 0x135   :  { %v1456_v23 = vrot.slane %v1455_v14, 2  ;;  %v1187_v24 = vadd.f32 %v1186_v15, %v1185_v6  ;;  %v1449_v25 = vrot.slane %v1448_v16, 2  ;;  %v1462_v31 = vadd.f32 %v1461_v20, %v1460_v12 }
 0x136   :  { %v1181_v10 = vrot.slane %v1180_v17, 1  ;;  %v1443_v27 = vadd.f32 %v1442_v18, %v1441_v9  ;;  %v1201_v29 = vadd.f32 %v1200_v19, %v1199_v11  ;;  %v1195_v32 = vrot.slane %v1194_v21, 1 }
 0x137   :  { %v1457_v36 = vadd.f32 %v1456_v23, %v1455_v14  ;;  %v1188_v37 = vrot.slane %v1187_v24, 1  ;;  %v1450_v38 = vadd.f32 %v1449_v25, %v1448_v16  ;;  %v1463_v42 = vrot.slane %v1462_v31, 2 }
 0x138   :  { %v1182_v39 = vadd.f32 %v1181_v10, %v1180_v17  ;;  %v1444_v40 = vrot.slane %v1443_v27, 1  ;;  %v1202_v41 = vrot.slane %v1201_v29, 1  ;;  %v1196_v43 = vadd.f32 %v1195_v32, %v1194_v21 }
 0x139   :  { %v1458_v0 = vrot.slane %v1457_v36, 1  ;;  %v1189_v44 = vadd.f32 %v1188_v37, %v1187_v24  ;;  %v1451_v45 = vrot.slane %v1450_v38, 1  ;;  %v1464_v49 = vadd.f32 %v1463_v42, %v1462_v31 }
 0x13a   :  { %v1445_v46 = vadd.f32 %v1444_v40, %v1443_v27  ;;  %v1203_v47 = vadd.f32 %v1202_v41, %v1201_v29  ;;  %v1923_v50 = vpack.c.bf16 %v973_v54, %v2052_v48  ;;  %v1316_v48 = vrot.slane %v1308_v26, %v2016_v22 }
 0x13b   :  { %v1278_v51 = vcombine.low %v1182_v39, %v1189_v44  ;;  %v1452_v52 = vadd.f32 %v1451_v45, %v1450_v38  ;;  %v1459_v53 = vadd.f32 %v1458_v0, %v1457_v36  ;;  %v1465_v56 = vrot.slane %v1464_v49, 1 }
 0x13c   :  { %v1279_v55 = vcombine.low %v1196_v43, %v1203_v47  ;;  %1750 = vst [vmem:[%s2164_s2 + $0x58] sm:$0xff] %v1923_v50  ;;  %v1579_v4 = vrot.slane %v1571_v35, %v2016_v22 }
 0x13d   :  { %v1300_v57 = vrot.slane %v1278_v51, %v2016_v22  ;;  %v1541_v58 = vcombine.low %v1445_v46, %v1452_v52  ;;  %v1466_v60 = vadd.f32 %v1465_v56, %v1464_v49 }
 0x13e   :  { %v1307_v59 = vrot.slane %v1279_v55, %v2016_v22 }
 0x13f   :  { %v1563_v61 = vrot.slane %v1541_v58, %v2016_v22  ;;  %v1542_v63 = vcombine.low %v1459_v53, %v1466_v60 }
 0x140   :  { %v1309_v62 = vcombine.low %v1300_v57, %v1307_v59 }
 0x141   :  { %v1570_v1 = vrot.slane %v1542_v63, %v2016_v22 }
 0x142   :  { %v1323_v54 = vrot.slane %v1309_v62, %v2016_v22 }
 0x143   :  { %v1572_v3 = vcombine.low %v1563_v61, %v1570_v1 }
 0x144   :  { %v1324_v2 = vcombine.low %v1316_v48, %v1323_v54 }
 0x145   :  { %v1586_v5 = vrot.slane %v1572_v3, %v2016_v22 }
 0x146   :  { %1376 = vst [vmem:[%s2165_s3] ss:$2 sm:$0xff] %v1324_v2 }
 0x147   :  { %v1587_v6 = vcombine.low %v1579_v4, %v1586_v5 }
 0x149   :  { %v1010_v28 = vpop.f32.mrb[8].mxu0  ;;  %1894 = vst [vmem:[%s2165_s3 + $0x1] ss:$2 sm:$0xff] %v1587_v6  ;;  %v1053_v26 = vpop.f32.mrb[8].mxu1 }
 0x14a   :  { %v1387_v30 = vmul.f32 %v1010_v28, %v1010_v28  ;;  %v1012_v7 = vpop.f32.mrb[9].mxu0  ;;  %v1389_v8 = vmul.f32 %v1053_v26, %v1053_v26  ;;  %v1055_v33 = vpop.f32.mrb[9].mxu1 }
 0x14b   :  { %v1388_v9 = vmul.f32 %v1012_v7, %v1012_v7  ;;  %v1916_v11 = vpack.c.bf16 %v1012_v7, %v1010_v28  ;;  %v1014_v34 = vpop.f32.mrb[10].mxu0  ;;  %v1390_v35 = vmul.f32 %v1055_v33, %v1055_v33  ;;  %v1917_v12 = vpack.c.bf16 %v1055_v33, %v1053_v26  ;;  %v2090_v15 = vpop.f32.mrb[10].mxu1 }
 0x14c   :  { %v1204_v13 = vadd.f32 %v1014_v34, %v1010_v28  ;;  %v1403_v14 = vmul.f32 %v1014_v34, %v1014_v34  ;;  %v1016_v16 = vpop.f32.mrb[11].mxu0  ;;  %v1218_v17 = vadd.f32 %v2090_v15, %v1053_v26  ;;  %v1405_v18 = vmul.f32 %v2090_v15, %v2090_v15  ;;  %v1059_v21 = vpop.f32.mrb[11].mxu1 }
 0x14d   :  { %1743 = vst [vmem:[%s2164_s2 + $0x20] sm:$0xff] %v1916_v11  ;;  %v1211_v19 = vadd.f32 %v1016_v16, %v1012_v7  ;;  %v1404_v20 = vmul.f32 %v1016_v16, %v1016_v16  ;;  %1744 = vst [vmem:[%s2164_s2 + $0x28] sm:$0xff] %v1917_v12  ;;  %v1924_v25 = vpack.c.bf16 %v1016_v16, %v1014_v34 }
 0x14e   :  { %v1205_v23 = vrot.slane %v1204_v13, 4  ;;  %v1467_v24 = vadd.f32 %v1403_v14, %v1387_v30  ;;  %v1225_v10 = vadd.f32 %v1059_v21, %v1055_v33  ;;  %v1219_v27 = vrot.slane %v1218_v17, 4 }
 0x14f   :  { %v1481_v29 = vadd.f32 %v1405_v18, %v1389_v8  ;;  %v1212_v31 = vrot.slane %v1211_v19, 4  ;;  %v1474_v32 = vadd.f32 %v1404_v20, %v1388_v9  ;;  %1751 = vst [vmem:[%s2164_s2 + $0x60] sm:$0xff] %v1924_v25  ;;  %v1406_v39 = vmul.f32 %v1059_v21, %v1059_v21 }
 0x150   :  { %v1206_v36 = vadd.f32 %v1205_v23, %v1204_v13  ;;  %v1468_v37 = vrot.slane %v1467_v24, 4  ;;  %v1226_v38 = vrot.slane %v1225_v10, 4  ;;  %v1220_v40 = vadd.f32 %v1219_v27, %v1218_v17 }
 0x151   :  { %v1482_v41 = vrot.slane %v1481_v29, 4  ;;  %v1213_v42 = vadd.f32 %v1212_v31, %v1211_v19  ;;  %v1475_v43 = vrot.slane %v1474_v32, 4  ;;  %v1488_v46 = vadd.f32 %v1406_v39, %v1390_v35 }
 0x152   :  { %v1207_v0 = vrot.slane %v1206_v36, 2  ;;  %v1469_v44 = vadd.f32 %v1468_v37, %v1467_v24  ;;  %v1227_v45 = vadd.f32 %v1226_v38, %v1225_v10  ;;  %v1221_v47 = vrot.slane %v1220_v40, 2 }
 0x153   :  { %v1483_v49 = vadd.f32 %v1482_v41, %v1481_v29  ;;  %v1214_v50 = vrot.slane %v1213_v42, 2  ;;  %v1476_v51 = vadd.f32 %v1475_v43, %v1474_v32  ;;  %v1489_v56 = vrot.slane %v1488_v46, 4 }
 0x154   :  { %v1208_v52 = vadd.f32 %v1207_v0, %v1206_v36  ;;  %v1470_v53 = vrot.slane %v1469_v44, 2  ;;  %v1228_v55 = vrot.slane %v1227_v45, 2  ;;  %v1222_v57 = vadd.f32 %v1221_v47, %v1220_v40 }
 0x155   :  { %v1484_v58 = vrot.slane %v1483_v49, 2  ;;  %v1215_v59 = vadd.f32 %v1214_v50, %v1213_v42  ;;  %v1477_v60 = vrot.slane %v1476_v51, 2  ;;  %v1490_v48 = vadd.f32 %v1489_v56, %v1488_v46 }
 0x156   :  { %v1209_v61 = vrot.slane %v1208_v52, 1  ;;  %v1471_v62 = vadd.f32 %v1470_v53, %v1469_v44  ;;  %v1229_v63 = vadd.f32 %v1228_v55, %v1227_v45  ;;  %v1223_v54 = vrot.slane %v1222_v57, 1 }
 0x157   :  { %v1485_v1 = vadd.f32 %v1484_v58, %v1483_v49  ;;  %v1216_v2 = vrot.slane %v1215_v59, 1  ;;  %v1478_v3 = vadd.f32 %v1477_v60, %v1476_v51  ;;  %v1491_v28 = vrot.slane %v1490_v48, 2 }
 0x158   :  { %v1210_v4 = vadd.f32 %v1209_v61, %v1208_v52  ;;  %v1472_v5 = vrot.slane %v1471_v62, 1  ;;  %v1230_v6 = vrot.slane %v1229_v63, 1  ;;  %v1224_v30 = vadd.f32 %v1223_v54, %v1222_v57 }
 0x159   :  { %v1486_v26 = vrot.slane %v1485_v1, 1  ;;  %v1217_v7 = vadd.f32 %v1216_v2, %v1215_v59  ;;  %v1479_v8 = vrot.slane %v1478_v3, 1  ;;  %v1492_v33 = vadd.f32 %v1491_v28, %v1490_v48 }
 0x15a   :  { %v1473_v9 = vadd.f32 %v1472_v5, %v1471_v62  ;;  %v1231_v11 = vadd.f32 %v1230_v6, %v1229_v63  ;;  %v1925_v34 = vpack.c.bf16 %v1059_v21, %v2090_v15 }
 0x15b   :  { %v1325_v35 = vcombine.low %v1210_v4, %v1217_v7  ;;  %v1480_v12 = vadd.f32 %v1479_v8, %v1478_v3  ;;  %v1487_v13 = vadd.f32 %v1486_v26, %v1485_v1  ;;  %v1493_v16 = vrot.slane %v1492_v33, 1 }
 0x15c   :  { %v1326_v14 = vcombine.low %v1224_v30, %v1231_v11  ;;  %1752 = vst [vmem:[%s2164_s2 + $0x68] sm:$0xff] %v1925_v34 }
 0x15d   :  { %v2109_v17 = vrot.slane %v1325_v35, %v2016_v22  ;;  %v1588_v18 = vcombine.low %v1473_v9, %v1480_v12  ;;  %v1494_v20 = vadd.f32 %v1493_v16, %v1492_v33 }
 0x15e   :  { %v2112_v19 = vrot.slane %v1326_v14, %v2016_v22 }
 0x15f   :  { %v2115_v23 = vrot.slane %v1588_v18, %v2016_v22  ;;  %v1589_v21 = vcombine.low %v1487_v13, %v1494_v20 }
 0x160   :  { %v1357_v15 = vcombine.low %v2109_v17, %v2112_v19 }
 0x161   :  { %v2120_v24 = vrot.slane %v1589_v21, %v2016_v22 }
 0x163   :  { %v1620_v25 = vcombine.low %v2115_v23, %v2120_v24 }
 0x169   :  { %v1096_v10 = vpop.f32.mrb[12].mxu0  ;;  %v1139_v27 = vpop.f32.mrb[12].mxu1 }
 0x16a   :  { %v1098_v29 = vpop.f32.mrb[13].mxu0  ;;  %v1391_v31 = vmul.f32 %v1096_v10, %v1096_v10  ;;  %v1393_v32 = vmul.f32 %v1139_v27, %v1139_v27  ;;  %v1141_v38 = vpop.f32.mrb[13].mxu1 }
 0x16b   :  { %v1392_v36 = vmul.f32 %v1098_v29, %v1098_v29  ;;  %v1918_v37 = vpack.c.bf16 %v1098_v29, %v1096_v10  ;;  %v1100_v39 = vpop.f32.mrb[14].mxu0  ;;  %v1394_v40 = vmul.f32 %v1141_v38, %v1141_v38  ;;  %v1919_v41 = vpack.c.bf16 %v1141_v38, %v1139_v27  ;;  %v2124_v0 = vpop.f32.mrb[14].mxu1 }
 0x16c   :  { %v1232_v42 = vadd.f32 %v1100_v39, %v1096_v10  ;;  %v1407_v43 = vmul.f32 %v1100_v39, %v1100_v39  ;;  %v1102_v44 = vpop.f32.mrb[15].mxu0  ;;  %v1246_v45 = vadd.f32 %v2124_v0, %v1139_v27  ;;  %v1409_v46 = vmul.f32 %v2124_v0, %v2124_v0  ;;  %v1145_v50 = vpop.f32.mrb[15].mxu1 }
 0x16d   :  { %1745 = vst [vmem:[%s2164_s2 + $0x30] sm:$0xff] %v1918_v37  ;;  %v1239_v47 = vadd.f32 %v1102_v44, %v1098_v29  ;;  %v1408_v49 = vmul.f32 %v1102_v44, %v1102_v44  ;;  %1746 = vst [vmem:[%s2164_s2 + $0x38] sm:$0xff] %v1919_v41  ;;  %v1926_v53 = vpack.c.bf16 %v1102_v44, %v1100_v39 }
 0x16e   :  { %v1233_v51 = vrot.slane %v1232_v42, 4  ;;  %v1495_v52 = vadd.f32 %v1407_v43, %v1391_v31  ;;  %v1253_v55 = vadd.f32 %v1145_v50, %v1141_v38  ;;  %v1247_v56 = vrot.slane %v1246_v45, 4 }
 0x16f   :  { %v1509_v57 = vadd.f32 %v1409_v46, %v1393_v32  ;;  %v1240_v58 = vrot.slane %v1239_v47, 4  ;;  %v1502_v59 = vadd.f32 %v1408_v49, %v1392_v36  ;;  %1753 = vst [vmem:[%s2164_s2 + $0x70] sm:$0xff] %v1926_v53  ;;  %v1410_v63 = vmul.f32 %v1145_v50, %v1145_v50 }
 0x170   :  { %v1234_v60 = vadd.f32 %v1233_v51, %v1232_v42  ;;  %v1496_v61 = vrot.slane %v1495_v52, 4  ;;  %v1254_v62 = vrot.slane %v1253_v55, 4  ;;  %v1248_v48 = vadd.f32 %v1247_v56, %v1246_v45 }
 0x171   :  { %v1510_v54 = vrot.slane %v1509_v57, 4  ;;  %v1241_v1 = vadd.f32 %v1240_v58, %v1239_v47  ;;  %v1503_v2 = vrot.slane %v1502_v59, 4  ;;  %v1516_v6 = vadd.f32 %v1410_v63, %v1394_v40 }
 0x172   :  { %v1235_v3 = vrot.slane %v1234_v60, 2  ;;  %v1497_v4 = vadd.f32 %v1496_v61, %v1495_v52  ;;  %v1255_v5 = vadd.f32 %v1254_v62, %v1253_v55  ;;  %v1249_v28 = vrot.slane %v1248_v48, 2 }
 0x173   :  { %v1511_v30 = vadd.f32 %v1510_v54, %v1509_v57  ;;  %v1242_v26 = vrot.slane %v1241_v1, 2  ;;  %v1504_v7 = vadd.f32 %v1503_v2, %v1502_v59  ;;  %v1517_v33 = vrot.slane %v1516_v6, 4 }
 0x174   :  { %v1236_v8 = vadd.f32 %v1235_v3, %v1234_v60  ;;  %v1498_v9 = vrot.slane %v1497_v4, 2  ;;  %v1256_v11 = vrot.slane %v1255_v5, 2  ;;  %v1250_v34 = vadd.f32 %v1249_v28, %v1248_v48 }
 0x175   :  { %v1512_v35 = vrot.slane %v1511_v30, 2  ;;  %v1243_v12 = vadd.f32 %v1242_v26, %v1241_v1  ;;  %v1505_v13 = vrot.slane %v1504_v7, 2  ;;  %v1518_v20 = vadd.f32 %v1517_v33, %v1516_v6 }
 0x176   :  { %v1237_v14 = vrot.slane %v1236_v8, 1  ;;  %v1499_v16 = vadd.f32 %v1498_v9, %v1497_v4  ;;  %v1257_v18 = vadd.f32 %v1256_v11, %v1255_v5  ;;  %v1251_v21 = vrot.slane %v1250_v34, 1 }
 0x177   :  { %v1513_v10 = vadd.f32 %v1512_v35, %v1511_v30  ;;  %v1244_v27 = vrot.slane %v1243_v12, 1  ;;  %v1506_v29 = vadd.f32 %v1505_v13, %v1504_v7  ;;  %v1519_v37 = vrot.slane %v1518_v20, 2 }
 0x178   :  { %v1238_v31 = vadd.f32 %v1237_v14, %v1236_v8  ;;  %v1500_v32 = vrot.slane %v1499_v16, 1  ;;  %v1258_v36 = vrot.slane %v1257_v18, 1  ;;  %v1252_v38 = vadd.f32 %v1251_v21, %v1250_v34 }
 0x179   :  { %v1514_v39 = vrot.slane %v1513_v10, 1  ;;  %v1245_v40 = vadd.f32 %v1244_v27, %v1243_v12  ;;  %v1507_v41 = vrot.slane %v1506_v29, 1  ;;  %v1520_v44 = vadd.f32 %v1519_v37, %v1518_v20 }
 0x17a   :  { %v1501_v42 = vadd.f32 %v1500_v32, %v1499_v16  ;;  %v1259_v43 = vadd.f32 %v1258_v36, %v1257_v18  ;;  %v1927_v45 = vpack.c.bf16 %v1145_v50, %v2124_v0  ;;  %v1365_v0 = vrot.slane %v1357_v15, %v2016_v22 }
 0x17b   :  { %v1327_v46 = vcombine.low %v1238_v31, %v1245_v40  ;;  %v1508_v47 = vadd.f32 %v1507_v41, %v1506_v29  ;;  %v1515_v49 = vadd.f32 %v1514_v39, %v1513_v10  ;;  %v1521_v52 = vrot.slane %v1520_v44, 1 }
 0x17c   :  { %v1328_v51 = vcombine.low %v1252_v38, %v1259_v43  ;;  %1754 = vst [vmem:[%s2164_s2 + $0x78] sm:$0xff] %v1927_v45  ;;  %v1628_v48 = vrot.slane %v1620_v25, %v2016_v22 }
 0x17d   :  { %v1349_v53 = vrot.slane %v1327_v46, %v2016_v22  ;;  %v1590_v55 = vcombine.low %v1501_v42, %v1508_v47  ;;  %v1522_v57 = vadd.f32 %v1521_v52, %v1520_v44 }
 0x17e   :  { %v1356_v56 = vrot.slane %v1328_v51, %v2016_v22 }
 0x17f   :  { %v1612_v58 = vrot.slane %v1590_v55, %v2016_v22  ;;  %v1591_v60 = vcombine.low %v1515_v49, %v1522_v57 }
 0x180   :  { %v1358_v59 = vcombine.low %v1349_v53, %v1356_v56 }
 0x181   :  { %v1619_v61 = vrot.slane %v1591_v60, %v2016_v22 }
 0x182   :  { %v1372_v50 = vrot.slane %v1358_v59, %v2016_v22 }
 0x183   :  { %v1621_v63 = vcombine.low %v1612_v58, %v1619_v61 }
 0x184   :  { %v1373_v62 = vcombine.low %v1365_v0, %v1372_v50 }
 0x185   :  { %v1635_v54 = vrot.slane %v1621_v63, %v2016_v22 }
 0x186   :  { %1893 = vst [vmem:[%s2165_s3 + $0x10] ss:$2 sm:$0xff] %v1373_v62 }
 0x187   :  { %v1636_v1 = vcombine.low %v1628_v48, %v1635_v54 }
 0x189   :  { %1895 = vst [vmem:[%s2165_s3 + $0x11] ss:$2 sm:$0xff] %v1636_v1 }
 0x18a   :  { %1763 = vsyncpa [#allocation3], 1 }

// kernel: generator_forward.8
= control target key start
LH: loop header
LB: loop body
LE: loop exit
PB: predicated region body
PF: predicated region fallthrough
CT: control target
= control target key end

     0   :  { %s515_s12 = smov 0   ;;  %s517_s13 = smov 0   ;;  %s557_s0 = inlined_call_operand.vmem [shape: bf16[32,256], index: 0, kind: input, shape index: {}]   ;;  %s558_s1 = inlined_call_operand.vmem [shape: f32[1,256], index: 1, kind: input, shape index: {}]   ;;  %s559_s2 = inlined_call_operand.vmem [shape: f32[1,256], index: 2, kind: input, shape index: {}]   ;;  %s560_s3 = inlined_call_operand.vmem [shape: bf16[32,256], index: 3, kind: output, shape index: {}]  }
   0x1   :  { %s519_s14 = smov 0  }
   0x2 LB: > { %s25_s15 = sadd.s32 1, %s489_s13  ;;  %p432_p0 = scmp.ge.s32.totalorder %s493_s14, 1  ;;  %s493_s14 = sphi %s519_s14, %s13_s14   ;;  %s489_s13 = sphi %s517_s13, %s562_s13   ;;  %s485_s12 = sphi %s515_s12, %s561_s12  }
   0x3   : > { %p27_p1 = scmp.ge.s32.totalorder %s25_s15, 2  ;;  %p180_p2 = scmp.lt.s32.totalorder %s493_s14, 3 }
   0x5   : > { %s564_s15 = smov (%p27_p1, %s25_s15), 0  ;;  %p181_p3 = pnand %p432_p0, %p180_p2 }
   0x6   : > { %s433_s16 = sshll.u32 (!%p181_p3), %s485_s12, 1  ;;  %v264_v0 = vlaneseq (!%p181_p3)  ;;  %v262_v2 = vld [vmem:[%s558_s1] sm:$0x3] (!%p181_p3) }
   0x7   : > { %184 = sbr.rel (%p181_p3) target bundleno = 29 (0x1d), region = 32  ;;  %p224_p4 = scmp.lt.s32.totalorder (!%p181_p3), %s433_s16, 3  ;;  %v278_v5 = vld [vmem:[%s559_s2] sm:$0x3] (!%p181_p3) }
   0x8   : > { %v265_v1 = vshrl.u32 (!%p181_p3), %v264_v0, 7 }
   0xa   : > { %v266_v3 = vsub.s32 (!%p181_p3), 0, %v265_v1  ;;  %v270_v4 = vsub.s32 (!%p181_p3), 1, %v265_v1 }
   0xc   : > { %v267_v6 = vrot.slane (!%p181_p3), %v262_v2, %v266_v3  ;;  %v271_v7 = vrot.slane (!%p181_p3), %v262_v2, %v270_v4  ;;  %v283_v10 = vrot.slane (!%p181_p3), %v278_v5, %v266_v3  ;;  %v287_v11 = vrot.slane (!%p181_p3), %v278_v5, %v270_v4 }
   0xe   : > { %s566_s16 = smov (!%p224_p4, %s433_s16), 3 }
   0xf   : > { %s443_s21 = sshll.u32 %s566_s16, 3 }
  0x10   : > { %s231_s24 = scalar_lea.vmem %s557_s0, %s443_s21  ;;  %s253_s27 = scalar_lea.vmem %s560_s3, %s443_s21 }
  0x11   : > { %v256_v8 = vld [vmem:[%s231_s24] sm:$0xff]  ;;  %v257_v9 = vld [vmem:[%s231_s24 + $0x8] sm:$0xff] }
  0x12   : > { %v258_v12 = vunpack.c.l.bf16 %v256_v8  ;;  %v259_v13 = vunpack.c.h.bf16 %v256_v8  ;;  %v260_v14 = vunpack.c.l.bf16 %v257_v9  ;;  %v261_v15 = vunpack.c.h.bf16 %v257_v9 }
  0x14   : > { %v274_v16 = vmul.f32 %v267_v6, %v258_v12  ;;  %v275_v17 = vmul.f32 %v271_v7, %v259_v13  ;;  %v276_v18 = vmul.f32 %v267_v6, %v260_v14  ;;  %v277_v19 = vmul.f32 %v271_v7, %v261_v15 }
  0x16   : > { %v290_v20 = vadd.f32 %v283_v10, %v274_v16  ;;  %v291_v21 = vadd.f32 %v287_v11, %v275_v17  ;;  %v292_v22 = vadd.f32 %v283_v10, %v276_v18  ;;  %v293_v23 = vadd.f32 %v287_v11, %v277_v19 }
  0x18   : > { %v294_v24 = vmax.f32 %v290_v20, 0.0  ;;  %v295_v25 = vmax.f32 %v291_v21, 0.0  ;;  %v296_v26 = vmax.f32 %v292_v22, 0.0  ;;  %v297_v27 = vmax.f32 %v293_v23, 0.0 }
  0x1a   : > { %v445_v28 = vpack.c.bf16 %v295_v25, %v294_v24  ;;  %v446_v29 = vpack.c.bf16 %v297_v27, %v296_v26 }
  0x1c   : > { %310 = vst [vmem:[%s253_s27] sm:$0xff] %v445_v28  ;;  %311 = vst [vmem:[%s253_s27 + $0x8] sm:$0xff] %v446_v29 }
  0x1d PF: > { %s13_s14 = sadd.s32 1, %s493_s14   ;;  %s561_s12 = smov %s489_s13 }
  0x1e   : > { %p10_p5 = scmp.ge.s32.totalorder %s13_s14, 4   ;;  %s562_s13 = smov %s564_s15 }
  0x20   :  { %12 = sbr.rel (!%p10_p5) target bundleno = 2 (0x2), region = 68 }

// kernel: generator_forward.7
= control target key start
LH: loop header
LB: loop body
LE: loop exit
PB: predicated region body
PF: predicated region fallthrough
CT: control target
= control target key end

     0   :  { %s2172_s12 = smov 0   ;;  %s2174_s13 = smov 0   ;;  %s2660_s0 = inlined_call_operand.vmem [shape: bf16[32,1152], index: 0, kind: input, shape index: {}]   ;;  %s2661_s1 = inlined_call_operand.vmem [shape: bf16[1152,256], index: 1, kind: input, shape index: {}]   ;;  %s2662_s2 = inlined_call_operand.vmem [shape: bf16[32,256], index: 2, kind: output, shape index: {0}]   ;;  %s2663_s3 = inlined_call_operand.vmem [shape: f32[2,2,256], index: 3, kind: output, shape index: {1}]  }
   0x1   :  { %s2176_s14 = smov 0  }
   0x2 LB: > { %s33_s15 = sadd.s32 1, %s2144_s13  ;;  %p1684_p0 = scmp.ge.s32.totalorder %s2148_s14, 1  ;;  %s2148_s14 = sphi %s2176_s14, %s14_s14   ;;  %s2144_s13 = sphi %s2174_s13, %s2665_s13   ;;  %s2140_s12 = sphi %s2172_s12, %s2664_s12  }
   0x3   : > { %p35_p1 = scmp.ge.s32.totalorder %s33_s15, 2  ;;  %p191_p2 = scmp.lt.s32.totalorder %s2148_s14, 3 }
   0x5   : > { %s2667_s15 = smov (%p35_p1, %s33_s15), 0  ;;  %p192_p3 = pnand %p1684_p0, %p191_p2 }
   0x6   : > { %v1897_v0 = vld [vmem:[%s2661_s1 + $0x4] ss:$8 sps:$4 sm:$0xff] (!%p192_p3)   ;;  %v1901_v2 = vld [vmem:[%s2661_s1] ss:$8 sps:$4 sm:$0xff] (!%p192_p3)   ;;  %v1903_v4 = vld [vmem:[%s2661_s1 + $0x14] ss:$8 sps:$4 sm:$0xff] (!%p192_p3)  }
   0x7   : > { %195 = sbr.rel (%p192_p3) target bundleno = 408 (0x198), region = 28  ;;  %v1899_v1 = vld [vmem:[%s2661_s1 + $0x204] ss:$8 sps:$4 sm:$0xff] (!%p192_p3)   ;;  %1211 = vmatprep.subr.bf16.mxu1 (!%p192_p3), %v1897_v0  ;;  %v1902_v3 = vld [vmem:[%s2661_s1 + $0x200] ss:$8 sps:$4 sm:$0xff] (!%p192_p3)   ;;  %s1685_s30 = sshll.u32 (!%p192_p3), %s2140_s12, 1 }
   0x8   : > { %1297 = vmatprep.subr.bf16.mxu0 (!%p192_p3), %v1899_v1  ;;  %1212 = vmatpush1.bf16.msra.mxu1 (!%p192_p3), %v1901_v2  ;;  %v1905_v5 = vld [vmem:[%s2661_s1 + $0x214] ss:$8 sps:$4 sm:$0xff] (!%p192_p3)   ;;  %v1907_v6 = vld [vmem:[%s2661_s1 + $0x10] ss:$8 sps:$4 sm:$0xff] (!%p192_p3)   ;;  %v1909_v8 = vld [vmem:[%s2661_s1 + $0x24] ss:$8 sps:$4 sm:$0xff] (!%p192_p3)  }
   0x9   : > { %1298 = vmatpush1.bf16.msra.mxu0 (!%p192_p3), %v1902_v3  ;;  %1213 = vmatprep.subr.bf16.mxu1 (!%p192_p3), %v1903_v4  ;;  %v1908_v7 = vld [vmem:[%s2661_s1 + $0x210] ss:$8 sps:$4 sm:$0xff] (!%p192_p3)   ;;  %v1911_v9 = vld [vmem:[%s2661_s1 + $0x224] ss:$8 sps:$4 sm:$0xff] (!%p192_p3)   ;;  %v1913_v10 = vld [vmem:[%s2661_s1 + $0x20] ss:$8 sps:$4 sm:$0xff] (!%p192_p3)  }
   0xa   : > { %1299 = vmatprep.subr.bf16.mxu0 (!%p192_p3), %v1905_v5  ;;  %v1914_v11 = vld [vmem:[%s2661_s1 + $0x220] ss:$8 sps:$4 sm:$0xff] (!%p192_p3)   ;;  %v1915_v12 = vld [vmem:[%s2661_s1 + $0x34] ss:$8 sps:$4 sm:$0xff] (!%p192_p3)   ;;  %v1919_v14 = vld [vmem:[%s2661_s1 + $0x30] ss:$8 sps:$4 sm:$0xff] (!%p192_p3)  }
   0xb   : > { %v1917_v13 = vld [vmem:[%s2661_s1 + $0x234] ss:$8 sps:$4 sm:$0xff] (!%p192_p3)   ;;  %v1920_v15 = vld [vmem:[%s2661_s1 + $0x230] ss:$8 sps:$4 sm:$0xff] (!%p192_p3)   ;;  %v1921_v16 = vld [vmem:[%s2661_s1 + $0x44] ss:$8 sps:$4 sm:$0xff] (!%p192_p3)  }
   0xc   : > { %1214 = vmatpush1.bf16.msra.mxu1 (!%p192_p3), %v1907_v6  ;;  %v1923_v17 = vld [vmem:[%s2661_s1 + $0x244] ss:$8 sps:$4 sm:$0xff] (!%p192_p3)   ;;  %v1925_v18 = vld [vmem:[%s2661_s1 + $0x40] ss:$8 sps:$4 sm:$0xff] (!%p192_p3)   ;;  %v1927_v20 = vld [vmem:[%s2661_s1 + $0x54] ss:$8 sps:$4 sm:$0xff] (!%p192_p3)  }
   0xd   : > { %1300 = vmatpush1.bf16.msra.mxu0 (!%p192_p3), %v1908_v7  ;;  %1215 = vmatprep.subr.bf16.mxu1 (!%p192_p3), %v1909_v8  ;;  %v1926_v19 = vld [vmem:[%s2661_s1 + $0x240] ss:$8 sps:$4 sm:$0xff] (!%p192_p3)   ;;  %v1929_v21 = vld [vmem:[%s2661_s1 + $0x254] ss:$8 sps:$4 sm:$0xff] (!%p192_p3)   ;;  %v1931_v22 = vld [vmem:[%s2661_s1 + $0x50] ss:$8 sps:$4 sm:$0xff] (!%p192_p3)  }
   0xe   : > { %1301 = vmatprep.subr.bf16.mxu0 %v1911_v9  ;;  %v1932_v23 = vld [vmem:[%s2661_s1 + $0x250] ss:$8 sps:$4 sm:$0xff]   ;;  %v1933_v24 = vld [vmem:[%s2661_s1 + $0x64] ss:$8 sps:$4 sm:$0xff]   ;;  %v1937_v26 = vld [vmem:[%s2661_s1 + $0x60] ss:$8 sps:$4 sm:$0xff]  }
   0xf   : > { %v1935_v25 = vld [vmem:[%s2661_s1 + $0x264] ss:$8 sps:$4 sm:$0xff]   ;;  %v1938_v27 = vld [vmem:[%s2661_s1 + $0x260] ss:$8 sps:$4 sm:$0xff]   ;;  %v1939_v28 = vld [vmem:[%s2661_s1 + $0x74] ss:$8 sps:$4 sm:$0xff]  }
  0x10   : > { %1216 = vmatpush1.bf16.msra.mxu1 %v1913_v10  ;;  %v1941_v29 = vld [vmem:[%s2661_s1 + $0x274] ss:$8 sps:$4 sm:$0xff]   ;;  %v1943_v30 = vld [vmem:[%s2661_s1 + $0x70] ss:$8 sps:$4 sm:$0xff]   ;;  %v1945_v32 = vld [vmem:[%s2661_s1 + $0x84] ss:$8 sps:$4 sm:$0xff]  }
  0x11   : > { %1302 = vmatpush1.bf16.msra.mxu0 %v1914_v11  ;;  %1217 = vmatprep.subr.bf16.mxu1 %v1915_v12  ;;  %v1944_v31 = vld [vmem:[%s2661_s1 + $0x270] ss:$8 sps:$4 sm:$0xff]   ;;  %p246_p4 = scmp.lt.s32.totalorder %s1685_s30, 3  ;;  %v1947_v33 = vld [vmem:[%s2661_s1 + $0x284] ss:$8 sps:$4 sm:$0xff]   ;;  %p281_p5 = scmp.lt.s32.totalorder %s2140_s12, 1 }
  0x12   : > { %1303 = vmatprep.subr.bf16.mxu0 %v1917_v13  ;;  %v1949_v34 = vld [vmem:[%s2661_s1 + $0x80] ss:$8 sps:$4 sm:$0xff]   ;;  %v1951_v36 = vld [vmem:[%s2661_s1 + $0x94] ss:$8 sps:$4 sm:$0xff]   ;;  %v1955_v38 = vld [vmem:[%s2661_s1 + $0x90] ss:$8 sps:$4 sm:$0xff]  }
  0x13   : > { %v1950_v35 = vld [vmem:[%s2661_s1 + $0x280] ss:$8 sps:$4 sm:$0xff]   ;;  %s2669_s30 = smov (!%p246_p4, %s1685_s30), 3  ;;  %v1953_v37 = vld [vmem:[%s2661_s1 + $0x294] ss:$8 sps:$4 sm:$0xff]   ;;  %s2671_s12 = smov (!%p281_p5, %s2140_s12), 1 }
  0x14   : > { %1218 = vmatpush1.bf16.msra.mxu1 %v1919_v14  ;;  %v1956_v39 = vld [vmem:[%s2661_s1 + $0x290] ss:$8 sps:$4 sm:$0xff]   ;;  %v1957_v40 = vld [vmem:[%s2661_s1 + $0xa4] ss:$8 sps:$4 sm:$0xff]   ;;  %s1870_s4 = smul.u32 36, %s2669_s30  ;;  %s1850_s29 = sshll.u32 %s2669_s30, 3 }
  0x15   : > { %1304 = vmatpush1.bf16.msra.mxu0 %v1920_v15  ;;  %1219 = vmatprep.subr.bf16.mxu1 %v1921_v16  ;;  %v1959_v41 = vld [vmem:[%s2661_s1 + $0x2a4] ss:$8 sps:$4 sm:$0xff]   ;;  %v1961_v42 = vld [vmem:[%s2661_s1 + $0xa0] ss:$8 sps:$4 sm:$0xff]   ;;  %v1963_v44 = vld [vmem:[%s2661_s1 + $0xb4] ss:$8 sps:$4 sm:$0xff]   ;;  %s277_s6 = scalar_lea.vmem %s2662_s2, %s1850_s29 }
  0x16   : > { %1305 = vmatprep.subr.bf16.mxu0 %v1923_v17  ;;  %v1962_v43 = vld [vmem:[%s2661_s1 + $0x2a0] ss:$8 sps:$4 sm:$0xff]   ;;  %s2334_s19 = scalar_lea.vmem %s2660_s0, %s1870_s4  ;;  %v1965_v45 = vld [vmem:[%s2661_s1 + $0x2b4] ss:$8 sps:$4 sm:$0xff]   ;;  %v1967_v46 = vld [vmem:[%s2661_s1 + $0xb0] ss:$8 sps:$4 sm:$0xff]  }
  0x17   : > { %v1968_v47 = vld [vmem:[%s2661_s1 + $0x2b0] ss:$8 sps:$4 sm:$0xff]   ;;  %v1995_v48 = vld [vmem:[%s2334_s19 + $0x4] ss:$36 sps:$4 sm:$0xff]   ;;  %v1975_v54 = vld [vmem:[%s2661_s1 + $0xd4] ss:$8 sps:$4 sm:$0xff]  }
  0x18   : > { %1220 = vmatpush1.bf16.msra.mxu1 %v1925_v18  ;;  %v1969_v49 = vld [vmem:[%s2661_s1 + $0xc4] ss:$8 sps:$4 sm:$0xff]   ;;  %1243 = vmatprep.mubr.bf16.mxu1 %v1995_v48  ;;  %v2001_v51 = vld [vmem:[%s2334_s19 + $0x14] ss:$36 sps:$4 sm:$0xff]   ;;  %v1973_v52 = vld [vmem:[%s2661_s1 + $0xc0] ss:$8 sps:$4 sm:$0xff]  }
  0x19   : > { %1306 = vmatpush1.bf16.msra.mxu0 %v1926_v19  ;;  %1221 = vmatprep.subr.bf16.mxu1 %v1927_v20  ;;  %v1971_v50 = vld [vmem:[%s2661_s1 + $0x2c4] ss:$8 sps:$4 sm:$0xff]   ;;  %v1974_v53 = vld [vmem:[%s2661_s1 + $0x2c0] ss:$8 sps:$4 sm:$0xff]   ;;  %v1977_v55 = vld [vmem:[%s2661_s1 + $0x2d4] ss:$8 sps:$4 sm:$0xff]  }
  0x1a   : > { %1307 = vmatprep.subr.bf16.mxu0 %v1929_v21  ;;  %1329 = vmatprep.mubr.bf16.mxu0 %v2001_v51  ;;  %v1979_v56 = vld [vmem:[%s2661_s1 + $0xd0] ss:$8 sps:$4 sm:$0xff]   ;;  %v1981_v58 = vld [vmem:[%s2661_s1 + $0xe4] ss:$8 sps:$4 sm:$0xff]   ;;  %v1985_v60 = vld [vmem:[%s2661_s1 + $0xe0] ss:$8 sps:$4 sm:$0xff]  }
  0x1b   : > { %v1980_v57 = vld [vmem:[%s2661_s1 + $0x2d0] ss:$8 sps:$4 sm:$0xff]   ;;  %v1983_v59 = vld [vmem:[%s2661_s1 + $0x2e4] ss:$8 sps:$4 sm:$0xff]   ;;  %v1986_v61 = vld [vmem:[%s2661_s1 + $0x2e0] ss:$8 sps:$4 sm:$0xff]  }
  0x1c   : > { %1222 = vmatpush1.bf16.msra.mxu1 %v1931_v22  ;;  %v1987_v62 = vld [vmem:[%s2661_s1 + $0xf4] ss:$8 sps:$4 sm:$0xff]   ;;  %v1991_v0 = vld [vmem:[%s2661_s1 + $0xf0] ss:$8 sps:$4 sm:$0xff]   ;;  %v1998_v2 = vld [vmem:[%s2661_s1 + $0x104] ss:$8 sps:$4 sm:$0xff]  }
  0x1d   : > { %1308 = vmatpush1.bf16.msra.mxu0 %v1932_v23  ;;  %1223 = vmatprep.subr.bf16.mxu1 %v1933_v24  ;;  %v1989_v63 = vld [vmem:[%s2661_s1 + $0x2f4] ss:$8 sps:$4 sm:$0xff]   ;;  %v1992_v1 = vld [vmem:[%s2661_s1 + $0x2f0] ss:$8 sps:$4 sm:$0xff]   ;;  %v2004_v3 = vld [vmem:[%s2661_s1 + $0x304] ss:$8 sps:$4 sm:$0xff]  }
  0x1e   : > { %1309 = vmatprep.subr.bf16.mxu0 %v1935_v25  ;;  %v1993_v4 = vld [vmem:[%s2334_s19] ss:$36 sps:$4 sm:$0xff]   ;;  %v1999_v6 = vld [vmem:[%s2334_s19 + $0x10] ss:$36 sps:$4 sm:$0xff]   ;;  %s1851_s30 = sshll.u32 %s2671_s12, 2 }
  0x1f   : > { %v1996_v5 = vld [vmem:[%s2661_s1 + $0x100] ss:$8 sps:$4 sm:$0xff]   ;;  %v2007_v8 = vld [vmem:[%s2661_s1 + $0x114] ss:$8 sps:$4 sm:$0xff]   ;;  %v2005_v10 = vld [vmem:[%s2661_s1 + $0x110] ss:$8 sps:$4 sm:$0xff]   ;;  %s288_s8 = scalar_lea.vmem %s2663_s3, %s1851_s30 }
  0x20   : > { %1224 = vmatpush1.bf16.msra.mxu1 %v1937_v26  ;;  %v2002_v7 = vld [vmem:[%s2661_s1 + $0x300] ss:$8 sps:$4 sm:$0xff]   ;;  %v2010_v9 = vld [vmem:[%s2661_s1 + $0x314] ss:$8 sps:$4 sm:$0xff]   ;;  %v2008_v11 = vld [vmem:[%s2661_s1 + $0x310] ss:$8 sps:$4 sm:$0xff]  }
  0x21   : > { %1310 = vmatpush1.bf16.msra.mxu0 %v1938_v27  ;;  %1225 = vmatprep.subr.bf16.mxu1 %v1939_v28  ;;  %v2013_v12 = vld [vmem:[%s2661_s1 + $0x124] ss:$8 sps:$4 sm:$0xff]   ;;  %v2011_v14 = vld [vmem:[%s2661_s1 + $0x120] ss:$8 sps:$4 sm:$0xff]   ;;  %v2019_v16 = vld [vmem:[%s2661_s1 + $0x134] ss:$8 sps:$4 sm:$0xff]  }
  0x22   : > { %1311 = vmatprep.subr.bf16.mxu0 %v1941_v29  ;;  %v2016_v13 = vld [vmem:[%s2661_s1 + $0x324] ss:$8 sps:$4 sm:$0xff]   ;;  %v2014_v15 = vld [vmem:[%s2661_s1 + $0x320] ss:$8 sps:$4 sm:$0xff]   ;;  %v2022_v17 = vld [vmem:[%s2661_s1 + $0x334] ss:$8 sps:$4 sm:$0xff]  }
  0x23   : > { %v2017_v18 = vld [vmem:[%s2661_s1 + $0x130] ss:$8 sps:$4 sm:$0xff]   ;;  %v2025_v20 = vld [vmem:[%s2661_s1 + $0x144] ss:$8 sps:$4 sm:$0xff]   ;;  %v2023_v22 = vld [vmem:[%s2661_s1 + $0x140] ss:$8 sps:$4 sm:$0xff]  }
  0x24   : > { %1226 = vmatpush1.bf16.msra.mxu1 %v1943_v30  ;;  %v2020_v19 = vld [vmem:[%s2661_s1 + $0x330] ss:$8 sps:$4 sm:$0xff]   ;;  %v2028_v21 = vld [vmem:[%s2661_s1 + $0x344] ss:$8 sps:$4 sm:$0xff]   ;;  %v2026_v23 = vld [vmem:[%s2661_s1 + $0x340] ss:$8 sps:$4 sm:$0xff]  }
  0x25   : > { %1312 = vmatpush1.bf16.msra.mxu0 %v1944_v31  ;;  %1227 = vmatprep.subr.bf16.mxu1 %v1945_v32  ;;  %v2031_v24 = vld [vmem:[%s2661_s1 + $0x154] ss:$8 sps:$4 sm:$0xff]   ;;  %v2029_v26 = vld [vmem:[%s2661_s1 + $0x150] ss:$8 sps:$4 sm:$0xff]   ;;  %v2037_v28 = vld [vmem:[%s2661_s1 + $0x164] ss:$8 sps:$4 sm:$0xff]  }
  0x26   : > { %1313 = vmatprep.subr.bf16.mxu0 %v1947_v33  ;;  %v2034_v25 = vld [vmem:[%s2661_s1 + $0x354] ss:$8 sps:$4 sm:$0xff]   ;;  %v2032_v27 = vld [vmem:[%s2661_s1 + $0x350] ss:$8 sps:$4 sm:$0xff]   ;;  %v2040_v29 = vld [vmem:[%s2661_s1 + $0x364] ss:$8 sps:$4 sm:$0xff]  }
  0x27   : > { %v2035_v30 = vld [vmem:[%s2661_s1 + $0x160] ss:$8 sps:$4 sm:$0xff]   ;;  %v2043_v32 = vld [vmem:[%s2661_s1 + $0x174] ss:$8 sps:$4 sm:$0xff]  }
  0x28   : > { %1228 = vmatpush1.bf16.msra.mxu1 %v1949_v34  ;;  %v2038_v31 = vld [vmem:[%s2661_s1 + $0x360] ss:$8 sps:$4 sm:$0xff]   ;;  %v2046_v33 = vld [vmem:[%s2661_s1 + $0x374] ss:$8 sps:$4 sm:$0xff]   ;;  %v2097_v34 = vld [vmem:[%s2334_s19 + $0xc] ss:$36 sps:$4 sm:$0xff]  }
  0x29   : > { %1314 = vmatpush1.bf16.msra.mxu0 %v1950_v35  ;;  %1229 = vmatprep.subr.bf16.mxu1 %v1951_v36  ;;  %v2100_v35 = vld [vmem:[%s2334_s19 + $0x1c] ss:$36 sps:$4 sm:$0xff]   ;;  %v2041_v36 = vld [vmem:[%s2661_s1 + $0x170] ss:$8 sps:$4 sm:$0xff]  }
  0x2a   : > { %1315 = vmatprep.subr.bf16.mxu0 %v1953_v37  ;;  %v2044_v37 = vld [vmem:[%s2661_s1 + $0x370] ss:$8 sps:$4 sm:$0xff]   ;;  %v2059_v48 = vld [vmem:[%s2661_s1 + $0x1a0] ss:$8 sps:$4 sm:$0xff]   ;;  %v2070_v51 = vld [vmem:[%s2661_s1 + $0x3b4] ss:$8 sps:$4 sm:$0xff]  }
  0x2c   : > { %1230 = vmatpush1.bf16.msra.mxu1 %v1955_v38  ;;  %v2049_v38 = vld [vmem:[%s2661_s1 + $0x184] ss:$8 sps:$4 sm:$0xff]  }
  0x2d   : > { %1316 = vmatpush1.bf16.msra.mxu0 %v1956_v39  ;;  %1231 = vmatprep.subr.bf16.mxu1 %v1957_v40  ;;  %v2052_v39 = vld [vmem:[%s2661_s1 + $0x384] ss:$8 sps:$4 sm:$0xff]   ;;  %v2047_v40 = vld [vmem:[%s2661_s1 + $0x180] ss:$8 sps:$4 sm:$0xff]  }
  0x2e   : > { %1317 = vmatprep.subr.bf16.mxu0 %v1959_v41  ;;  %v2050_v41 = vld [vmem:[%s2661_s1 + $0x380] ss:$8 sps:$4 sm:$0xff]  }
  0x30   : > { %1232 = vmatpush1.bf16.msra.mxu1 %v1961_v42  ;;  %v2055_v42 = vld [vmem:[%s2661_s1 + $0x194] ss:$8 sps:$4 sm:$0xff]  }
  0x31   : > { %1318 = vmatpush1.bf16.msra.mxu0 %v1962_v43  ;;  %1233 = vmatprep.subr.bf16.mxu1 %v1963_v44  ;;  %v2058_v43 = vld [vmem:[%s2661_s1 + $0x394] ss:$8 sps:$4 sm:$0xff]   ;;  %v2053_v44 = vld [vmem:[%s2661_s1 + $0x190] ss:$8 sps:$4 sm:$0xff]  }
  0x32   : > { %1319 = vmatprep.subr.bf16.mxu0 %v1965_v45  ;;  %v2056_v45 = vld [vmem:[%s2661_s1 + $0x390] ss:$8 sps:$4 sm:$0xff]  }
  0x34   : > { %1234 = vmatpush1.bf16.msra.mxu1 %v1967_v46  ;;  %v2061_v46 = vld [vmem:[%s2661_s1 + $0x1a4] ss:$8 sps:$4 sm:$0xff]  }
  0x35   : > { %1320 = vmatpush1.bf16.msra.mxu0 %v1968_v47  ;;  %1235 = vmatprep.subr.bf16.mxu1 %v1969_v49  ;;  %v2064_v47 = vld [vmem:[%s2661_s1 + $0x3a4] ss:$8 sps:$4 sm:$0xff]   ;;  %v2062_v49 = vld [vmem:[%s2661_s1 + $0x3a0] ss:$8 sps:$4 sm:$0xff]  }
  0x36   : > { %1321 = vmatprep.subr.bf16.mxu0 %v1971_v50  ;;  %v2067_v50 = vld [vmem:[%s2661_s1 + $0x1b4] ss:$8 sps:$4 sm:$0xff]  }
  0x38   : > { %1236 = vmatpush1.bf16.msra.mxu1 %v1973_v52  ;;  %v2065_v52 = vld [vmem:[%s2661_s1 + $0x1b0] ss:$8 sps:$4 sm:$0xff]  }
  0x39   : > { %1322 = vmatpush1.bf16.msra.mxu0 %v1974_v53  ;;  %1237 = vmatprep.subr.bf16.mxu1 %v1975_v54  ;;  %v2068_v53 = vld [vmem:[%s2661_s1 + $0x3b0] ss:$8 sps:$4 sm:$0xff]   ;;  %v2073_v54 = vld [vmem:[%s2661_s1 + $0x1c4] ss:$8 sps:$4 sm:$0xff]  }
  0x3a   : > { %1323 = vmatprep.subr.bf16.mxu0 %v1977_v55  ;;  %v2076_v55 = vld [vmem:[%s2661_s1 + $0x3c4] ss:$8 sps:$4 sm:$0xff]  }
  0x3c   : > { %1238 = vmatpush1.bf16.msra.mxu1 %v1979_v56  ;;  %v2071_v56 = vld [vmem:[%s2661_s1 + $0x1c0] ss:$8 sps:$4 sm:$0xff]  }
  0x3d   : > { %1324 = vmatpush1.bf16.msra.mxu0 %v1980_v57  ;;  %1239 = vmatprep.subr.bf16.mxu1 %v1981_v58  ;;  %v2074_v57 = vld [vmem:[%s2661_s1 + $0x3c0] ss:$8 sps:$4 sm:$0xff]   ;;  %v2079_v58 = vld [vmem:[%s2661_s1 + $0x1d4] ss:$8 sps:$4 sm:$0xff]  }
  0x3e   : > { %1325 = vmatprep.subr.bf16.mxu0 %v1983_v59  ;;  %v2082_v59 = vld [vmem:[%s2661_s1 + $0x3d4] ss:$8 sps:$4 sm:$0xff]  }
  0x40   : > { %1240 = vmatpush1.bf16.msra.mxu1 %v1985_v60  ;;  %v2077_v60 = vld [vmem:[%s2661_s1 + $0x1d0] ss:$8 sps:$4 sm:$0xff]  }
  0x41   : > { %1326 = vmatpush1.bf16.msra.mxu0 %v1986_v61  ;;  %1241 = vmatprep.subr.bf16.mxu1 %v1987_v62  ;;  %v2080_v61 = vld [vmem:[%s2661_s1 + $0x3d0] ss:$8 sps:$4 sm:$0xff]   ;;  %v2085_v62 = vld [vmem:[%s2661_s1 + $0x1e4] ss:$8 sps:$4 sm:$0xff]  }
  0x42   : > { %1327 = vmatprep.subr.bf16.mxu0 %v1989_v63  ;;  %v2088_v63 = vld [vmem:[%s2661_s1 + $0x3e4] ss:$8 sps:$4 sm:$0xff]  }
  0x44   : > { %1242 = vmatpush1.bf16.msra.mxu1 %v1991_v0  ;;  %v2083_v0 = vld [vmem:[%s2661_s1 + $0x1e0] ss:$8 sps:$4 sm:$0xff]  }
  0x45   : > { %1328 = vmatpush1.bf16.msra.mxu0 %v1992_v1  ;;  %1254 = vmatprep.subr.bf16.mxu1 %v1998_v2  ;;  %v2086_v1 = vld [vmem:[%s2661_s1 + $0x3e0] ss:$8 sps:$4 sm:$0xff]   ;;  %v2091_v2 = vld [vmem:[%s2661_s1 + $0x1f4] ss:$8 sps:$4 sm:$0xff]  }
  0x46   : > { %1340 = vmatprep.subr.bf16.mxu0 %v2004_v3  ;;  %v2094_v3 = vld [vmem:[%s2661_s1 + $0x3f4] ss:$8 sps:$4 sm:$0xff]  }
  0x47   : > { %1244 = vmatmul.mubr.bf16.vlgmr.msra.gmra.mrb[0].mxu1 %v1993_v4  ;;  %v2089_v4 = vld [vmem:[%s2661_s1 + $0x1f0] ss:$8 sps:$4 sm:$0xff]  }
  0x48   : > { %1330 = vmatmul.mubr.bf16.vlgmr.msra.gmra.mrb[0].mxu0 %v1999_v6  ;;  %1255 = vmatpush1.bf16.msra.mxu1 %v1996_v5  ;;  %v2092_v5 = vld [vmem:[%s2661_s1 + $0x3f0] ss:$8 sps:$4 sm:$0xff]   ;;  %v2103_v6 = vld [vmem:[%s2661_s1 + $0x404] ss:$8 sps:$4 sm:$0xff]  }
  0x49   : > { %1341 = vmatpush1.bf16.msra.mxu0 %v2002_v7  ;;  %1256 = vmatprep.subr.bf16.mxu1 %v2007_v8  ;;  %v2095_v7 = vld [vmem:[%s2334_s19 + $0x8] ss:$36 sps:$4 sm:$0xff]   ;;  %v2098_v8 = vld [vmem:[%s2334_s19 + $0x18] ss:$36 sps:$4 sm:$0xff]  }
  0x4a   : > { %1342 = vmatprep.subr.bf16.mxu0 %v2010_v9  ;;  %1286 = vmatprep.mubr.bf16.mxu1 %v2097_v34  ;;  %v2101_v9 = vld [vmem:[%s2661_s1 + $0x400] ss:$8 sps:$4 sm:$0xff]  }
  0x4b   : > { %1372 = vmatprep.mubr.bf16.mxu0 %v2100_v35 }
  0x4c   : > { %1257 = vmatpush1.bf16.msra.mxu1 %v2005_v10  ;;  %v2106_v10 = vld [vmem:[%s2661_s1 + $0x414] ss:$8 sps:$4 sm:$0xff]  }
  0x4d   : > { %1343 = vmatpush1.bf16.msra.mxu0 %v2008_v11  ;;  %1258 = vmatprep.subr.bf16.mxu1 %v2013_v12  ;;  %v2104_v11 = vld [vmem:[%s2661_s1 + $0x410] ss:$8 sps:$4 sm:$0xff]   ;;  %v2150_v12 = vmov 0  }
  0x4e   : > { %1344 = vmatprep.subr.bf16.mxu0 %v2016_v13  ;;  %v2109_v13 = vld [vmem:[%s2661_s1 + $0x424] ss:$8 sps:$4 sm:$0xff]  }
  0x50   : > { %1259 = vmatpush1.bf16.msra.mxu1 %v2011_v14  ;;  %v2107_v14 = vld [vmem:[%s2661_s1 + $0x420] ss:$8 sps:$4 sm:$0xff]  }
  0x51   : > { %1345 = vmatpush1.bf16.msra.mxu0 %v2014_v15  ;;  %1260 = vmatprep.subr.bf16.mxu1 %v2019_v16  ;;  %v2112_v15 = vld [vmem:[%s2661_s1 + $0x434] ss:$8 sps:$4 sm:$0xff]   ;;  %v2110_v16 = vld [vmem:[%s2661_s1 + $0x430] ss:$8 sps:$4 sm:$0xff]  }
  0x52   : > { %1346 = vmatprep.subr.bf16.mxu0 %v2022_v17  ;;  %v2115_v17 = vld [vmem:[%s2661_s1 + $0x444] ss:$8 sps:$4 sm:$0xff]  }
  0x54   : > { %1261 = vmatpush1.bf16.msra.mxu1 %v2017_v18  ;;  %v2113_v18 = vld [vmem:[%s2661_s1 + $0x440] ss:$8 sps:$4 sm:$0xff]  }
  0x55   : > { %1347 = vmatpush1.bf16.msra.mxu0 %v2020_v19  ;;  %1262 = vmatprep.subr.bf16.mxu1 %v2025_v20  ;;  %v2118_v19 = vld [vmem:[%s2661_s1 + $0x454] ss:$8 sps:$4 sm:$0xff]   ;;  %v2116_v20 = vld [vmem:[%s2661_s1 + $0x450] ss:$8 sps:$4 sm:$0xff]  }
  0x56   : > { %1348 = vmatprep.subr.bf16.mxu0 %v2028_v21  ;;  %v2121_v21 = vld [vmem:[%s2661_s1 + $0x464] ss:$8 sps:$4 sm:$0xff]  }
  0x58   : > { %1263 = vmatpush1.bf16.msra.mxu1 %v2023_v22  ;;  %v2119_v22 = vld [vmem:[%s2661_s1 + $0x460] ss:$8 sps:$4 sm:$0xff]  }
  0x59   : > { %1349 = vmatpush1.bf16.msra.mxu0 %v2026_v23  ;;  %1264 = vmatprep.subr.bf16.mxu1 %v2031_v24  ;;  %v2124_v23 = vld [vmem:[%s2661_s1 + $0x474] ss:$8 sps:$4 sm:$0xff]   ;;  %v2122_v24 = vld [vmem:[%s2661_s1 + $0x470] ss:$8 sps:$4 sm:$0xff]  }
  0x5a   : > { %1350 = vmatprep.subr.bf16.mxu0 %v2034_v25  ;;  %v2125_v25 = vld [vmem:[%s2334_s19 + $0x20] ss:$36 sps:$4 sm:$0xff]  }
  0x5c   : > { %1265 = vmatpush1.bf16.msra.mxu1 %v2029_v26 }
  0x5d   : > { %1351 = vmatpush1.bf16.msra.mxu0 %v2032_v27  ;;  %1266 = vmatprep.subr.bf16.mxu1 %v2037_v28 }
  0x5e   : > { %1352 = vmatprep.subr.bf16.mxu0 %v2040_v29 }
  0x60   : > { %1267 = vmatpush1.bf16.msra.mxu1 %v2035_v30 }
  0x61   : > { %1353 = vmatpush1.bf16.msra.mxu0 %v2038_v31  ;;  %1268 = vmatprep.subr.bf16.mxu1 %v2043_v32 }
  0x62   : > { %1354 = vmatprep.subr.bf16.mxu0 %v2046_v33 }
  0x64   : > { %1269 = vmatpush1.bf16.msra.mxu1 %v2041_v36 }
  0x65   : > { %1355 = vmatpush1.bf16.msra.mxu0 %v2044_v37  ;;  %1270 = vmatprep.subr.bf16.mxu1 %v2049_v38 }
  0x66   : > { %1356 = vmatprep.subr.bf16.mxu0 %v2052_v39 }
  0x68   : > { %1271 = vmatpush1.bf16.msra.mxu1 %v2047_v40 }
  0x69   : > { %1357 = vmatpush1.bf16.msra.mxu0 %v2050_v41  ;;  %1272 = vmatprep.subr.bf16.mxu1 %v2055_v42 }
  0x6a   : > { %1358 = vmatprep.subr.bf16.mxu0 %v2058_v43 }
  0x6c   : > { %1273 = vmatpush1.bf16.msra.mxu1 %v2053_v44 }
  0x6d   : > { %1359 = vmatpush1.bf16.msra.mxu0 %v2056_v45  ;;  %1274 = vmatprep.subr.bf16.mxu1 %v2061_v46 }
  0x6e   : > { %1360 = vmatprep.subr.bf16.mxu0 %v2064_v47 }
  0x70   : > { %1275 = vmatpush1.bf16.msra.mxu1 %v2059_v48 }
  0x71   : > { %1361 = vmatpush1.bf16.msra.mxu0 %v2062_v49  ;;  %1276 = vmatprep.subr.bf16.mxu1 %v2067_v50 }
  0x72   : > { %1362 = vmatprep.subr.bf16.mxu0 %v2070_v51 }
  0x74   : > { %1277 = vmatpush1.bf16.msra.mxu1 %v2065_v52 }
  0x75   : > { %1363 = vmatpush1.bf16.msra.mxu0 %v2068_v53  ;;  %1278 = vmatprep.subr.bf16.mxu1 %v2073_v54  ;;  %v2151_v53 = vmov 1966171168  }
  0x76   : > { %1364 = vmatprep.subr.bf16.mxu0 %v2076_v55  ;;  %v1444_v54 = vunpack.c.l.s4 %v2151_v53  ;;  %v1446_v55 = vlaneseq }
  0x78   : > { %1279 = vmatpush1.bf16.msra.mxu1 %v2071_v56  ;;  %vm1460_vm0 = vcmp.lt.s32.totalorder %v1446_v55, 256 }
  0x79   : > { %1365 = vmatpush1.bf16.msra.mxu0 %v2074_v57  ;;  %1280 = vmatprep.subr.bf16.mxu1 %v2079_v58 }
  0x7a   : > { %1366 = vmatprep.subr.bf16.mxu0 %v2082_v59 }
  0x7c   : > { %1281 = vmatpush1.bf16.msra.mxu1 %v2077_v60 }
  0x7d   : > { %1367 = vmatpush1.bf16.msra.mxu0 %v2080_v61  ;;  %1282 = vmatprep.subr.bf16.mxu1 %v2085_v62 }
  0x7e   : > { %1368 = vmatprep.subr.bf16.mxu0 %v2088_v63 }
  0x80   : > { %1283 = vmatpush1.bf16.msra.mxu1 %v2083_v0  ;;  %v1445_v0 = vunpack.c.0.s8 %v1444_v54 }
  0x81   : > { %1369 = vmatpush1.bf16.msra.mxu0 %v2086_v1  ;;  %1284 = vmatprep.subr.bf16.mxu1 %v2091_v2  ;;  %v1447_v1 = vshrl.u32 %v1446_v55, 7 }
  0x82   : > { %1370 = vmatprep.subr.bf16.mxu0 %v2094_v3 }
  0x84   : > { %1285 = vmatpush1.bf16.msra.mxu1 %v2089_v4 }
  0x85   : > { %1371 = vmatpush1.bf16.msra.mxu0 %v2092_v5 }
  0x86   : > { %1383 = vmatprep.subr.bf16.mxu0 %v2103_v6 }
  0x87   : > { %1287 = vmatmul.mubr.bf16.vlgmr.msra.gmra.mrb[0].mxu1 %v2095_v7 }
  0x88   : > { %1373 = vmatmul.mubr.bf16.vlgmr.msra.gmra.mrb[0].mxu0 %v2098_v8 }
  0x89   : > { %1384 = vmatpush1.bf16.msra.mxu0 %v2101_v9  ;;  %1415 = vmatprep.mubr.bf16.mxu0 %v2150_v12 }
  0x8a   : > { %1385 = vmatprep.subr.bf16.mxu0 %v2106_v10  ;;  %v1448_v10 = vsub.s32 %v1445_v0, %v1447_v1 }
  0x8d   : > { %1386 = vmatpush1.bf16.msra.mxu0 %v2104_v11 }
  0x8e   : > { %1387 = vmatprep.subr.bf16.mxu0 %v2109_v13 }
  0x91   : > { %1388 = vmatpush1.bf16.msra.mxu0 %v2107_v14 }
  0x92   : > { %1389 = vmatprep.subr.bf16.mxu0 %v2112_v15 }
  0x95   : > { %1390 = vmatpush1.bf16.msra.mxu0 %v2110_v16 }
  0x96   : > { %1391 = vmatprep.subr.bf16.mxu0 %v2115_v17 }
  0x99   : > { %1392 = vmatpush1.bf16.msra.mxu0 %v2113_v18 }
  0x9a   : > { %1393 = vmatprep.subr.bf16.mxu0 %v2118_v19 }
  0x9d   : > { %1394 = vmatpush1.bf16.msra.mxu0 %v2116_v20 }
  0x9e   : > { %1395 = vmatprep.subr.bf16.mxu0 %v2121_v21 }
  0xa1   : > { %1396 = vmatpush1.bf16.msra.mxu0 %v2119_v22 }
  0xa2   : > { %1397 = vmatprep.subr.bf16.mxu0 %v2124_v23 }
  0xa5   : > { %1398 = vmatpush1.bf16.msra.mxu0 %v2122_v24 }
  0xa8   : > { %1416 = vmatmul.mubr.bf16.vlgmr.msra.gmra.mrb[0].mxu0 %v2125_v25 }
 0x15a   : > { %v1288_v26 = vpop.f32.mrb[0].mxu1 }
 0x15b   : > { %v1290_v27 = vpop.f32.mrb[1].mxu1 }
 0x15c   : > { %v1292_v28 = vpop.f32.mrb[2].mxu1 }
 0x15d   : > { %v1294_v29 = vpop.f32.mrb[3].mxu1 }
 0x17b   : > { %v1417_v30 = vpop.f32.mrb[0].mxu0 }
 0x17c   : > { %v1854_v31 = vadd.f32 %v1417_v30, %v1288_v26  ;;  %v1419_v32 = vpop.f32.mrb[1].mxu0 }
 0x17d   : > { %v1855_v33 = vadd.f32 %v1419_v32, %v1290_v27  ;;  %v1421_v34 = vpop.f32.mrb[2].mxu0 }
 0x17e   : > { %v1856_v35 = vadd.f32 %v1421_v34, %v1292_v28  ;;  %v1423_v36 = vpop.f32.mrb[3].mxu0  ;;  %v1463_v39 = vmul.f32 %v1854_v31, %v1854_v31 }
 0x17f   : > { %v1852_v37 = vpack.c.bf16 %v1855_v33, %v1854_v31  ;;  %v1857_v38 = vadd.f32 %v1423_v36, %v1294_v29  ;;  %v1464_v42 = vmul.f32 %v1855_v33, %v1855_v33 }
 0x180   : > { %v1426_v40 = vadd.f32 %v1856_v35, %v1854_v31  ;;  %v1465_v41 = vmul.f32 %v1856_v35, %v1856_v35 }
 0x181   : > { %1513 = vst [vmem:[%s277_s6] sm:$0xff] %v1852_v37  ;;  %v1433_v43 = vadd.f32 %v1857_v38, %v1855_v33  ;;  %v1466_v44 = vmul.f32 %v1857_v38, %v1857_v38  ;;  %v1853_v45 = vpack.c.bf16 %v1857_v38, %v1856_v35 }
 0x182   : > { %v1427_v46 = vrot.slane %v1426_v40, 4  ;;  %v1467_v47 = vadd.f32 %v1465_v41, %v1463_v39 }
 0x183   : > { %v1434_v48 = vrot.slane %v1433_v43, 4  ;;  %v1474_v49 = vadd.f32 %v1466_v44, %v1464_v42  ;;  %1514 = vst [vmem:[%s277_s6 + $0x8] sm:$0xff] %v1853_v45 }
 0x184   : > { %v1428_v50 = vadd.f32 %v1427_v46, %v1426_v40  ;;  %v1468_v51 = vrot.slane %v1467_v47, 4 }
 0x185   : > { %v1435_v52 = vadd.f32 %v1434_v48, %v1433_v43  ;;  %v1475_v56 = vrot.slane %v1474_v49, 4 }
 0x186   : > { %v1429_v57 = vrot.slane %v1428_v50, 2  ;;  %v1469_v58 = vadd.f32 %v1468_v51, %v1467_v47 }
 0x187   : > { %v1436_v59 = vrot.slane %v1435_v52, 2  ;;  %v1476_v60 = vadd.f32 %v1475_v56, %v1474_v49 }
 0x188   : > { %v1430_v61 = vadd.f32 %v1429_v57, %v1428_v50  ;;  %v1470_v62 = vrot.slane %v1469_v58, 2 }
 0x189   : > { %v1437_v63 = vadd.f32 %v1436_v59, %v1435_v52  ;;  %v1477_v2 = vrot.slane %v1476_v60, 2 }
 0x18a   : > { %v1431_v3 = vrot.slane %v1430_v61, 1  ;;  %v1471_v4 = vadd.f32 %v1470_v62, %v1469_v58 }
 0x18b   : > { %v1438_v5 = vrot.slane %v1437_v63, 1  ;;  %v1478_v6 = vadd.f32 %v1477_v2, %v1476_v60 }
 0x18c   : > { %v1432_v7 = vadd.f32 %v1431_v3, %v1430_v61  ;;  %v1472_v8 = vrot.slane %v1471_v4, 1 }
 0x18d   : > { %v1439_v9 = vadd.f32 %v1438_v5, %v1437_v63  ;;  %v1479_v11 = vrot.slane %v1478_v6, 1 }
 0x18e   : > { %v1473_v12 = vadd.f32 %v1472_v8, %v1471_v4 }
 0x18f   : > { %v1442_v13 = vcombine.low %v1432_v7, %v1439_v9  ;;  %v1480_v14 = vadd.f32 %v1479_v11, %v1478_v6 }
 0x191   : > { %v1449_v15 = vrot.slane %v1442_v13, %v1448_v10  ;;  %v1483_v16 = vcombine.low %v1473_v12, %v1480_v14 }
 0x193   : > { %v1456_v17 = vrot.slane %v1449_v15, %v1448_v10  ;;  %v1490_v18 = vrot.slane %v1483_v16, %v1448_v10 }
 0x195   : > { %1462 = vst.msk [vmem:[%s288_s8] ss:$2 sm:$0x3] %vm1460_vm0, %v1456_v17  ;;  %v1497_v19 = vrot.slane %v1490_v18, %v1448_v10 }
 0x197   : > { %1845 = vst.msk [vmem:[%s288_s8 + $0x1] ss:$2 sm:$0x3] %vm1460_vm0, %v1497_v19 }
 0x198 PF: > { %s14_s14 = sadd.s32 1, %s2148_s14   ;;  %s2664_s12 = smov %s2144_s13 }
 0x199   : > { %p11_p6 = scmp.ge.s32.totalorder %s14_s14, 4   ;;  %s2665_s13 = smov %s2667_s15 }
 0x19b   :  { %13 = sbr.rel (!%p11_p6) target bundleno = 2 (0x2), region = 74 }

// kernel: generator_forward.9
= control target key start
LH: loop header
LB: loop body
LE: loop exit
PB: predicated region body
PF: predicated region fallthrough
CT: control target
= control target key end

     0   :  { %s1340_s9 = smov 0   ;;  %s1342_s10 = smov 0   ;;  %s1522_s0 = inlined_call_operand.vmem [shape: bf16[128,640], index: 0, kind: input, shape index: {}]   ;;  %s1523_s1 = inlined_call_operand.vmem [shape: bf16[640,128], index: 1, kind: input, shape index: {}]   ;;  %s1524_s2 = inlined_call_operand.vmem [shape: f32[128,128], index: 2, kind: output, shape index: {}]  }
   0x1   :  { %s1344_s11 = smov 0  }
   0x2 LB: > { %s31_s12 = sadd.s32 1, %s1319_s10  ;;  %p993_p0 = scmp.ge.s32.totalorder %s1323_s11, 1  ;;  %s1323_s11 = sphi %s1344_s11, %s12_s11   ;;  %s1319_s10 = sphi %s1342_s10, %s1526_s10   ;;  %s1315_s9 = sphi %s1340_s9, %s1525_s9  }
   0x3   : > { %p33_p1 = scmp.ge.s32.totalorder %s31_s12, 2  ;;  %p158_p2 = scmp.lt.s32.totalorder %s1323_s11, 3 }
   0x5   : > { %s1528_s12 = smov (%p33_p1, %s31_s12), 0  ;;  %p159_p3 = pnand %p993_p0, %p158_p2 }
   0x6   : > { %v1217_v0 = vld [vmem:[%s1523_s1 + $0x40] sm:$0xff] (!%p159_p3)   ;;  %v1221_v4 = vld [vmem:[%s1523_s1 + $0x48] sm:$0xff] (!%p159_p3)   ;;  %v1225_v8 = vld [vmem:[%s1523_s1 + $0x50] sm:$0xff] (!%p159_p3)   ;;  %s994_s19 = sshll.u32 (!%p159_p3), %s1315_s9, 3 }
   0x7   : > { %162 = sbr.rel (%p159_p3) target bundleno = 306 (0x132), region = 28  ;;  %v1218_v1 = vld [vmem:[%s1523_s1 + $0xc0] sm:$0xff] (!%p159_p3)   ;;  %1060 = vmatprep.subr.bf16.mxu0 (!%p159_p3), %v1217_v0  ;;  %v1222_v5 = vld [vmem:[%s1523_s1 + $0xc8] sm:$0xff] (!%p159_p3)   ;;  %v1226_v9 = vld [vmem:[%s1523_s1 + $0xd0] sm:$0xff] (!%p159_p3)   ;;  %p198_p4 = scmp.lt.s32.totalorder (!%p159_p3), %s994_s19, 15 }
   0x8   : > { %v1219_v2 = vld [vmem:[%s1523_s1] sm:$0xff] (!%p159_p3)   ;;  %1100 = vmatprep.subr.bf16.mxu1 (!%p159_p3), %v1218_v1  ;;  %v1223_v6 = vld [vmem:[%s1523_s1 + $0x8] sm:$0xff] (!%p159_p3)   ;;  %v1227_v10 = vld [vmem:[%s1523_s1 + $0x10] sm:$0xff] (!%p159_p3)  }
   0x9   : > { %v1220_v3 = vld [vmem:[%s1523_s1 + $0x80] sm:$0xff] (!%p159_p3)   ;;  %1061 = vmatpush3.bf16.msra.mxu0 (!%p159_p3), %v1219_v2  ;;  %v1224_v7 = vld [vmem:[%s1523_s1 + $0x88] sm:$0xff] (!%p159_p3)   ;;  %v1228_v11 = vld [vmem:[%s1523_s1 + $0x90] sm:$0xff] (!%p159_p3)  }
   0xa   : > { %1101 = vmatpush3.bf16.msra.mxu1 (!%p159_p3), %v1220_v3  ;;  %1062 = vmatprep.subr.bf16.mxu0 (!%p159_p3), %v1221_v4  ;;  %v1229_v12 = vld [vmem:[%s1523_s1 + $0x58] sm:$0xff] (!%p159_p3)   ;;  %v1233_v16 = vld [vmem:[%s1523_s1 + $0x60] sm:$0xff] (!%p159_p3)   ;;  %v1237_v20 = vld [vmem:[%s1523_s1 + $0x68] sm:$0xff] (!%p159_p3)  }
   0xb   : > { %1102 = vmatprep.subr.bf16.mxu1 (!%p159_p3), %v1222_v5  ;;  %v1230_v13 = vld [vmem:[%s1523_s1 + $0xd8] sm:$0xff] (!%p159_p3)   ;;  %v1234_v17 = vld [vmem:[%s1523_s1 + $0xe0] sm:$0xff] (!%p159_p3)   ;;  %v1238_v21 = vld [vmem:[%s1523_s1 + $0xe8] sm:$0xff] (!%p159_p3)  }
   0xc   : > { %v1231_v14 = vld [vmem:[%s1523_s1 + $0x18] sm:$0xff] (!%p159_p3)   ;;  %v1235_v18 = vld [vmem:[%s1523_s1 + $0x20] sm:$0xff] (!%p159_p3)   ;;  %v1239_v22 = vld [vmem:[%s1523_s1 + $0x28] sm:$0xff] (!%p159_p3)  }
   0xd   : > { %1063 = vmatpush3.bf16.msra.mxu0 (!%p159_p3), %v1223_v6  ;;  %v1232_v15 = vld [vmem:[%s1523_s1 + $0x98] sm:$0xff] (!%p159_p3)   ;;  %v1236_v19 = vld [vmem:[%s1523_s1 + $0xa0] sm:$0xff] (!%p159_p3)   ;;  %v1240_v23 = vld [vmem:[%s1523_s1 + $0xa8] sm:$0xff] (!%p159_p3)  }
   0xe   : > { %1103 = vmatpush3.bf16.msra.mxu1 %v1224_v7  ;;  %1064 = vmatprep.subr.bf16.mxu0 %v1225_v8  ;;  %s1530_s19 = smov (!%p198_p4, %s994_s19), 15  ;;  %v1241_v24 = vld [vmem:[%s1523_s1 + $0x70] sm:$0xff]   ;;  %v1245_v28 = vld [vmem:[%s1523_s1 + $0x78] sm:$0xff]   ;;  %v1255_v36 = vld [vmem:[%s1523_s1 + $0x100] sm:$0xff]  }
   0xf   : > { %1104 = vmatprep.subr.bf16.mxu1 %v1226_v9  ;;  %v1242_v25 = vld [vmem:[%s1523_s1 + $0xf0] sm:$0xff]   ;;  %s1192_s17 = smul.u32 20, %s1530_s19  ;;  %v1246_v29 = vld [vmem:[%s1523_s1 + $0xf8] sm:$0xff]   ;;  %v1256_v37 = vld [vmem:[%s1523_s1 + $0x108] sm:$0xff]   ;;  %s997_s26 = sshll.u32 %s1530_s19, 3 }
  0x10   : > { %v1243_v26 = vld [vmem:[%s1523_s1 + $0x30] sm:$0xff]   ;;  %v1247_v30 = vld [vmem:[%s1523_s1 + $0x38] sm:$0xff]   ;;  %v1271_v46 = vld [vmem:[%s1523_s1 + $0x120] sm:$0xff]  }
  0x11   : > { %1065 = vmatpush3.bf16.msra.mxu0 %v1227_v10  ;;  %v1244_v27 = vld [vmem:[%s1523_s1 + $0xb0] sm:$0xff]   ;;  %s1457_s28 = scalar_lea.vmem %s1522_s0, %s1192_s17  ;;  %v1248_v31 = vld [vmem:[%s1523_s1 + $0xb8] sm:$0xff]   ;;  %v1272_v51 = vld [vmem:[%s1523_s1 + $0x128] sm:$0xff]  }
  0x12   : > { %1105 = vmatpush3.bf16.msra.mxu1 %v1228_v11  ;;  %1066 = vmatprep.subr.bf16.mxu0 %v1229_v12  ;;  %v1249_v32 = vld [vmem:[%s1457_s28] ss:$20 sps:$4 sm:$0xff]   ;;  %v1251_v33 = vld [vmem:[%s1457_s28 + $0x4] ss:$20 sps:$4 sm:$0xff]   ;;  %v1252_v34 = vld [vmem:[%s1457_s28 + $0x8] ss:$20 sps:$4 sm:$0xff]  }
  0x13   : > { %1106 = vmatprep.subr.bf16.mxu1 %v1230_v13  ;;  %v1254_v35 = vld [vmem:[%s1457_s28 + $0xc] ss:$20 sps:$4 sm:$0xff]   ;;  %707 = vmatprep.mubr.bf16.mxu0 %v1251_v33  ;;  %v1259_v39 = vld [vmem:[%s1457_s28 + $0x34] ss:$20 sps:$4 sm:$0xff]   ;;  %v1262_v42 = vld [vmem:[%s1457_s28 + $0x30] ss:$20 sps:$4 sm:$0xff]  }
  0x14   : > { %772 = vmatprep.mubr.bf16.mxu1 %v1254_v35  ;;  %v1257_v38 = vld [vmem:[%s1457_s28 + $0x2c] ss:$20 sps:$4 sm:$0xff]   ;;  %v1261_v40 = vld [vmem:[%s1457_s28 + $0x28] ss:$20 sps:$4 sm:$0xff]   ;;  %v1263_v41 = vld [vmem:[%s1523_s1 + $0x110] sm:$0xff]  }
  0x15   : > { %1067 = vmatpush3.bf16.msra.mxu0 %v1231_v14  ;;  %v1265_v43 = vld [vmem:[%s1457_s28 + $0x54] ss:$20 sps:$4 sm:$0xff]   ;;  %v1264_v44 = vld [vmem:[%s1523_s1 + $0x118] sm:$0xff]   ;;  %v1269_v47 = vld [vmem:[%s1457_s28 + $0x50] ss:$20 sps:$4 sm:$0xff]  }
  0x16   : > { %1107 = vmatpush3.bf16.msra.mxu1 %v1232_v15  ;;  %1068 = vmatprep.subr.bf16.mxu0 %v1233_v16  ;;  %v1267_v45 = vld [vmem:[%s1457_s28 + $0x5c] ss:$20 sps:$4 sm:$0xff]   ;;  %v1270_v48 = vld [vmem:[%s1457_s28 + $0x58] ss:$20 sps:$4 sm:$0xff]   ;;  %v1278_v54 = vld [vmem:[%s1457_s28 + $0x80] ss:$20 sps:$4 sm:$0xff]  }
  0x17   : > { %1108 = vmatprep.subr.bf16.mxu1 %v1234_v17  ;;  %v1273_v49 = vld [vmem:[%s1457_s28 + $0x7c] ss:$20 sps:$4 sm:$0xff]   ;;  %v1275_v50 = vld [vmem:[%s1457_s28 + $0x84] ss:$20 sps:$4 sm:$0xff]   ;;  %v1282_v56 = vld [vmem:[%s1457_s28 + $0x60] ss:$20 sps:$4 sm:$0xff]  }
  0x18   : > { %v1279_v52 = vld [vmem:[%s1523_s1 + $0x130] sm:$0xff]   ;;  %v1277_v53 = vld [vmem:[%s1457_s28 + $0x78] ss:$20 sps:$4 sm:$0xff]   ;;  %v1284_v59 = vld [vmem:[%s1457_s28 + $0x88] ss:$20 sps:$4 sm:$0xff]  }
  0x19   : > { %1069 = vmatpush3.bf16.msra.mxu0 %v1235_v18  ;;  %v1281_v55 = vld [vmem:[%s1457_s28 + $0x10] ss:$20 sps:$4 sm:$0xff]   ;;  %v1280_v57 = vld [vmem:[%s1523_s1 + $0x138] sm:$0xff]  }
  0x1a   : > { %1109 = vmatpush3.bf16.msra.mxu1 %v1236_v19  ;;  %1070 = vmatprep.subr.bf16.mxu0 %v1237_v20  ;;  %v1283_v58 = vld [vmem:[%s1457_s28 + $0x38] ss:$20 sps:$4 sm:$0xff]   ;;  %s224_s28 = scalar_lea.vmem %s1524_s2, %s997_s26 }
  0x1b   : > { %1110 = vmatprep.subr.bf16.mxu1 %v1238_v21 }
  0x1d   : > { %1071 = vmatpush3.bf16.msra.mxu0 %v1239_v22 }
  0x1e   : > { %1111 = vmatpush3.bf16.msra.mxu1 %v1240_v23  ;;  %1072 = vmatprep.subr.bf16.mxu0 %v1241_v24 }
  0x1f   : > { %1112 = vmatprep.subr.bf16.mxu1 %v1242_v25 }
  0x21   : > { %1073 = vmatpush3.bf16.msra.mxu0 %v1243_v26 }
  0x22   : > { %1113 = vmatpush3.bf16.msra.mxu1 %v1244_v27  ;;  %1074 = vmatprep.subr.bf16.mxu0 %v1245_v28 }
  0x23   : > { %1114 = vmatprep.subr.bf16.mxu1 %v1246_v29 }
  0x25   : > { %1075 = vmatpush3.bf16.msra.mxu0 %v1247_v30 }
  0x26   : > { %1115 = vmatpush3.bf16.msra.mxu1 %v1248_v31  ;;  %1152 = vmatprep.subr.bf16.mxu0 %v1255_v36 }
  0x27   : > { %1176 = vmatprep.subr.bf16.mxu1 %v1255_v36 }
  0x28   : > { %708 = vmatmul.mubr.bf16.vlgmr.msra.gmra.mrb[0].mxu0 %v1249_v32 }
  0x29   : > { %773 = vmatmul.mubr.bf16.vlgmr.msra.gmra.mrb[0].mxu1 %v1252_v34  ;;  %1153 = vmatpush3.bf16.msra.mxu0 %v1255_v36 }
  0x2a   : > { %1184 = vmatpush3.bf16.msra.mxu1 %v1255_v36  ;;  %1154 = vmatprep.subr.bf16.mxu0 %v1256_v37 }
  0x2b   : > { %1177 = vmatprep.subr.bf16.mxu1 %v1256_v37  ;;  %715 = vmatprep.mubr.bf16.mxu0 %v1257_v38 }
  0x2c   : > { %780 = vmatprep.mubr.bf16.mxu1 %v1259_v39 }
  0x2d   : > { %1155 = vmatpush3.bf16.msra.mxu0 %v1256_v37 }
  0x2e   : > { %1185 = vmatpush3.bf16.msra.mxu1 %v1256_v37  ;;  %1156 = vmatprep.subr.bf16.mxu0 %v1263_v41 }
  0x2f   : > { %1178 = vmatprep.subr.bf16.mxu1 %v1263_v41 }
  0x30   : > { %716 = vmatmul.mubr.bf16.gmra.mrb[4].mxu0 %v1261_v40 }
  0x31   : > { %781 = vmatmul.mubr.bf16.gmra.mrb[4].mxu1 %v1262_v42  ;;  %723 = vmatprep.mubr.bf16.mxu0 %v1265_v43 }
  0x32   : > { %1157 = vmatpush3.bf16.msra.mxu0 %v1263_v41  ;;  %788 = vmatprep.mubr.bf16.mxu1 %v1267_v45 }
  0x33   : > { %1186 = vmatpush3.bf16.msra.mxu1 %v1263_v41  ;;  %1158 = vmatprep.subr.bf16.mxu0 %v1264_v44 }
  0x34   : > { %1179 = vmatprep.subr.bf16.mxu1 %v1264_v44 }
  0x36   : > { %1159 = vmatpush3.bf16.msra.mxu0 %v1264_v44 }
  0x37   : > { %1187 = vmatpush3.bf16.msra.mxu1 %v1264_v44  ;;  %1160 = vmatprep.subr.bf16.mxu0 %v1271_v46 }
  0x38   : > { %724 = vmatmul.mubr.bf16.gmra.mrb[8].mxu0 %v1269_v47  ;;  %1180 = vmatprep.subr.bf16.mxu1 %v1271_v46 }
  0x39   : > { %789 = vmatmul.mubr.bf16.gmra.mrb[8].mxu1 %v1270_v48  ;;  %731 = vmatprep.mubr.bf16.mxu0 %v1273_v49 }
  0x3a   : > { %1161 = vmatpush3.bf16.msra.mxu0 %v1271_v46  ;;  %796 = vmatprep.mubr.bf16.mxu1 %v1275_v50 }
  0x3b   : > { %1188 = vmatpush3.bf16.msra.mxu1 %v1271_v46  ;;  %1162 = vmatprep.subr.bf16.mxu0 %v1272_v51 }
  0x3c   : > { %1181 = vmatprep.subr.bf16.mxu1 %v1272_v51 }
  0x3e   : > { %1163 = vmatpush3.bf16.msra.mxu0 %v1272_v51 }
  0x3f   : > { %1189 = vmatpush3.bf16.msra.mxu1 %v1272_v51  ;;  %1164 = vmatprep.subr.bf16.mxu0 %v1279_v52 }
  0x40   : > { %732 = vmatmul.mubr.bf16.gmra.mrb[12].mxu0 %v1277_v53  ;;  %1182 = vmatprep.subr.bf16.mxu1 %v1279_v52 }
  0x41   : > { %797 = vmatmul.mubr.bf16.gmra.mrb[12].mxu1 %v1278_v54  ;;  %1168 = vmatprep.mubr.bf16.mxu0 %v1281_v55 }
  0x42   : > { %1165 = vmatpush3.bf16.msra.mxu0 %v1279_v52  ;;  %1172 = vmatprep.mubr.bf16.mxu1 %v1282_v56 }
  0x43   : > { %1190 = vmatpush3.bf16.msra.mxu1 %v1279_v52  ;;  %1166 = vmatprep.subr.bf16.mxu0 %v1280_v57 }
  0x44   : > { %1183 = vmatprep.subr.bf16.mxu1 %v1280_v57 }
  0x46   : > { %1167 = vmatpush3.bf16.msra.mxu0 %v1280_v57 }
  0x47   : > { %1191 = vmatpush3.bf16.msra.mxu1 %v1280_v57 }
  0x49   : > { %1169 = vmatmul.mubr.bf16.vlgmr.msra.gmra.mrb[16].mxu0 %v1283_v58 }
  0x4a   : > { %1173 = vmatmul.mubr.bf16.vlgmr.msra.gmra.mrb[16].mxu1 %v1284_v59 }
  0xfb   : > { %v1076_v60 = vpop.f32.mrb[0].mxu0 }
  0xfc   : > { %v1116_v61 = vpop.f32.mrb[0].mxu1  ;;  %v1077_v62 = vpop.f32.mrb[1].mxu0 }
  0xfd   : > { %v1078_v63 = vadd.f32 %v1077_v62, %v1076_v60  ;;  %v1117_v0 = vpop.f32.mrb[1].mxu1  ;;  %v1079_v1 = vpop.f32.mrb[2].mxu0 }
  0xfe   : > { %v1118_v2 = vadd.f32 %v1117_v0, %v1116_v61  ;;  %v1119_v3 = vpop.f32.mrb[2].mxu1  ;;  %v1080_v4 = vpop.f32.mrb[3].mxu0 }
  0xff   : > { %v1081_v5 = vadd.f32 %v1080_v4, %v1079_v1  ;;  %v1120_v6 = vpop.f32.mrb[3].mxu1 }
 0x100   : > { %v1121_v7 = vadd.f32 %v1120_v6, %v1119_v3  ;;  %v775_v8 = vadd.f32 %v1118_v2, %v1078_v63 }
 0x102   : > { %v778_v9 = vadd.f32 %v1121_v7, %v1081_v5 }
 0x103   : > { %v1082_v10 = vpop.f32.mrb[4].mxu0 }
 0x104   : > { %v1122_v11 = vpop.f32.mrb[4].mxu1  ;;  %v1083_v12 = vpop.f32.mrb[5].mxu0 }
 0x105   : > { %v1084_v13 = vadd.f32 %v1083_v12, %v1082_v10  ;;  %v1123_v14 = vpop.f32.mrb[5].mxu1  ;;  %v1085_v15 = vpop.f32.mrb[6].mxu0 }
 0x106   : > { %v1124_v16 = vadd.f32 %v1123_v14, %v1122_v11  ;;  %v1125_v17 = vpop.f32.mrb[6].mxu1  ;;  %v1086_v18 = vpop.f32.mrb[7].mxu0 }
 0x107   : > { %v1087_v19 = vadd.f32 %v1086_v18, %v1085_v15  ;;  %v1126_v20 = vpop.f32.mrb[7].mxu1 }
 0x108   : > { %v1127_v21 = vadd.f32 %v1126_v20, %v1125_v17  ;;  %v783_v22 = vadd.f32 %v1124_v16, %v1084_v13 }
 0x10a   : > { %v786_v23 = vadd.f32 %v1127_v21, %v1087_v19 }
 0x10b   : > { %v1088_v24 = vpop.f32.mrb[8].mxu0 }
 0x10c   : > { %v1128_v25 = vpop.f32.mrb[8].mxu1  ;;  %v1089_v26 = vpop.f32.mrb[9].mxu0 }
 0x10d   : > { %v1090_v27 = vadd.f32 %v1089_v26, %v1088_v24  ;;  %v1129_v28 = vpop.f32.mrb[9].mxu1  ;;  %v1091_v29 = vpop.f32.mrb[10].mxu0 }
 0x10e   : > { %v1130_v30 = vadd.f32 %v1129_v28, %v1128_v25  ;;  %v1131_v31 = vpop.f32.mrb[10].mxu1  ;;  %v1092_v32 = vpop.f32.mrb[11].mxu0 }
 0x10f   : > { %v1093_v33 = vadd.f32 %v1092_v32, %v1091_v29  ;;  %v1132_v34 = vpop.f32.mrb[11].mxu1 }
 0x110   : > { %v1133_v35 = vadd.f32 %v1132_v34, %v1131_v31  ;;  %v791_v36 = vadd.f32 %v1130_v30, %v1090_v27 }
 0x112   : > { %v794_v37 = vadd.f32 %v1133_v35, %v1093_v33 }
 0x113   : > { %v1094_v38 = vpop.f32.mrb[12].mxu0 }
 0x114   : > { %v1134_v39 = vpop.f32.mrb[12].mxu1  ;;  %v1095_v40 = vpop.f32.mrb[13].mxu0 }
 0x115   : > { %v1096_v41 = vadd.f32 %v1095_v40, %v1094_v38  ;;  %v1135_v42 = vpop.f32.mrb[13].mxu1  ;;  %v1097_v43 = vpop.f32.mrb[14].mxu0 }
 0x116   : > { %v1136_v44 = vadd.f32 %v1135_v42, %v1134_v39  ;;  %v1137_v45 = vpop.f32.mrb[14].mxu1  ;;  %v1098_v46 = vpop.f32.mrb[15].mxu0 }
 0x117   : > { %v1099_v47 = vadd.f32 %v1098_v46, %v1097_v43  ;;  %v1138_v48 = vpop.f32.mrb[15].mxu1 }
 0x118   : > { %v1139_v49 = vadd.f32 %v1138_v48, %v1137_v45  ;;  %v799_v50 = vadd.f32 %v1136_v44, %v1096_v41 }
 0x11a   : > { %v802_v51 = vadd.f32 %v1139_v49, %v1099_v47 }
 0x11c   : > { %v1170_v52 = vpop.f32.mrb[16].mxu0 }
 0x11d   : > { %v848_v53 = vadd.f32 %v1170_v52, %v783_v22  ;;  %v1174_v54 = vpop.f32.mrb[16].mxu1  ;;  %v839_v55 = vpop.f32.mrb[17].mxu0 }
 0x11e   : > { %v864_v56 = vadd.f32 %v1174_v54, %v799_v50  ;;  %v840_v57 = vadd.f32 %v839_v55, %v775_v8  ;;  %v855_v58 = vpop.f32.mrb[17].mxu1  ;;  %v1171_v59 = vpop.f32.mrb[18].mxu0 }
 0x11f   : > { %1285 = vtanh.f32 %v848_v53  ;;  %v856_v60 = vadd.f32 %v855_v58, %v791_v36  ;;  %v851_v61 = vadd.f32 %v1171_v59, %v786_v23  ;;  %v1175_v62 = vpop.f32.mrb[18].mxu1  ;;  %v842_v63 = vpop.f32.mrb[19].mxu0 }
 0x120   : > { %1287 = vtanh.f32 %v864_v56  ;;  %v867_v0 = vadd.f32 %v1175_v62, %v802_v51  ;;  %v843_v1 = vadd.f32 %v842_v63, %v778_v9  ;;  %v858_v2 = vpop.f32.mrb[19].mxu1 }
 0x121   : > { %1289 = vtanh.f32 %v840_v57  ;;  %v859_v3 = vadd.f32 %v858_v2, %v794_v37 }
 0x122   : > { %1291 = vtanh.f32 %v856_v60 }
 0x123   : > { %1293 = vtanh.f32 %v851_v61 }
 0x124   : > { %1295 = vtanh.f32 %v867_v0 }
 0x125   : > { %1297 = vtanh.f32 %v843_v1 }
 0x126   : > { %1299 = vtanh.f32 %v859_v3 }
 0x129   : > { %v1286_v4 = vpop.eup %1285 }
 0x12a   : > { %v1288_v5 = vpop.eup %1287  ;;  %880 = vst [vmem:[%s224_s28 + $0x10] sm:$0xff] %v1286_v4 }
 0x12b   : > { %v1290_v6 = vpop.eup %1289  ;;  %884 = vst [vmem:[%s224_s28 + $0x30] sm:$0xff] %v1288_v5 }
 0x12c   : > { %v1292_v7 = vpop.eup %1291  ;;  %878 = vst [vmem:[%s224_s28] sm:$0xff] %v1290_v6 }
 0x12d   : > { %v1294_v8 = vpop.eup %1293  ;;  %882 = vst [vmem:[%s224_s28 + $0x20] sm:$0xff] %v1292_v7 }
 0x12e   : > { %v1296_v9 = vpop.eup %1295  ;;  %881 = vst [vmem:[%s224_s28 + $0x18] sm:$0xff] %v1294_v8 }
 0x12f   : > { %v1298_v10 = vpop.eup %1297  ;;  %885 = vst [vmem:[%s224_s28 + $0x38] sm:$0xff] %v1296_v9 }
 0x130   : > { %v1300_v11 = vpop.eup %1299  ;;  %879 = vst [vmem:[%s224_s28 + $0x8] sm:$0xff] %v1298_v10 }
 0x131   : > { %883 = vst [vmem:[%s224_s28 + $0x28] sm:$0xff] %v1300_v11 }
 0x132 PF: > { %s12_s11 = sadd.s32 1, %s1323_s11   ;;  %s1525_s9 = smov %s1319_s10 }
 0x133   : > { %p9_p5 = scmp.ge.s32.totalorder %s12_s11, 4   ;;  %s1526_s10 = smov %s1528_s12 }
 0x135   :  { %11 = sbr.rel (!%p9_p5) target bundleno = 2 (0x2), region = 61 }

</bundles_post_ra>
